<compile_context>
chip_gen: v6e
topology: v6e:2x2x1
jax: 0.10.0
libtpu: 0.0.40
codegen_flags: <defaults>
</compile_context>

<pallas_src>
import math

import jax
import jax.numpy as jnp
from jax.experimental import pallas as pl
from jax.experimental.pallas import tpu as pltpu


# ----------------------------------------------------------------------------
# Pallas helpers
# ----------------------------------------------------------------------------
def _full_spec(shape):
    nd = len(shape)
    return pl.BlockSpec(shape, lambda i, nd=nd: (0,) * nd)


# ----------------------------------------------------------------------------
# Weight repacking (PyTorch conv layouts -> matmul layouts), done once at init
# ----------------------------------------------------------------------------
def _conv3x3_to_mat(w):
    # [Cout, Cin, kh, kw] -> [kh*kw*Cin, Cout], rows ordered (i, j, cin)
    Cout, Cin, kh, kw = w.shape
    return w.transpose(2, 3, 1, 0).reshape(kh * kw * Cin, Cout)


def _conv1x1_to_mat(w):
    return w.reshape(w.shape[0], w.shape[1]).T        # [Cin, Cout]


# ----------------------------------------------------------------------------
# The single fused kernel (closure over the static problem dimensions)
# ----------------------------------------------------------------------------
def _make_fused_kernel(B, H1, W1, H2, W2, C1, C2, V, D):

    def kernel(col1_ref, pts_ref,
               w1_ref, b1_ref, wh1_ref, bh1_ref, wf1a_ref, wf1b_ref, bf1_ref,
               w2_ref, b2_ref, wh2_ref, bh2_ref, wf2a_ref, wf2b_ref, bf2_ref,
               wgf_ref, bgf_ref,
               pos_ref, adj_ref, wg_ref, bg_ref, wv_ref, bv_ref,
               wst_ref, bst_ref, wp_ref, bp_ref,
               slab1_ref, fused2_ref, dec_ref, st_ref, pfeat_ref):
        f32, bf16 = jnp.float32, jnp.bfloat16

        def mm(a, b):
            return jnp.dot(a.astype(bf16), b, preferred_element_type=f32)

        # ---- stage 1: conv1 (3x3 s2, im2col'd at the module boundary) -------
        # rows of col1 / x1 are ordered (h1, w1, b)
        x1 = jnp.maximum(mm(col1_ref[...], w1_ref[...]) + b1_ref[...], 0.0)
        heads1 = mm(x1, wh1_ref[...]) + bh1_ref[...]          # [M1, 2*C1 + 11]
        rel1 = jnp.maximum(heads1[:, 0:2 * C1], 0.0)          # [hms_f1 | dp_f1]
        seg = jax.nn.sigmoid(heads1[:, 2 * C1:2 * C1 + 11])   # [hms|mask|dp]
        fused1 = jnp.maximum(
            mm(x1, wf1a_ref[...]) + mm(rel1, wf1b_ref[...]) + bf1_ref[...],
            0.0)
        slab1_ref[...] = jnp.concatenate([seg, fused1], axis=1)   # lane-dense

        # ---- stage 2: conv2 (3x3 s2 pad1), im2col built in VMEM from f1 -----
        # (h, w, b, c) ordering keeps every slice / zero-pad on non-minor dims.
        x1s = x1.reshape(H1, W1, B, C1).reshape(H1 // 2, 2, W1, B, C1)
        z_h = jnp.zeros((1, W1, B, C1), f32)
        h_taps = [
            jnp.concatenate([z_h, x1s[0:H1 // 2 - 1, 1]], axis=0),  # ki = 0
            x1s[:, 0],                                              # ki = 1
            x1s[:, 1],                                              # ki = 2
        ]
        z_w = jnp.zeros((H2, 1, B, C1), f32)
        patches = []
        for ki in range(3):
            hv = h_taps[ki].reshape(H2, W1 // 2, 2, B, C1)
            w_taps = [
                jnp.concatenate([z_w, hv[:, 0:W1 // 2 - 1, 1]], axis=1),
                hv[:, :, 0],
                hv[:, :, 1],
            ]
            for kj in range(3):
                patches.append(w_taps[kj])                 # (H2, W2, B, C1)
        col2 = jnp.concatenate(patches, axis=-1).reshape(H2 * W2 * B, 9 * C1)

        x2 = jnp.maximum(mm(col2, w2_ref[...]) + b2_ref[...], 0.0)   # [M2, C2]
        heads2 = jnp.maximum(mm(x2, wh2_ref[...]) + bh2_ref[...], 0.0)
        fused2 = jnp.maximum(
            mm(x2, wf2a_ref[...]) + mm(heads2, wf2b_ref[...]) + bf2_ref[...],
            0.0)
        fused2_ref[...] = fused2

        # ---- global average pool as an in-kernel reduction + global feats ---
        gf = jnp.mean(fused2.reshape(H2 * W2, B, C2), axis=0)        # [B, C2]
        glr = jnp.maximum(mm(gf, wgf_ref[...]) + bgf_ref[...], 0.0)  # [B, 2D]
        gl, gr = glr[:, 0:D], glr[:, D:2 * D]

        # ---- GCN decoder: per-batch [V, V] adjacency (no block-diag kron) ---
        def gcn_branch(g, idx):
            vf = (g[:, None, :] + pos_ref[idx][None, :, :]).reshape(B * V, D)
            h = jnp.maximum(mm(vf, wg_ref[idx]) + bg_ref[idx], 0.0)
            adj_b = jnp.broadcast_to(adj_ref[idx].astype(bf16)[None],
                                     (B, V, V))
            feat = jax.lax.dot_general(
                adj_b, h.reshape(B, V, D).astype(bf16),
                dimension_numbers=(((2,), (1,)), ((0,), (0,))),
                preferred_element_type=f32).reshape(B * V, D)
            verts = mm(feat, wv_ref[...]) + bv_ref[...]
            return verts, feat

        verts_l, feat_l = gcn_branch(gl, 0)
        verts_r, feat_r = gcn_branch(gr, 1)
        dec_ref[...] = jnp.concatenate([verts_l, verts_r, feat_l, feat_r],
                                       axis=1)

        # fused [scale(1)|trans2d(2)] heads + point-branch MLP
        st_ref[...] = jnp.concatenate(
            [mm(gl, wst_ref[...]) + bst_ref[...],
             mm(gr, wst_ref[...]) + bst_ref[...]], axis=1)
        pfeat_ref[...] = jnp.maximum(
            mm(pts_ref[...], wp_ref[...]) + bp_ref[...], 0.0)

    return kernel


# ----------------------------------------------------------------------------
# Deterministic synthetic parameters (encoder / mid_model / decoder), packed
# once into the layouts the fused kernel wants.
# ----------------------------------------------------------------------------
def init_params(key):
    ks = iter(jax.random.split(key, 32))

    def w(shape, scale=0.1):
        return scale * jax.random.normal(next(ks), shape, jnp.float32)

    V, D = 8, 32
    bf = jnp.bfloat16

    enc_conv1_w = w((8, 3, 3, 3))
    enc_conv2_w = w((16, 8, 3, 3))
    hms_head_w, mask_head_w, dp_head_w = w((6, 8, 1, 1)), w((2, 8, 1, 1)), w((3, 8, 1, 1))
    hms_f1_w, dp_f1_w = w((8, 8, 1, 1)), w((8, 8, 1, 1))
    hms_f2_w, dp_f2_w = w((16, 16, 1, 1)), w((16, 16, 1, 1))
    point_w = w((4, 16))
    fuse1_w, fuse2_w = w((8, 24, 1, 1)), w((16, 48, 1, 1))
    gf_left_w, gf_right_w = w((16, D)), w((16, D))
    pos_emb_left, pos_emb_right = w((V, D)), w((V, D))
    gcn_w_left, gcn_w_right = w((D, D)), w((D, D))
    vert_out_w = w((D, 3))
    scale_w, trans_w = w((D, 1)), w((D, 2))

    fuse1_m = _conv1x1_to_mat(fuse1_w)     # [24, 8]  rows: f1|hms_f1|dp_f1
    fuse2_m = _conv1x1_to_mat(fuse2_w)     # [48, 16] rows: f2|hms_f2|dp_f2

    p = {
        "w1": _conv3x3_to_mat(enc_conv1_w).astype(bf),            # [27, 8]
        "b1": jnp.zeros((1, 8), jnp.float32),
        # fused f1 heads, ReLU branches first (lane-0 aligned for the MXU),
        # sigmoid heads at the tail: [hms_f1(8)|dp_f1(8)|hms(6)|mask(2)|dp(3)]
        "wh1": jnp.concatenate(
            [_conv1x1_to_mat(hms_f1_w), _conv1x1_to_mat(dp_f1_w),
             _conv1x1_to_mat(hms_head_w), _conv1x1_to_mat(mask_head_w),
             _conv1x1_to_mat(dp_head_w)], axis=1).astype(bf),     # [8, 27]
        "bh1": jnp.zeros((1, 27), jnp.float32),
        "wf1a": fuse1_m[0:8].astype(bf),                          # [8, 8]
        "wf1b": fuse1_m[8:24].astype(bf),                         # [16, 8]
        "bf1": jnp.zeros((1, 8), jnp.float32),
        "w2": _conv3x3_to_mat(enc_conv2_w).astype(bf),            # [72, 16]
        "b2": jnp.zeros((1, 16), jnp.float32),
        "wh2": jnp.concatenate(
            [_conv1x1_to_mat(hms_f2_w), _conv1x1_to_mat(dp_f2_w)],
            axis=1).astype(bf),                                   # [16, 32]
        "bh2": jnp.zeros((1, 32), jnp.float32),
        "wf2a": fuse2_m[0:16].astype(bf),                         # [16, 16]
        "wf2b": fuse2_m[16:48].astype(bf),                        # [32, 16]
        "bf2": jnp.zeros((1, 16), jnp.float32),
        "wgf": jnp.concatenate([gf_left_w, gf_right_w], axis=1).astype(bf),
        "bgf": jnp.zeros((1, 2 * D), jnp.float32),
        "pos_emb": jnp.stack([pos_emb_left, pos_emb_right]),      # [2, V, D]
        "wg": jnp.stack([gcn_w_left, gcn_w_right]).astype(bf),    # [2, D, D]
        "bg": jnp.zeros((2, 1, D), jnp.float32),
        "wv": vert_out_w.astype(bf), "bv": jnp.zeros((1, 3), jnp.float32),
        # TODO(synk): real IntagHand uses separate per-hand scale/trans/vert
        # heads; this synthetic decoder shares them across hands.
        "wst": jnp.concatenate([scale_w, trans_w], axis=1).astype(bf),
        "bst": jnp.zeros((1, 3), jnp.float32),
        "wp": point_w.astype(bf), "bp": jnp.zeros((1, 16), jnp.float32),
    }

    # TODO(synk): real IntagHand converters are MANO mesh-converter objects;
    # represented here as row-normalized adjacency matrices.
    adj_l = jnp.abs(w((V, V))) + jnp.eye(V)
    adj_r = jnp.abs(w((V, V))) + jnp.eye(V)
    adj_l = adj_l / jnp.sum(adj_l, axis=-1, keepdims=True)
    adj_r = adj_r / jnp.sum(adj_r, axis=-1, keepdims=True)
    p["converter"] = {"left": adj_l, "right": adj_r}
    p["adj"] = jnp.stack([adj_l, adj_r])                          # [2, V, V]
    return p


# ----------------------------------------------------------------------------
# HandNET_GCN.forward equivalent (ONE fused Pallas launch)
# ----------------------------------------------------------------------------
def handnet_gcn_forward(p, img, choose, cloud, depth, ind, K_new, valid):
    B, Cimg, H, W = img.shape
    V, D = p["pos_emb"].shape[1], p["pos_emb"].shape[2]
    C1, C2 = p["w1"].shape[1], p["w2"].shape[1]
    H1, W1 = H // 2, W // 2
    H2, W2 = H1 // 2, W1 // 2
    N = cloud.shape[1]

    # -------- host-side boundary glue ---------------------------------------
    # im2col for conv1 on the raw input image (rows ordered (h1, w1, b)).
    # TODO(synk): at real resolutions move this in-kernel too (like conv2).
    x = jnp.transpose(img, (2, 3, 0, 1))                  # [H, W, B, C]
    xp = jnp.pad(x, ((1, 1), (1, 1), (0, 0), (0, 0)))
    cols = []
    for i in range(3):
        for j in range(3):
            cols.append(xp[i:i + 2 * H1:2, j:j + 2 * W1:2])
    col1 = jnp.concatenate(cols, axis=-1).reshape(H1 * W1 * B, 9 * Cimg)

    # point branch: data-dependent depth gather + tiny camera einsum stay in
    # XLA.  TODO(synk): no clean Pallas equivalent for the per-batch gather.
    depth_flat = depth.reshape(B, -1)
    picked = jnp.take_along_axis(depth_flat, choose, axis=1)[..., None]
    pts2d = jnp.concatenate([cloud, picked], axis=-1).reshape(B * N, -1)
    cloud_cam = jnp.einsum("bnc,bkc->bnk", cloud, K_new) * valid[:, None, None]
    ret = {"cloud_cam": cloud_cam, "ind": ind}
    if "point2mano_left" in ret:   # mirrors HandNET_GCN.forward (never taken)
        return ret

    # -------- the single fused kernel ---------------------------------------
    kernel = _make_fused_kernel(B, H1, W1, H2, W2, C1, C2, V, D)
    ins = [col1, pts2d,
           p["w1"], p["b1"], p["wh1"], p["bh1"], p["wf1a"], p["wf1b"], p["bf1"],
           p["w2"], p["b2"], p["wh2"], p["bh2"], p["wf2a"], p["wf2b"], p["bf2"],
           p["wgf"], p["bgf"],
           p["pos_emb"], p["adj"], p["wg"], p["bg"], p["wv"], p["bv"],
           p["wst"], p["bst"], p["wp"], p["bp"]]

    M1, M2 = H1 * W1 * B, H2 * W2 * B
    out_shapes = [(M1, 11 + C1), (M2, C2), (B * V, 6 + 2 * D), (B, 6),
                  (B * N, 16)]

    flops = 2 * (
        M1 * (9 * Cimg * C1 + C1 * (2 * C1 + 11) + C1 * C1 + 2 * C1 * C1)
        + M2 * (9 * C1 * C2 + C2 * 2 * C2 + C2 * C2 + 2 * C2 * C2)
        + B * C2 * 2 * D
        + 2 * (B * V * D * D + B * V * V * D + B * V * D * 3 + B * D * 3)
        + B * N * 4 * 16)
    bytes_accessed = (sum(int(a.size) * a.dtype.itemsize for a in ins)
                      + sum(4 * int(math.prod(s)) for s in out_shapes))

    slab1, fused2_flat, dec, st, pfeat = pl.pallas_call(
        kernel,
        out_shape=tuple(jax.ShapeDtypeStruct(s, jnp.float32)
                        for s in out_shapes),
        grid=(1,),
        in_specs=[_full_spec(a.shape) for a in ins],
        out_specs=tuple(_full_spec(s) for s in out_shapes),
        compiler_params=pltpu.CompilerParams(
            dimension_semantics=("arbitrary",)),
        cost_estimate=pl.CostEstimate(
            flops=int(flops), transcendentals=int(M1 * 11),
            bytes_accessed=int(bytes_accessed)),
    )(*ins)

    # -------- unpack the lane-dense slabs (tiny XLA glue) -------------------
    sA = slab1.reshape(H1, W1, B, 11 + C1).transpose(2, 3, 0, 1)  # NCHW
    hms, mask, dp = sA[:, 0:6], sA[:, 6:8], sA[:, 8:11]
    fused1 = sA[:, 11:11 + C1]
    fused2 = fused2_flat.reshape(H2, W2, B, C2).transpose(2, 3, 0, 1)

    verts_l = dec[:, 0:3].reshape(B, V, 3)
    verts_r = dec[:, 3:6].reshape(B, V, 3)
    feat_l = dec[:, 6:6 + D].reshape(B, V, D)
    feat_r = dec[:, 6 + D:6 + 2 * D].reshape(B, V, D)

    ret["point_feat"] = pfeat.reshape(B, N, 16)

    result = {"verts3d": {"left": verts_l, "right": verts_r}}
    paramsDict = {
        "scale_left": st[:, 0:1], "trans2d_left": st[:, 1:3],
        "scale_right": st[:, 3:4], "trans2d_right": st[:, 4:6],
    }
    handDictList = [{"verts3d": {"left": verts_l, "right": verts_r}}]
    otherInfo = {
        "vert_feat_left": feat_l,
        "vert_feat_right": feat_r,
        "fmaps": [fused1, fused2],
    }
    if hms is not None:
        otherInfo["hms"] = hms
    if mask is not None:
        otherInfo["mask"] = mask
    if dp is not None:
        otherInfo["dense"] = dp
    if ret is not None:
        otherInfo["ret"] = ret
    converter = {}
    for hand_type in ["left", "right"]:
        converter[hand_type] = p["converter"][hand_type]
    otherInfo["converter_left"] = converter["left"]
    otherInfo["converter_right"] = converter["right"]
    return (result, paramsDict, handDictList, otherInfo)


# ----------------------------------------------------------------------------
# Main
# ----------------------------------------------------------------------------
if __name__ == "__main__":
    key = jax.random.PRNGKey(0)
    k_img, k_depth, k_cloud, k_K, k_choose = jax.random.split(key, 5)
    B, H, W, N = 2, 16, 16, 8

    img = jax.random.normal(k_img, (B, 3, H, W), jnp.float32)     # NCHW
    depth = jax.random.normal(k_depth, (B, 1, H, W), jnp.float32)
    choose = jax.random.randint(k_choose, (B, N), 0, H * W)
    cloud = jax.random.normal(k_cloud, (B, N, 3), jnp.float32)
    ind = jnp.arange(B, dtype=jnp.int32)
    K_new = (jnp.broadcast_to(jnp.eye(3, dtype=jnp.float32), (B, 3, 3))
             + 0.01 * jax.random.normal(k_K, (B, 3, 3), jnp.float32))
    valid = jnp.ones((B,), jnp.float32)

    params = init_params(jax.random.PRNGKey(42))

    fwd = jax.jit(handnet_gcn_forward)
    result, paramsDict, handDictList, otherInfo = fwd(
        params, img, choose, cloud, depth, ind, K_new, valid)

    jax.block_until_ready(result["verts3d"]["left"])
    jax.block_until_ready(result["verts3d"]["right"])
    jax.block_until_ready(otherInfo["hms"])
    jax.block_until_ready(otherInfo["mask"])
    jax.block_until_ready(otherInfo["dense"])
    jax.block_until_ready(otherInfo["fmaps"][0])
    jax.block_until_ready(otherInfo["fmaps"][1])
    jax.block_until_ready(otherInfo["ret"]["point_feat"])
    jax.block_until_ready(paramsDict["trans2d_left"])
    print("KERNEL_OK")
</pallas_src>

<mosaic_0001>
module attributes {stable_mosaic.version = 11 : i64} {
  func.func @kernel(%arg0: i32, %arg1: memref<128x27xf32, #tpu.memory_space<vmem>>, %arg2: memref<16x4xf32, #tpu.memory_space<vmem>>, %arg3: memref<27x8xbf16, #tpu.memory_space<vmem>>, %arg4: memref<1x8xf32, #tpu.memory_space<vmem>>, %arg5: memref<8x27xbf16, #tpu.memory_space<vmem>>, %arg6: memref<1x27xf32, #tpu.memory_space<vmem>>, %arg7: memref<8x8xbf16, #tpu.memory_space<vmem>>, %arg8: memref<16x8xbf16, #tpu.memory_space<vmem>>, %arg9: memref<1x8xf32, #tpu.memory_space<vmem>>, %arg10: memref<72x16xbf16, #tpu.memory_space<vmem>>, %arg11: memref<1x16xf32, #tpu.memory_space<vmem>>, %arg12: memref<16x32xbf16, #tpu.memory_space<vmem>>, %arg13: memref<1x32xf32, #tpu.memory_space<vmem>>, %arg14: memref<16x16xbf16, #tpu.memory_space<vmem>>, %arg15: memref<32x16xbf16, #tpu.memory_space<vmem>>, %arg16: memref<1x16xf32, #tpu.memory_space<vmem>>, %arg17: memref<16x64xbf16, #tpu.memory_space<vmem>>, %arg18: memref<1x64xf32, #tpu.memory_space<vmem>>, %arg19: memref<2x8x32xf32, #tpu.memory_space<vmem>>, %arg20: memref<2x8x8xf32, #tpu.memory_space<vmem>>, %arg21: memref<2x32x32xbf16, #tpu.memory_space<vmem>>, %arg22: memref<2x1x32xf32, #tpu.memory_space<vmem>>, %arg23: memref<32x3xbf16, #tpu.memory_space<vmem>>, %arg24: memref<1x3xf32, #tpu.memory_space<vmem>>, %arg25: memref<32x3xbf16, #tpu.memory_space<vmem>>, %arg26: memref<1x3xf32, #tpu.memory_space<vmem>>, %arg27: memref<4x16xbf16, #tpu.memory_space<vmem>>, %arg28: memref<1x16xf32, #tpu.memory_space<vmem>>, %arg29: memref<128x19xf32, #tpu.memory_space<vmem>>, %arg30: memref<32x16xf32, #tpu.memory_space<vmem>>, %arg31: memref<16x70xf32, #tpu.memory_space<vmem>>, %arg32: memref<2x6xf32, #tpu.memory_space<vmem>>, %arg33: memref<16x16xf32, #tpu.memory_space<vmem>>) attributes {dimension_semantics = [#tpu.dimension_semantics<arbitrary>], iteration_bounds = array<i64: 1>, scalar_prefetch = 0 : i64, scratch_operands = 0 : i64, tpu.core_type = #tpu.core_type<tc>, window_params = [{pipeline_mode = #tpu.pipeline_mode<synchronous>, transform_indices = @transform_0, window_bounds = array<i64: 128, 27>}, {pipeline_mode = #tpu.pipeline_mode<synchronous>, transform_indices = @transform_1, window_bounds = array<i64: 16, 4>}, {pipeline_mode = #tpu.pipeline_mode<synchronous>, transform_indices = @transform_2, window_bounds = array<i64: 27, 8>}, {pipeline_mode = #tpu.pipeline_mode<synchronous>, transform_indices = @transform_3, window_bounds = array<i64: 1, 8>}, {pipeline_mode = #tpu.pipeline_mode<synchronous>, transform_indices = @transform_4, window_bounds = array<i64: 8, 27>}, {pipeline_mode = #tpu.pipeline_mode<synchronous>, transform_indices = @transform_5, window_bounds = array<i64: 1, 27>}, {pipeline_mode = #tpu.pipeline_mode<synchronous>, transform_indices = @transform_6, window_bounds = array<i64: 8, 8>}, {pipeline_mode = #tpu.pipeline_mode<synchronous>, transform_indices = @transform_7, window_bounds = array<i64: 16, 8>}, {pipeline_mode = #tpu.pipeline_mode<synchronous>, transform_indices = @transform_8, window_bounds = array<i64: 1, 8>}, {pipeline_mode = #tpu.pipeline_mode<synchronous>, transform_indices = @transform_9, window_bounds = array<i64: 72, 16>}, {pipeline_mode = #tpu.pipeline_mode<synchronous>, transform_indices = @transform_10, window_bounds = array<i64: 1, 16>}, {pipeline_mode = #tpu.pipeline_mode<synchronous>, transform_indices = @transform_11, window_bounds = array<i64: 16, 32>}, {pipeline_mode = #tpu.pipeline_mode<synchronous>, transform_indices = @transform_12, window_bounds = array<i64: 1, 32>}, {pipeline_mode = #tpu.pipeline_mode<synchronous>, transform_indices = @transform_13, window_bounds = array<i64: 16, 16>}, {pipeline_mode = #tpu.pipeline_mode<synchronous>, transform_indices = @transform_14, window_bounds = array<i64: 32, 16>}, {pipeline_mode = #tpu.pipeline_mode<synchronous>, transform_indices = @transform_15, window_bounds = array<i64: 1, 16>}, {pipeline_mode = #tpu.pipeline_mode<synchronous>, transform_indices = @transform_16, window_bounds = array<i64: 16, 64>}, {pipeline_mode = #tpu.pipeline_mode<synchronous>, transform_indices = @transform_17, window_bounds = array<i64: 1, 64>}, {pipeline_mode = #tpu.pipeline_mode<synchronous>, transform_indices = @transform_18, window_bounds = array<i64: 2, 8, 32>}, {pipeline_mode = #tpu.pipeline_mode<synchronous>, transform_indices = @transform_19, window_bounds = array<i64: 2, 8, 8>}, {pipeline_mode = #tpu.pipeline_mode<synchronous>, transform_indices = @transform_20, window_bounds = array<i64: 2, 32, 32>}, {pipeline_mode = #tpu.pipeline_mode<synchronous>, transform_indices = @transform_21, window_bounds = array<i64: 2, 1, 32>}, {pipeline_mode = #tpu.pipeline_mode<synchronous>, transform_indices = @transform_22, window_bounds = array<i64: 32, 3>}, {pipeline_mode = #tpu.pipeline_mode<synchronous>, transform_indices = @transform_23, window_bounds = array<i64: 1, 3>}, {pipeline_mode = #tpu.pipeline_mode<synchronous>, transform_indices = @transform_24, window_bounds = array<i64: 32, 3>}, {pipeline_mode = #tpu.pipeline_mode<synchronous>, transform_indices = @transform_25, window_bounds = array<i64: 1, 3>}, {pipeline_mode = #tpu.pipeline_mode<synchronous>, transform_indices = @transform_26, window_bounds = array<i64: 4, 16>}, {pipeline_mode = #tpu.pipeline_mode<synchronous>, transform_indices = @transform_27, window_bounds = array<i64: 1, 16>}, {pipeline_mode = #tpu.pipeline_mode<synchronous>, transform_indices = @transform_28, window_bounds = array<i64: 128, 19>}, {pipeline_mode = #tpu.pipeline_mode<synchronous>, transform_indices = @transform_29, window_bounds = array<i64: 32, 16>}, {pipeline_mode = #tpu.pipeline_mode<synchronous>, transform_indices = @transform_30, window_bounds = array<i64: 16, 70>}, {pipeline_mode = #tpu.pipeline_mode<synchronous>, transform_indices = @transform_31, window_bounds = array<i64: 2, 6>}, {pipeline_mode = #tpu.pipeline_mode<synchronous>, transform_indices = @transform_32, window_bounds = array<i64: 16, 16>}]} {
    %c0 = arith.constant 0 : index
    %c0_0 = arith.constant 0 : index
    %0 = vector.load %arg1[%c0, %c0_0] : memref<128x27xf32, #tpu.memory_space<vmem>>, vector<128x27xf32>
    %c0_1 = arith.constant 0 : index
    %c0_2 = arith.constant 0 : index
    %1 = vector.load %arg3[%c0_1, %c0_2] : memref<27x8xbf16, #tpu.memory_space<vmem>>, vector<27x8xbf16>
    %2 = arith.truncf %0 : vector<128x27xf32> to vector<128x27xbf16>
    %cst = arith.constant dense<0.000000e+00> : vector<128x8xf32>
    %3 = tpu.matmul %2, %1, %cst {dimension_numbers = #tpu.dot_dimension_numbers<[1], [0], [0], [1], [0, 0, 1, 1], [], []>} : vector<128x27xbf16>, vector<27x8xbf16>, vector<128x8xf32> -> vector<128x8xf32>
    %c0_3 = arith.constant 0 : index
    %c0_4 = arith.constant 0 : index
    %4 = vector.load %arg4[%c0_3, %c0_4] : memref<1x8xf32, #tpu.memory_space<vmem>>, vector<1x8xf32>
    %5 = vector.broadcast %4 : vector<1x8xf32> to vector<128x8xf32>
    %6 = arith.addf %3, %5 : vector<128x8xf32>
    %cst_5 = arith.constant 0.000000e+00 : f32
    %7 = vector.broadcast %cst_5 : f32 to vector<128x8xf32>
    %8 = arith.maximumf %6, %7 : vector<128x8xf32>
    %c0_6 = arith.constant 0 : index
    %c0_7 = arith.constant 0 : index
    %9 = vector.load %arg5[%c0_6, %c0_7] : memref<8x27xbf16, #tpu.memory_space<vmem>>, vector<8x27xbf16>
    %10 = arith.truncf %8 : vector<128x8xf32> to vector<128x8xbf16>
    %cst_8 = arith.constant dense<0.000000e+00> : vector<128x27xf32>
    %11 = tpu.matmul %10, %9, %cst_8 {dimension_numbers = #tpu.dot_dimension_numbers<[1], [0], [0], [1], [0, 0, 1, 1], [], []>} : vector<128x8xbf16>, vector<8x27xbf16>, vector<128x27xf32> -> vector<128x27xf32>
    %c0_9 = arith.constant 0 : index
    %c0_10 = arith.constant 0 : index
    %12 = vector.load %arg6[%c0_9, %c0_10] : memref<1x27xf32, #tpu.memory_space<vmem>>, vector<1x27xf32>
    %13 = vector.broadcast %12 : vector<1x27xf32> to vector<128x27xf32>
    %14 = arith.addf %11, %13 : vector<128x27xf32>
    %15 = vector.extract_strided_slice %14 {offsets = [0, 0], sizes = [128, 16], strides = [1, 1]} : vector<128x27xf32> to vector<128x16xf32>
    %cst_11 = arith.constant 0.000000e+00 : f32
    %16 = vector.broadcast %cst_11 : f32 to vector<128x16xf32>
    %17 = arith.maximumf %15, %16 : vector<128x16xf32>
    %18 = vector.extract_strided_slice %14 {offsets = [0, 16], sizes = [128, 11], strides = [1, 1]} : vector<128x27xf32> to vector<128x11xf32>
    %19 = arith.negf %18 : vector<128x11xf32>
    %20 = math.exp %19 : vector<128x11xf32>
    %cst_12 = arith.constant 1.000000e+00 : f32
    %21 = vector.broadcast %cst_12 : f32 to vector<128x11xf32>
    %22 = arith.addf %21, %20 : vector<128x11xf32>
    %23 = arith.divf %21, %22 : vector<128x11xf32>
    %c0_13 = arith.constant 0 : index
    %c0_14 = arith.constant 0 : index
    %24 = vector.load %arg7[%c0_13, %c0_14] : memref<8x8xbf16, #tpu.memory_space<vmem>>, vector<8x8xbf16>
    %25 = arith.truncf %8 : vector<128x8xf32> to vector<128x8xbf16>
    %cst_15 = arith.constant dense<0.000000e+00> : vector<128x8xf32>
    %26 = tpu.matmul %25, %24, %cst_15 {dimension_numbers = #tpu.dot_dimension_numbers<[1], [0], [0], [1], [0, 0, 1, 1], [], []>} : vector<128x8xbf16>, vector<8x8xbf16>, vector<128x8xf32> -> vector<128x8xf32>
    %c0_16 = arith.constant 0 : index
    %c0_17 = arith.constant 0 : index
    %27 = vector.load %arg8[%c0_16, %c0_17] : memref<16x8xbf16, #tpu.memory_space<vmem>>, vector<16x8xbf16>
    %28 = arith.truncf %17 : vector<128x16xf32> to vector<128x16xbf16>
    %cst_18 = arith.constant dense<0.000000e+00> : vector<128x8xf32>
    %29 = tpu.matmul %28, %27, %cst_18 {dimension_numbers = #tpu.dot_dimension_numbers<[1], [0], [0], [1], [0, 0, 1, 1], [], []>} : vector<128x16xbf16>, vector<16x8xbf16>, vector<128x8xf32> -> vector<128x8xf32>
    %30 = arith.addf %26, %29 : vector<128x8xf32>
    %c0_19 = arith.constant 0 : index
    %c0_20 = arith.constant 0 : index
    %31 = vector.load %arg9[%c0_19, %c0_20] : memref<1x8xf32, #tpu.memory_space<vmem>>, vector<1x8xf32>
    %32 = vector.broadcast %31 : vector<1x8xf32> to vector<128x8xf32>
    %33 = arith.addf %30, %32 : vector<128x8xf32>
    %cst_21 = arith.constant 0.000000e+00 : f32
    %34 = vector.broadcast %cst_21 : f32 to vector<128x8xf32>
    %35 = arith.maximumf %33, %34 : vector<128x8xf32>
    %36 = tpu.concatenate %23, %35 in 1 : vector<128x11xf32>, vector<128x8xf32> -> vector<128x19xf32>
    %c0_22 = arith.constant 0 : index
    %c0_23 = arith.constant 0 : index
    %37 = vector.load %arg29[%c0_22, %c0_23] : memref<128x19xf32, #tpu.memory_space<vmem>>, vector<128x19xf32>
    tpu.vector_store %arg29[%c0_22, %c0_23], %36 {strides = array<i32>} : memref<128x19xf32, #tpu.memory_space<vmem>>, vector<128x19xf32>,
    %38 = vector.shape_cast %8 : vector<128x8xf32> to vector<8x8x2x8xf32>
    %39 = vector.shape_cast %38 : vector<8x8x2x8xf32> to vector<4x2x8x2x8xf32>
    %cst_24 = arith.constant 0.000000e+00 : f32
    %40 = vector.broadcast %cst_24 : f32 to vector<1x8x2x8xf32>
    %41 = vector.extract_strided_slice %39 {offsets = [0, 1, 0, 0, 0], sizes = [3, 1, 8, 2, 8], strides = [1, 1, 1, 1, 1]} : vector<4x2x8x2x8xf32> to vector<3x1x8x2x8xf32>
    %42 = vector.shape_cast %41 : vector<3x1x8x2x8xf32> to vector<3x8x2x8xf32>
    %43 = tpu.concatenate %40, %42 in 0 : vector<1x8x2x8xf32>, vector<3x8x2x8xf32> -> vector<4x8x2x8xf32>
    %44 = vector.extract_strided_slice %39 {offsets = [0, 0, 0, 0, 0], sizes = [4, 1, 8, 2, 8], strides = [1, 1, 1, 1, 1]} : vector<4x2x8x2x8xf32> to vector<4x1x8x2x8xf32>
    %45 = vector.shape_cast %44 : vector<4x1x8x2x8xf32> to vector<4x8x2x8xf32>
    %46 = vector.extract_strided_slice %39 {offsets = [0, 1, 0, 0, 0], sizes = [4, 1, 8, 2, 8], strides = [1, 1, 1, 1, 1]} : vector<4x2x8x2x8xf32> to vector<4x1x8x2x8xf32>
    %47 = vector.shape_cast %46 : vector<4x1x8x2x8xf32> to vector<4x8x2x8xf32>
    %cst_25 = arith.constant 0.000000e+00 : f32
    %48 = vector.broadcast %cst_25 : f32 to vector<4x1x2x8xf32>
    %49 = vector.shape_cast %43 : vector<4x8x2x8xf32> to vector<4x4x2x2x8xf32>
    %50 = vector.extract_strided_slice %49 {offsets = [0, 0, 1, 0, 0], sizes = [4, 3, 1, 2, 8], strides = [1, 1, 1, 1, 1]} : vector<4x4x2x2x8xf32> to vector<4x3x1x2x8xf32>
    %51 = vector.shape_cast %50 : vector<4x3x1x2x8xf32> to vector<4x3x2x8xf32>
    %52 = tpu.concatenate %48, %51 in 1 : vector<4x1x2x8xf32>, vector<4x3x2x8xf32> -> vector<4x4x2x8xf32>
    %53 = vector.extract_strided_slice %49 {offsets = [0, 0, 0, 0, 0], sizes = [4, 4, 1, 2, 8], strides = [1, 1, 1, 1, 1]} : vector<4x4x2x2x8xf32> to vector<4x4x1x2x8xf32>
    %54 = vector.shape_cast %53 : vector<4x4x1x2x8xf32> to vector<4x4x2x8xf32>
    %55 = vector.extract_strided_slice %49 {offsets = [0, 0, 1, 0, 0], sizes = [4, 4, 1, 2, 8], strides = [1, 1, 1, 1, 1]} : vector<4x4x2x2x8xf32> to vector<4x4x1x2x8xf32>
    %56 = vector.shape_cast %55 : vector<4x4x1x2x8xf32> to vector<4x4x2x8xf32>
    %57 = vector.shape_cast %45 : vector<4x8x2x8xf32> to vector<4x4x2x2x8xf32>
    %58 = vector.extract_strided_slice %57 {offsets = [0, 0, 1, 0, 0], sizes = [4, 3, 1, 2, 8], strides = [1, 1, 1, 1, 1]} : vector<4x4x2x2x8xf32> to vector<4x3x1x2x8xf32>
    %59 = vector.shape_cast %58 : vector<4x3x1x2x8xf32> to vector<4x3x2x8xf32>
    %60 = tpu.concatenate %48, %59 in 1 : vector<4x1x2x8xf32>, vector<4x3x2x8xf32> -> vector<4x4x2x8xf32>
    %61 = vector.extract_strided_slice %57 {offsets = [0, 0, 0, 0, 0], sizes = [4, 4, 1, 2, 8], strides = [1, 1, 1, 1, 1]} : vector<4x4x2x2x8xf32> to vector<4x4x1x2x8xf32>
    %62 = vector.shape_cast %61 : vector<4x4x1x2x8xf32> to vector<4x4x2x8xf32>
    %63 = vector.extract_strided_slice %57 {offsets = [0, 0, 1, 0, 0], sizes = [4, 4, 1, 2, 8], strides = [1, 1, 1, 1, 1]} : vector<4x4x2x2x8xf32> to vector<4x4x1x2x8xf32>
    %64 = vector.shape_cast %63 : vector<4x4x1x2x8xf32> to vector<4x4x2x8xf32>
    %65 = vector.shape_cast %47 : vector<4x8x2x8xf32> to vector<4x4x2x2x8xf32>
    %66 = vector.extract_strided_slice %65 {offsets = [0, 0, 1, 0, 0], sizes = [4, 3, 1, 2, 8], strides = [1, 1, 1, 1, 1]} : vector<4x4x2x2x8xf32> to vector<4x3x1x2x8xf32>
    %67 = vector.shape_cast %66 : vector<4x3x1x2x8xf32> to vector<4x3x2x8xf32>
    %68 = tpu.concatenate %48, %67 in 1 : vector<4x1x2x8xf32>, vector<4x3x2x8xf32> -> vector<4x4x2x8xf32>
    %69 = vector.extract_strided_slice %65 {offsets = [0, 0, 0, 0, 0], sizes = [4, 4, 1, 2, 8], strides = [1, 1, 1, 1, 1]} : vector<4x4x2x2x8xf32> to vector<4x4x1x2x8xf32>
    %70 = vector.shape_cast %69 : vector<4x4x1x2x8xf32> to vector<4x4x2x8xf32>
    %71 = vector.extract_strided_slice %65 {offsets = [0, 0, 1, 0, 0], sizes = [4, 4, 1, 2, 8], strides = [1, 1, 1, 1, 1]} : vector<4x4x2x2x8xf32> to vector<4x4x1x2x8xf32>
    %72 = vector.shape_cast %71 : vector<4x4x1x2x8xf32> to vector<4x4x2x8xf32>
    %73 = tpu.concatenate %52, %54, %56, %60, %62, %64, %68, %70, %72 in 3 : vector<4x4x2x8xf32>, vector<4x4x2x8xf32>, vector<4x4x2x8xf32>, vector<4x4x2x8xf32>, vector<4x4x2x8xf32>, vector<4x4x2x8xf32>, vector<4x4x2x8xf32>, vector<4x4x2x8xf32>, vector<4x4x2x8xf32> -> vector<4x4x2x72xf32>
    %74 = vector.shape_cast %73 : vector<4x4x2x72xf32> to vector<32x72xf32>
    %c0_26 = arith.constant 0 : index
    %c0_27 = arith.constant 0 : index
    %75 = vector.load %arg10[%c0_26, %c0_27] : memref<72x16xbf16, #tpu.memory_space<vmem>>, vector<72x16xbf16>
    %76 = arith.truncf %74 : vector<32x72xf32> to vector<32x72xbf16>
    %cst_28 = arith.constant dense<0.000000e+00> : vector<32x16xf32>
    %77 = tpu.matmul %76, %75, %cst_28 {dimension_numbers = #tpu.dot_dimension_numbers<[1], [0], [0], [1], [0, 0, 1, 1], [], []>} : vector<32x72xbf16>, vector<72x16xbf16>, vector<32x16xf32> -> vector<32x16xf32>
    %c0_29 = arith.constant 0 : index
    %c0_30 = arith.constant 0 : index
    %78 = vector.load %arg11[%c0_29, %c0_30] : memref<1x16xf32, #tpu.memory_space<vmem>>, vector<1x16xf32>
    %79 = vector.broadcast %78 : vector<1x16xf32> to vector<32x16xf32>
    %80 = arith.addf %77, %79 : vector<32x16xf32>
    %cst_31 = arith.constant 0.000000e+00 : f32
    %81 = vector.broadcast %cst_31 : f32 to vector<32x16xf32>
    %82 = arith.maximumf %80, %81 : vector<32x16xf32>
    %c0_32 = arith.constant 0 : index
    %c0_33 = arith.constant 0 : index
    %83 = vector.load %arg12[%c0_32, %c0_33] : memref<16x32xbf16, #tpu.memory_space<vmem>>, vector<16x32xbf16>
    %84 = arith.truncf %82 : vector<32x16xf32> to vector<32x16xbf16>
    %cst_34 = arith.constant dense<0.000000e+00> : vector<32x32xf32>
    %85 = tpu.matmul %84, %83, %cst_34 {dimension_numbers = #tpu.dot_dimension_numbers<[1], [0], [0], [1], [0, 0, 1, 1], [], []>} : vector<32x16xbf16>, vector<16x32xbf16>, vector<32x32xf32> -> vector<32x32xf32>
    %c0_35 = arith.constant 0 : index
    %c0_36 = arith.constant 0 : index
    %86 = vector.load %arg13[%c0_35, %c0_36] : memref<1x32xf32, #tpu.memory_space<vmem>>, vector<1x32xf32>
    %87 = vector.broadcast %86 : vector<1x32xf32> to vector<32x32xf32>
    %88 = arith.addf %85, %87 : vector<32x32xf32>
    %cst_37 = arith.constant 0.000000e+00 : f32
    %89 = vector.broadcast %cst_37 : f32 to vector<32x32xf32>
    %90 = arith.maximumf %88, %89 : vector<32x32xf32>
    %c0_38 = arith.constant 0 : index
    %c0_39 = arith.constant 0 : index
    %91 = vector.load %arg14[%c0_38, %c0_39] : memref<16x16xbf16, #tpu.memory_space<vmem>>, vector<16x16xbf16>
    %92 = arith.truncf %82 : vector<32x16xf32> to vector<32x16xbf16>
    %cst_40 = arith.constant dense<0.000000e+00> : vector<32x16xf32>
    %93 = tpu.matmul %92, %91, %cst_40 {dimension_numbers = #tpu.dot_dimension_numbers<[1], [0], [0], [1], [0, 0, 1, 1], [], []>} : vector<32x16xbf16>, vector<16x16xbf16>, vector<32x16xf32> -> vector<32x16xf32>
    %c0_41 = arith.constant 0 : index
    %c0_42 = arith.constant 0 : index
    %94 = vector.load %arg15[%c0_41, %c0_42] : memref<32x16xbf16, #tpu.memory_space<vmem>>, vector<32x16xbf16>
    %95 = arith.truncf %90 : vector<32x32xf32> to vector<32x32xbf16>
    %cst_43 = arith.constant dense<0.000000e+00> : vector<32x16xf32>
    %96 = tpu.matmul %95, %94, %cst_43 {dimension_numbers = #tpu.dot_dimension_numbers<[1], [0], [0], [1], [0, 0, 1, 1], [], []>} : vector<32x32xbf16>, vector<32x16xbf16>, vector<32x16xf32> -> vector<32x16xf32>
    %97 = arith.addf %93, %96 : vector<32x16xf32>
    %c0_44 = arith.constant 0 : index
    %c0_45 = arith.constant 0 : index
    %98 = vector.load %arg16[%c0_44, %c0_45] : memref<1x16xf32, #tpu.memory_space<vmem>>, vector<1x16xf32>
    %99 = vector.broadcast %98 : vector<1x16xf32> to vector<32x16xf32>
    %100 = arith.addf %97, %99 : vector<32x16xf32>
    %cst_46 = arith.constant 0.000000e+00 : f32
    %101 = vector.broadcast %cst_46 : f32 to vector<32x16xf32>
    %102 = arith.maximumf %100, %101 : vector<32x16xf32>
    %c0_47 = arith.constant 0 : index
    %c0_48 = arith.constant 0 : index
    %103 = vector.load %arg30[%c0_47, %c0_48] : memref<32x16xf32, #tpu.memory_space<vmem>>, vector<32x16xf32>
    tpu.vector_store %arg30[%c0_47, %c0_48], %102 {strides = array<i32>} : memref<32x16xf32, #tpu.memory_space<vmem>>, vector<32x16xf32>,
    %104 = vector.shape_cast %102 : vector<32x16xf32> to vector<16x2x16xf32>
    %cst_49 = arith.constant dense<0.000000e+00> : vector<2x16xf32>
    %105 = vector.multi_reduction <add>, %104, %cst_49 [0] : vector<16x2x16xf32> to vector<2x16xf32>
    %cst_50 = arith.constant 1.600000e+01 : f32
    %106 = vector.broadcast %cst_50 : f32 to vector<2x16xf32>
    %107 = arith.divf %105, %106 : vector<2x16xf32>
    %c0_51 = arith.constant 0 : index
    %c0_52 = arith.constant 0 : index
    %108 = vector.load %arg17[%c0_51, %c0_52] : memref<16x64xbf16, #tpu.memory_space<vmem>>, vector<16x64xbf16>
    %109 = arith.truncf %107 : vector<2x16xf32> to vector<2x16xbf16>
    %cst_53 = arith.constant dense<0.000000e+00> : vector<2x64xf32>
    %110 = tpu.matmul %109, %108, %cst_53 {dimension_numbers = #tpu.dot_dimension_numbers<[1], [0], [0], [1], [0, 0, 1, 1], [], []>} : vector<2x16xbf16>, vector<16x64xbf16>, vector<2x64xf32> -> vector<2x64xf32>
    %c0_54 = arith.constant 0 : index
    %c0_55 = arith.constant 0 : index
    %111 = vector.load %arg18[%c0_54, %c0_55] : memref<1x64xf32, #tpu.memory_space<vmem>>, vector<1x64xf32>
    %112 = vector.broadcast %111 : vector<1x64xf32> to vector<2x64xf32>
    %113 = arith.addf %110, %112 : vector<2x64xf32>
    %cst_56 = arith.constant 0.000000e+00 : f32
    %114 = vector.broadcast %cst_56 : f32 to vector<2x64xf32>
    %115 = arith.maximumf %113, %114 : vector<2x64xf32>
    %116 = vector.extract_strided_slice %115 {offsets = [0, 0], sizes = [2, 32], strides = [1, 1]} : vector<2x64xf32> to vector<2x32xf32>
    %117 = vector.extract_strided_slice %115 {offsets = [0, 32], sizes = [2, 32], strides = [1, 1]} : vector<2x64xf32> to vector<2x32xf32>
    %118 = vector.shape_cast %116 : vector<2x32xf32> to vector<2x1x32xf32>
    %c0_57 = arith.constant 0 : index
    %c0_58 = arith.constant 0 : index
    %c0_59 = arith.constant 0 : index
    %119 = vector.load %arg19[%c0_57, %c0_58, %c0_59] : memref<2x8x32xf32, #tpu.memory_space<vmem>>, vector<1x8x32xf32>
    %120 = vector.shape_cast %119 : vector<1x8x32xf32> to vector<8x32xf32>
    %121 = vector.shape_cast %120 : vector<8x32xf32> to vector<1x8x32xf32>
    %122 = vector.broadcast %118 : vector<2x1x32xf32> to vector<2x8x32xf32>
    %123 = vector.broadcast %121 : vector<1x8x32xf32> to vector<2x8x32xf32>
    %124 = arith.addf %122, %123 : vector<2x8x32xf32>
    %125 = vector.shape_cast %124 : vector<2x8x32xf32> to vector<16x32xf32>
    %c0_60 = arith.constant 0 : index
    %c0_61 = arith.constant 0 : index
    %c0_62 = arith.constant 0 : index
    %126 = vector.load %arg21[%c0_60, %c0_61, %c0_62] : memref<2x32x32xbf16, #tpu.memory_space<vmem>>, vector<1x32x32xbf16>
    %127 = vector.shape_cast %126 : vector<1x32x32xbf16> to vector<32x32xbf16>
    %128 = arith.truncf %125 : vector<16x32xf32> to vector<16x32xbf16>
    %cst_63 = arith.constant dense<0.000000e+00> : vector<16x32xf32>
    %129 = tpu.matmul %128, %127, %cst_63 {dimension_numbers = #tpu.dot_dimension_numbers<[1], [0], [0], [1], [0, 0, 1, 1], [], []>} : vector<16x32xbf16>, vector<32x32xbf16>, vector<16x32xf32> -> vector<16x32xf32>
    %c0_64 = arith.constant 0 : index
    %c0_65 = arith.constant 0 : index
    %c0_66 = arith.constant 0 : index
    %130 = vector.load %arg22[%c0_64, %c0_65, %c0_66] : memref<2x1x32xf32, #tpu.memory_space<vmem>>, vector<1x1x32xf32>
    %131 = vector.shape_cast %130 : vector<1x1x32xf32> to vector<1x32xf32>
    %132 = vector.broadcast %131 : vector<1x32xf32> to vector<16x32xf32>
    %133 = arith.addf %129, %132 : vector<16x32xf32>
    %cst_67 = arith.constant 0.000000e+00 : f32
    %134 = vector.broadcast %cst_67 : f32 to vector<16x32xf32>
    %135 = arith.maximumf %133, %134 : vector<16x32xf32>
    %c0_68 = arith.constant 0 : index
    %c0_69 = arith.constant 0 : index
    %c0_70 = arith.constant 0 : index
    %136 = vector.load %arg20[%c0_68, %c0_69, %c0_70] : memref<2x8x8xf32, #tpu.memory_space<vmem>>, vector<1x8x8xf32>
    %137 = vector.shape_cast %136 : vector<1x8x8xf32> to vector<8x8xf32>
    %138 = arith.truncf %137 : vector<8x8xf32> to vector<8x8xbf16>
    %139 = vector.shape_cast %138 : vector<8x8xbf16> to vector<1x8x8xbf16>
    %140 = vector.shape_cast %139 : vector<1x8x8xbf16> to vector<1x8x8xbf16>
    %141 = vector.broadcast %140 : vector<1x8x8xbf16> to vector<2x8x8xbf16>
    %142 = vector.shape_cast %135 : vector<16x32xf32> to vector<2x8x32xf32>
    %143 = arith.truncf %142 : vector<2x8x32xf32> to vector<2x8x32xbf16>
    %cst_71 = arith.constant dense<0.000000e+00> : vector<2x8x32xf32>
    %144 = tpu.matmul %141, %143, %cst_71 {dimension_numbers = #tpu.dot_dimension_numbers<[2], [1], [1], [2], [0, 0, 0, 1, 1, 2], [0], [0]>} : vector<2x8x8xbf16>, vector<2x8x32xbf16>, vector<2x8x32xf32> -> vector<2x8x32xf32>
    %145 = vector.shape_cast %144 : vector<2x8x32xf32> to vector<16x32xf32>
    %c0_72 = arith.constant 0 : index
    %c0_73 = arith.constant 0 : index
    %146 = vector.load %arg23[%c0_72, %c0_73] : memref<32x3xbf16, #tpu.memory_space<vmem>>, vector<32x3xbf16>
    %147 = arith.truncf %145 : vector<16x32xf32> to vector<16x32xbf16>
    %cst_74 = arith.constant dense<0.000000e+00> : vector<16x3xf32>
    %148 = tpu.matmul %147, %146, %cst_74 {dimension_numbers = #tpu.dot_dimension_numbers<[1], [0], [0], [1], [0, 0, 1, 1], [], []>} : vector<16x32xbf16>, vector<32x3xbf16>, vector<16x3xf32> -> vector<16x3xf32>
    %c0_75 = arith.constant 0 : index
    %c0_76 = arith.constant 0 : index
    %149 = vector.load %arg24[%c0_75, %c0_76] : memref<1x3xf32, #tpu.memory_space<vmem>>, vector<1x3xf32>
    %150 = vector.broadcast %149 : vector<1x3xf32> to vector<16x3xf32>
    %151 = arith.addf %148, %150 : vector<16x3xf32>
    %152 = vector.shape_cast %117 : vector<2x32xf32> to vector<2x1x32xf32>
    %c1 = arith.constant 1 : index
    %c0_77 = arith.constant 0 : index
    %c0_78 = arith.constant 0 : index
    %153 = vector.load %arg19[%c1, %c0_77, %c0_78] : memref<2x8x32xf32, #tpu.memory_space<vmem>>, vector<1x8x32xf32>
    %154 = vector.shape_cast %153 : vector<1x8x32xf32> to vector<8x32xf32>
    %155 = vector.shape_cast %154 : vector<8x32xf32> to vector<1x8x32xf32>
    %156 = vector.broadcast %152 : vector<2x1x32xf32> to vector<2x8x32xf32>
    %157 = vector.broadcast %155 : vector<1x8x32xf32> to vector<2x8x32xf32>
    %158 = arith.addf %156, %157 : vector<2x8x32xf32>
    %159 = vector.shape_cast %158 : vector<2x8x32xf32> to vector<16x32xf32>
    %c1_79 = arith.constant 1 : index
    %c0_80 = arith.constant 0 : index
    %c0_81 = arith.constant 0 : index
    %160 = vector.load %arg21[%c1_79, %c0_80, %c0_81] : memref<2x32x32xbf16, #tpu.memory_space<vmem>>, vector<1x32x32xbf16>
    %161 = vector.shape_cast %160 : vector<1x32x32xbf16> to vector<32x32xbf16>
    %162 = arith.truncf %159 : vector<16x32xf32> to vector<16x32xbf16>
    %cst_82 = arith.constant dense<0.000000e+00> : vector<16x32xf32>
    %163 = tpu.matmul %162, %161, %cst_82 {dimension_numbers = #tpu.dot_dimension_numbers<[1], [0], [0], [1], [0, 0, 1, 1], [], []>} : vector<16x32xbf16>, vector<32x32xbf16>, vector<16x32xf32> -> vector<16x32xf32>
    %c1_83 = arith.constant 1 : index
    %c0_84 = arith.constant 0 : index
    %c0_85 = arith.constant 0 : index
    %164 = vector.load %arg22[%c1_83, %c0_84, %c0_85] : memref<2x1x32xf32, #tpu.memory_space<vmem>>, vector<1x1x32xf32>
    %165 = vector.shape_cast %164 : vector<1x1x32xf32> to vector<1x32xf32>
    %166 = vector.broadcast %165 : vector<1x32xf32> to vector<16x32xf32>
    %167 = arith.addf %163, %166 : vector<16x32xf32>
    %cst_86 = arith.constant 0.000000e+00 : f32
    %168 = vector.broadcast %cst_86 : f32 to vector<16x32xf32>
    %169 = arith.maximumf %167, %168 : vector<16x32xf32>
    %c1_87 = arith.constant 1 : index
    %c0_88 = arith.constant 0 : index
    %c0_89 = arith.constant 0 : index
    %170 = vector.load %arg20[%c1_87, %c0_88, %c0_89] : memref<2x8x8xf32, #tpu.memory_space<vmem>>, vector<1x8x8xf32>
    %171 = vector.shape_cast %170 : vector<1x8x8xf32> to vector<8x8xf32>
    %172 = arith.truncf %171 : vector<8x8xf32> to vector<8x8xbf16>
    %173 = vector.shape_cast %172 : vector<8x8xbf16> to vector<1x8x8xbf16>
    %174 = vector.shape_cast %173 : vector<1x8x8xbf16> to vector<1x8x8xbf16>
    %175 = vector.broadcast %174 : vector<1x8x8xbf16> to vector<2x8x8xbf16>
    %176 = vector.shape_cast %169 : vector<16x32xf32> to vector<2x8x32xf32>
    %177 = arith.truncf %176 : vector<2x8x32xf32> to vector<2x8x32xbf16>
    %cst_90 = arith.constant dense<0.000000e+00> : vector<2x8x32xf32>
    %178 = tpu.matmul %175, %177, %cst_90 {dimension_numbers = #tpu.dot_dimension_numbers<[2], [1], [1], [2], [0, 0, 0, 1, 1, 2], [0], [0]>} : vector<2x8x8xbf16>, vector<2x8x32xbf16>, vector<2x8x32xf32> -> vector<2x8x32xf32>
    %179 = vector.shape_cast %178 : vector<2x8x32xf32> to vector<16x32xf32>
    %c0_91 = arith.constant 0 : index
    %c0_92 = arith.constant 0 : index
    %180 = vector.load %arg23[%c0_91, %c0_92] : memref<32x3xbf16, #tpu.memory_space<vmem>>, vector<32x3xbf16>
    %181 = arith.truncf %179 : vector<16x32xf32> to vector<16x32xbf16>
    %cst_93 = arith.constant dense<0.000000e+00> : vector<16x3xf32>
    %182 = tpu.matmul %181, %180, %cst_93 {dimension_numbers = #tpu.dot_dimension_numbers<[1], [0], [0], [1], [0, 0, 1, 1], [], []>} : vector<16x32xbf16>, vector<32x3xbf16>, vector<16x3xf32> -> vector<16x3xf32>
    %c0_94 = arith.constant 0 : index
    %c0_95 = arith.constant 0 : index
    %183 = vector.load %arg24[%c0_94, %c0_95] : memref<1x3xf32, #tpu.memory_space<vmem>>, vector<1x3xf32>
    %184 = vector.broadcast %183 : vector<1x3xf32> to vector<16x3xf32>
    %185 = arith.addf %182, %184 : vector<16x3xf32>
    %186 = tpu.concatenate %151, %185, %145, %179 in 1 : vector<16x3xf32>, vector<16x3xf32>, vector<16x32xf32>, vector<16x32xf32> -> vector<16x70xf32>
    %c0_96 = arith.constant 0 : index
    %c0_97 = arith.constant 0 : index
    %187 = vector.load %arg31[%c0_96, %c0_97] : memref<16x70xf32, #tpu.memory_space<vmem>>, vector<16x70xf32>
    tpu.vector_store %arg31[%c0_96, %c0_97], %186 {strides = array<i32>} : memref<16x70xf32, #tpu.memory_space<vmem>>, vector<16x70xf32>,
    %c0_98 = arith.constant 0 : index
    %c0_99 = arith.constant 0 : index
    %188 = vector.load %arg25[%c0_98, %c0_99] : memref<32x3xbf16, #tpu.memory_space<vmem>>, vector<32x3xbf16>
    %189 = arith.truncf %116 : vector<2x32xf32> to vector<2x32xbf16>
    %cst_100 = arith.constant dense<0.000000e+00> : vector<2x3xf32>
    %190 = tpu.matmul %189, %188, %cst_100 {dimension_numbers = #tpu.dot_dimension_numbers<[1], [0], [0], [1], [0, 0, 1, 1], [], []>} : vector<2x32xbf16>, vector<32x3xbf16>, vector<2x3xf32> -> vector<2x3xf32>
    %c0_101 = arith.constant 0 : index
    %c0_102 = arith.constant 0 : index
    %191 = vector.load %arg26[%c0_101, %c0_102] : memref<1x3xf32, #tpu.memory_space<vmem>>, vector<1x3xf32>
    %192 = vector.broadcast %191 : vector<1x3xf32> to vector<2x3xf32>
    %193 = arith.addf %190, %192 : vector<2x3xf32>
    %c0_103 = arith.constant 0 : index
    %c0_104 = arith.constant 0 : index
    %194 = vector.load %arg25[%c0_103, %c0_104] : memref<32x3xbf16, #tpu.memory_space<vmem>>, vector<32x3xbf16>
    %195 = arith.truncf %117 : vector<2x32xf32> to vector<2x32xbf16>
    %cst_105 = arith.constant dense<0.000000e+00> : vector<2x3xf32>
    %196 = tpu.matmul %195, %194, %cst_105 {dimension_numbers = #tpu.dot_dimension_numbers<[1], [0], [0], [1], [0, 0, 1, 1], [], []>} : vector<2x32xbf16>, vector<32x3xbf16>, vector<2x3xf32> -> vector<2x3xf32>
    %c0_106 = arith.constant 0 : index
    %c0_107 = arith.constant 0 : index
    %197 = vector.load %arg26[%c0_106, %c0_107] : memref<1x3xf32, #tpu.memory_space<vmem>>, vector<1x3xf32>
    %198 = vector.broadcast %197 : vector<1x3xf32> to vector<2x3xf32>
    %199 = arith.addf %196, %198 : vector<2x3xf32>
    %200 = tpu.concatenate %193, %199 in 1 : vector<2x3xf32>, vector<2x3xf32> -> vector<2x6xf32>
    %c0_108 = arith.constant 0 : index
    %c0_109 = arith.constant 0 : index
    %201 = vector.load %arg32[%c0_108, %c0_109] : memref<2x6xf32, #tpu.memory_space<vmem>>, vector<2x6xf32>
    tpu.vector_store %arg32[%c0_108, %c0_109], %200 {strides = array<i32>} : memref<2x6xf32, #tpu.memory_space<vmem>>, vector<2x6xf32>,
    %c0_110 = arith.constant 0 : index
    %c0_111 = arith.constant 0 : index
    %202 = vector.load %arg2[%c0_110, %c0_111] : memref<16x4xf32, #tpu.memory_space<vmem>>, vector<16x4xf32>
    %c0_112 = arith.constant 0 : index
    %c0_113 = arith.constant 0 : index
    %203 = vector.load %arg27[%c0_112, %c0_113] : memref<4x16xbf16, #tpu.memory_space<vmem>>, vector<4x16xbf16>
    %204 = arith.truncf %202 : vector<16x4xf32> to vector<16x4xbf16>
    %cst_114 = arith.constant dense<0.000000e+00> : vector<16x16xf32>
    %205 = tpu.matmul %204, %203, %cst_114 {dimension_numbers = #tpu.dot_dimension_numbers<[1], [0], [0], [1], [0, 0, 1, 1], [], []>} : vector<16x4xbf16>, vector<4x16xbf16>, vector<16x16xf32> -> vector<16x16xf32>
    %c0_115 = arith.constant 0 : index
    %c0_116 = arith.constant 0 : index
    %206 = vector.load %arg28[%c0_115, %c0_116] : memref<1x16xf32, #tpu.memory_space<vmem>>, vector<1x16xf32>
    %207 = vector.broadcast %206 : vector<1x16xf32> to vector<16x16xf32>
    %208 = arith.addf %205, %207 : vector<16x16xf32>
    %cst_117 = arith.constant 0.000000e+00 : f32
    %209 = vector.broadcast %cst_117 : f32 to vector<16x16xf32>
    %210 = arith.maximumf %208, %209 : vector<16x16xf32>
    %c0_118 = arith.constant 0 : index
    %c0_119 = arith.constant 0 : index
    %211 = vector.load %arg33[%c0_118, %c0_119] : memref<16x16xf32, #tpu.memory_space<vmem>>, vector<16x16xf32>
    tpu.vector_store %arg33[%c0_118, %c0_119], %210 {strides = array<i32>} : memref<16x16xf32, #tpu.memory_space<vmem>>, vector<16x16xf32>,
    return
  }
  func.func @transform_0(%arg0: i32) -> (i32, i32) {
    %c0_i32 = arith.constant 0 : i32
    %c0_i32_0 = arith.constant 0 : i32
    %c0_i32_1 = arith.constant 0 : i32
    return %c0_i32, %c0_i32_0 : i32, i32
  }
  func.func @transform_1(%arg0: i32) -> (i32, i32) {
    %c0_i32 = arith.constant 0 : i32
    %c0_i32_0 = arith.constant 0 : i32
    %c0_i32_1 = arith.constant 0 : i32
    return %c0_i32, %c0_i32_0 : i32, i32
  }
  func.func @transform_2(%arg0: i32) -> (i32, i32) {
    %c0_i32 = arith.constant 0 : i32
    %c0_i32_0 = arith.constant 0 : i32
    %c0_i32_1 = arith.constant 0 : i32
    return %c0_i32, %c0_i32_0 : i32, i32
  }
  func.func @transform_3(%arg0: i32) -> (i32, i32) {
    %c0_i32 = arith.constant 0 : i32
    %c0_i32_0 = arith.constant 0 : i32
    %c0_i32_1 = arith.constant 0 : i32
    return %c0_i32, %c0_i32_0 : i32, i32
  }
  func.func @transform_4(%arg0: i32) -> (i32, i32) {
    %c0_i32 = arith.constant 0 : i32
    %c0_i32_0 = arith.constant 0 : i32
    %c0_i32_1 = arith.constant 0 : i32
    return %c0_i32, %c0_i32_0 : i32, i32
  }
  func.func @transform_5(%arg0: i32) -> (i32, i32) {
    %c0_i32 = arith.constant 0 : i32
    %c0_i32_0 = arith.constant 0 : i32
    %c0_i32_1 = arith.constant 0 : i32
    return %c0_i32, %c0_i32_0 : i32, i32
  }
  func.func @transform_6(%arg0: i32) -> (i32, i32) {
    %c0_i32 = arith.constant 0 : i32
    %c0_i32_0 = arith.constant 0 : i32
    %c0_i32_1 = arith.constant 0 : i32
    return %c0_i32, %c0_i32_0 : i32, i32
  }
  func.func @transform_7(%arg0: i32) -> (i32, i32) {
    %c0_i32 = arith.constant 0 : i32
    %c0_i32_0 = arith.constant 0 : i32
    %c0_i32_1 = arith.constant 0 : i32
    return %c0_i32, %c0_i32_0 : i32, i32
  }
  func.func @transform_8(%arg0: i32) -> (i32, i32) {
    %c0_i32 = arith.constant 0 : i32
    %c0_i32_0 = arith.constant 0 : i32
    %c0_i32_1 = arith.constant 0 : i32
    return %c0_i32, %c0_i32_0 : i32, i32
  }
  func.func @transform_9(%arg0: i32) -> (i32, i32) {
    %c0_i32 = arith.constant 0 : i32
    %c0_i32_0 = arith.constant 0 : i32
    %c0_i32_1 = arith.constant 0 : i32
    return %c0_i32, %c0_i32_0 : i32, i32
  }
  func.func @transform_10(%arg0: i32) -> (i32, i32) {
    %c0_i32 = arith.constant 0 : i32
    %c0_i32_0 = arith.constant 0 : i32
    %c0_i32_1 = arith.constant 0 : i32
    return %c0_i32, %c0_i32_0 : i32, i32
  }
  func.func @transform_11(%arg0: i32) -> (i32, i32) {
    %c0_i32 = arith.constant 0 : i32
    %c0_i32_0 = arith.constant 0 : i32
    %c0_i32_1 = arith.constant 0 : i32
    return %c0_i32, %c0_i32_0 : i32, i32
  }
  func.func @transform_12(%arg0: i32) -> (i32, i32) {
    %c0_i32 = arith.constant 0 : i32
    %c0_i32_0 = arith.constant 0 : i32
    %c0_i32_1 = arith.constant 0 : i32
    return %c0_i32, %c0_i32_0 : i32, i32
  }
  func.func @transform_13(%arg0: i32) -> (i32, i32) {
    %c0_i32 = arith.constant 0 : i32
    %c0_i32_0 = arith.constant 0 : i32
    %c0_i32_1 = arith.constant 0 : i32
    return %c0_i32, %c0_i32_0 : i32, i32
  }
  func.func @transform_14(%arg0: i32) -> (i32, i32) {
    %c0_i32 = arith.constant 0 : i32
    %c0_i32_0 = arith.constant 0 : i32
    %c0_i32_1 = arith.constant 0 : i32
    return %c0_i32, %c0_i32_0 : i32, i32
  }
  func.func @transform_15(%arg0: i32) -> (i32, i32) {
    %c0_i32 = arith.constant 0 : i32
    %c0_i32_0 = arith.constant 0 : i32
    %c0_i32_1 = arith.constant 0 : i32
    return %c0_i32, %c0_i32_0 : i32, i32
  }
  func.func @transform_16(%arg0: i32) -> (i32, i32) {
    %c0_i32 = arith.constant 0 : i32
    %c0_i32_0 = arith.constant 0 : i32
    %c0_i32_1 = arith.constant 0 : i32
    return %c0_i32, %c0_i32_0 : i32, i32
  }
  func.func @transform_17(%arg0: i32) -> (i32, i32) {
    %c0_i32 = arith.constant 0 : i32
    %c0_i32_0 = arith.constant 0 : i32
    %c0_i32_1 = arith.constant 0 : i32
    return %c0_i32, %c0_i32_0 : i32, i32
  }
  func.func @transform_18(%arg0: i32) -> (i32, i32, i32) {
    %c0_i32 = arith.constant 0 : i32
    %c0_i32_0 = arith.constant 0 : i32
    %c0_i32_1 = arith.constant 0 : i32
    %c0_i32_2 = arith.constant 0 : i32
    return %c0_i32, %c0_i32_0, %c0_i32_1 : i32, i32, i32
  }
  func.func @transform_19(%arg0: i32) -> (i32, i32, i32) {
    %c0_i32 = arith.constant 0 : i32
    %c0_i32_0 = arith.constant 0 : i32
    %c0_i32_1 = arith.constant 0 : i32
    %c0_i32_2 = arith.constant 0 : i32
    return %c0_i32, %c0_i32_0, %c0_i32_1 : i32, i32, i32
  }
  func.func @transform_20(%arg0: i32) -> (i32, i32, i32) {
    %c0_i32 = arith.constant 0 : i32
    %c0_i32_0 = arith.constant 0 : i32
    %c0_i32_1 = arith.constant 0 : i32
    %c0_i32_2 = arith.constant 0 : i32
    return %c0_i32, %c0_i32_0, %c0_i32_1 : i32, i32, i32
  }
  func.func @transform_21(%arg0: i32) -> (i32, i32, i32) {
    %c0_i32 = arith.constant 0 : i32
    %c0_i32_0 = arith.constant 0 : i32
    %c0_i32_1 = arith.constant 0 : i32
    %c0_i32_2 = arith.constant 0 : i32
    return %c0_i32, %c0_i32_0, %c0_i32_1 : i32, i32, i32
  }
  func.func @transform_22(%arg0: i32) -> (i32, i32) {
    %c0_i32 = arith.constant 0 : i32
    %c0_i32_0 = arith.constant 0 : i32
    %c0_i32_1 = arith.constant 0 : i32
    return %c0_i32, %c0_i32_0 : i32, i32
  }
  func.func @transform_23(%arg0: i32) -> (i32, i32) {
    %c0_i32 = arith.constant 0 : i32
    %c0_i32_0 = arith.constant 0 : i32
    %c0_i32_1 = arith.constant 0 : i32
    return %c0_i32, %c0_i32_0 : i32, i32
  }
  func.func @transform_24(%arg0: i32) -> (i32, i32) {
    %c0_i32 = arith.constant 0 : i32
    %c0_i32_0 = arith.constant 0 : i32
    %c0_i32_1 = arith.constant 0 : i32
    return %c0_i32, %c0_i32_0 : i32, i32
  }
  func.func @transform_25(%arg0: i32) -> (i32, i32) {
    %c0_i32 = arith.constant 0 : i32
    %c0_i32_0 = arith.constant 0 : i32
    %c0_i32_1 = arith.constant 0 : i32
    return %c0_i32, %c0_i32_0 : i32, i32
  }
  func.func @transform_26(%arg0: i32) -> (i32, i32) {
    %c0_i32 = arith.constant 0 : i32
    %c0_i32_0 = arith.constant 0 : i32
    %c0_i32_1 = arith.constant 0 : i32
    return %c0_i32, %c0_i32_0 : i32, i32
  }
  func.func @transform_27(%arg0: i32) -> (i32, i32) {
    %c0_i32 = arith.constant 0 : i32
    %c0_i32_0 = arith.constant 0 : i32
    %c0_i32_1 = arith.constant 0 : i32
    return %c0_i32, %c0_i32_0 : i32, i32
  }
  func.func @transform_28(%arg0: i32) -> (i32, i32) {
    %c0_i32 = arith.constant 0 : i32
    %c0_i32_0 = arith.constant 0 : i32
    %c0_i32_1 = arith.constant 0 : i32
    return %c0_i32, %c0_i32_0 : i32, i32
  }
  func.func @transform_29(%arg0: i32) -> (i32, i32) {
    %c0_i32 = arith.constant 0 : i32
    %c0_i32_0 = arith.constant 0 : i32
    %c0_i32_1 = arith.constant 0 : i32
    return %c0_i32, %c0_i32_0 : i32, i32
  }
  func.func @transform_30(%arg0: i32) -> (i32, i32) {
    %c0_i32 = arith.constant 0 : i32
    %c0_i32_0 = arith.constant 0 : i32
    %c0_i32_1 = arith.constant 0 : i32
    return %c0_i32, %c0_i32_0 : i32, i32
  }
  func.func @transform_31(%arg0: i32) -> (i32, i32) {
    %c0_i32 = arith.constant 0 : i32
    %c0_i32_0 = arith.constant 0 : i32
    %c0_i32_1 = arith.constant 0 : i32
    return %c0_i32, %c0_i32_0 : i32, i32
  }
  func.func @transform_32(%arg0: i32) -> (i32, i32) {
    %c0_i32 = arith.constant 0 : i32
    %c0_i32_0 = arith.constant 0 : i32
    %c0_i32_1 = arith.constant 0 : i32
    return %c0_i32, %c0_i32_0 : i32, i32
  }
}

</mosaic_0001>

<bundles_post_ra>
// kernel: handnet_gcn_forward.1
= control target key start
LH: loop header
LB: loop body
LE: loop exit
PB: predicated region body
PF: predicated region fallthrough
CT: control target
= control target key end

     0   :  { %s4159_s6 = smov 1   ;;  %s4160_s10 = smov 2   ;;  %s5634_s0 = inlined_call_operand.smem [shape: u32[33], index: -1, kind: input, shape index: {}] }
   0x1   :  { %s4220_s5 = sld [smem:[%s5634_s0]]   ;;  %s4161_s14 = smov 3  }
   0x2   :  { %s4225_s9 = sld [smem:[%s5634_s0 + %s4159_s6]]   ;;  %s4162_s18 = smov 4  }
   0x3   :  { %s4230_s13 = sld [smem:[%s5634_s0 + %s4160_s10]]   ;;  %s4163_s22 = smov 5  }
   0x4   :  { %s4235_s17 = sld [smem:[%s5634_s0 + %s4161_s14]]   ;;  %s4164_s26 = smov 6  }
   0x5   :  { %s4240_s21 = sld [smem:[%s5634_s0 + %s4162_s18]]   ;;  %s4165_s30 = smov 7  }
   0x6   :  { %s4245_s25 = sld [smem:[%s5634_s0 + %s4163_s22]]   ;;  %s4166_s4 = smov 8  }
   0x7   :  { %s4250_s29 = sld [smem:[%s5634_s0 + %s4164_s26]]   ;;  %s4167_s10 = smov 9  }
   0x8   :  { %5667 = sst [smem:[#allocation5_spill]] %s4225_s9  ;;  %s4168_s15 = smov 10  }
   0x9   :  { %s4255_s3 = sld [smem:[%s5634_s0 + %s4165_s30]]   ;;  %s4169_s20 = smov 11  }
   0xa   :  { %s4260_s8 = sld [smem:[%s5634_s0 + %s4166_s4]]   ;;  %s4170_s26 = smov 12  }
   0xb   :  { %s4265_s14 = sld [smem:[%s5634_s0 + %s4167_s10]]   ;;  %s4171_s1 = smov 13  }
   0xc   :  { %s4270_s19 = sld [smem:[%s5634_s0 + %s4168_s15]]   ;;  %s4172_s7 = smov 14  }
   0xd   :  { %s4275_s24 = sld [smem:[%s5634_s0 + %s4169_s20]]   ;;  %s4173_s15 = smov 15  }
   0xe   :  { %s4280_s30 = sld [smem:[%s5634_s0 + %s4170_s26]]   ;;  %s4174_s22 = smov 16  }
   0xf   :  { %s4285_s6 = sld [smem:[%s5634_s0 + %s4171_s1]]   ;;  %s4175_s28 = smov 17  }
  0x10   :  { %5668 = sst [smem:[#allocation6_spill]] %s4260_s8 }
  0x11   :  { %s4290_s12 = sld [smem:[%s5634_s0 + %s4172_s7]]   ;;  %s4176_s7 = smov 18  }
  0x12   :  { %s4295_s20 = sld [smem:[%s5634_s0 + %s4173_s15]]   ;;  %s4177_s15 = smov 19  }
  0x13   :  { %s4300_s27 = sld [smem:[%s5634_s0 + %s4174_s22]]   ;;  %s4178_s22 = smov 20  }
  0x14   :  { %s4305_s4 = sld [smem:[%s5634_s0 + %s4175_s28]]   ;;  %s4179_s28 = smov 21  }
  0x15   :  { %s4310_s9 = sld [smem:[%s5634_s0 + %s4176_s7]]   ;;  %s4180_s7 = smov 22  }
  0x16   :  { %s4315_s8 = sld [smem:[%s5634_s0 + %s4177_s15]]   ;;  %s4181_s15 = smov 23  }
  0x18   :  { %5669 = sst [smem:[#allocation7_spill]] %s4295_s20 }
  0x19   :  { %s4320_s20 = sld [smem:[%s5634_s0 + %s4178_s22]]   ;;  %s4182_s22 = smov 24  }
  0x1a   :  { %5670 = sst [smem:[#allocation8_spill]] %s4305_s4 }
  0x1b   :  { %5671 = sst [smem:[#allocation9_spill]] %s4310_s9 }
  0x1c   :  { %5672 = sst [smem:[#allocation10_spill]] %s4315_s8 }
  0x1d   :  { %s4325_s4 = sld [smem:[%s5634_s0 + %s4179_s28]]   ;;  %s4183_s28 = smov 25  }
  0x1e   :  { %s4330_s9 = sld [smem:[%s5634_s0 + %s4180_s7]]   ;;  %s4184_s7 = smov 26  }
  0x1f   :  { %5673 = sst [smem:[#allocation11_spill]] %s4320_s20 }
  0x20   :  { %s4335_s8 = sld [smem:[%s5634_s0 + %s4181_s15]]   ;;  %s4185_s15 = smov 27  }
  0x21   :  { %s4340_s20 = sld [smem:[%s5634_s0 + %s4182_s22]]   ;;  %s4186_s22 = smov 28  }
  0x23   :  { %5674 = sst [smem:[#allocation12_spill]] %s4325_s4 }
  0x24   :  { %5675 = sst [smem:[#allocation13_spill]] %s4330_s9 }
  0x25   :  { %s4345_s4 = sld [smem:[%s5634_s0 + %s4183_s28]]   ;;  %s4187_s28 = smov 29  }
  0x26   :  { %5676 = sst [smem:[#allocation14_spill]] %s4335_s8 }
  0x27   :  { %5677 = sst [smem:[#allocation15_spill]] %s4340_s20 }
  0x28   :  { %s4350_s9 = sld [smem:[%s5634_s0 + %s4184_s7]]   ;;  %s4188_s7 = smov 30  }
  0x29   :  { %s4355_s8 = sld [smem:[%s5634_s0 + %s4185_s15]]   ;;  %s4189_s15 = smov 31  }
  0x2a   :  { %s4360_s20 = sld [smem:[%s5634_s0 + %s4186_s22]]   ;;  %s4190_s22 = smov 32  }
  0x2b   :  { %5678 = sst [smem:[#allocation16_spill]] %s4345_s4 }
  0x2c   :  { %s4365_s4 = sld [smem:[%s5634_s0 + %s4187_s28]]  }
  0x2e   :  { %5679 = sst [smem:[#allocation17_spill]] %s4350_s9 }
  0x2f   :  { %5680 = sst [smem:[#allocation18_spill]] %s4355_s8 }
  0x30   :  { %5681 = sst [smem:[#allocation19_spill]] %s4360_s20 }
  0x31   :  { %s4370_s9 = sld [smem:[%s5634_s0 + %s4188_s7]]  }
  0x32   :  { %s4375_s8 = sld [smem:[%s5634_s0 + %s4189_s15]]  }
  0x33   :  { %s4380_s20 = sld [smem:[%s5634_s0 + %s4190_s22]]  }
  0x34   :  { %v4052_v0 = vld [vmem:[%s4230_s13 + $0x8] sm:$0x3f]   ;;  %vm200_vm0 = vcmask 1044480   ;;  %vm201_vm1 = vcmask 1045504   ;;  %v4191_v1 = vmov 65535   ;;  %v129_v3 = vld [vmem:[%s4220_s5] sm:$0xff] }
  0x35   :  { %v202_v2 = vsel %vm200_vm0, 4294967295, %v4191_v1  ;;  %v130_v4 = vld [vmem:[%s4220_s5 + $0x8] sm:$0xff]  ;;  %vm175_vm2 = vcmask 220160   ;;  %v4053_v8 = vld [vmem:[%s4230_s13] sm:$0xff]   ;;  %v5643_v9 = vmov 0.0   ;;  %s4193_s0 = smov 8  }
  0x36   :  { %v203_v5 = vsel %vm201_vm1, %v202_v2, 0  ;;  %v149_v6 = vpack.c.bf16 %v130_v4, %v129_v3  ;;  %1312 = vrot.lane.b32.xlu0 %v5643_v9, %s4193_s0  ;;  %v131_v10 = vld [vmem:[%s4220_s5 + $0x10] sm:$0xff]  ;;  %v132_v11 = vld [vmem:[%s4220_s5 + $0x18] sm:$0xff]  ;;  %v133_v12 = vld [vmem:[%s4220_s5 + $0x20] sm:$0xff] }
  0x37   :  { %v205_v7 = vand.u32 %v4052_v0, %v203_v5  ;;  %v134_v13 = vld [vmem:[%s4220_s5 + $0x28] sm:$0xff]  ;;  %v150_v14 = vpack.c.bf16 %v132_v11, %v131_v10  ;;  %v135_v16 = vld [vmem:[%s4220_s5 + $0x30] sm:$0xff]  ;;  %v136_v17 = vld [vmem:[%s4220_s5 + $0x38] sm:$0xff] }
  0x38   :  { %3808 = vmatprep.mubr.msk.bf16.mxu0 %vm175_vm2, %v149_v6  ;;  %v151_v15 = vpack.c.bf16 %v134_v13, %v133_v12  ;;  %v137_v18 = vld [vmem:[%s4220_s5 + $0x40] sm:$0xff]  ;;  %v138_v19 = vld [vmem:[%s4220_s5 + $0x48] sm:$0xff]  ;;  %v152_v20 = vpack.c.bf16 %v136_v17, %v135_v16 }
  0x39   :  { %3804 = vmatprep.subr.bf16.mxu0 %v205_v7  ;;  %v153_v21 = vpack.c.bf16 %v138_v19, %v137_v18 }
  0x3a   :  { %3805 = vmatpush3.bf16.msra.mxu0 %v205_v7 }
  0x3b   :  { %3806 = vmatprep.subr.bf16.mxu0 %v4053_v8 }
  0x3e   :  { %3807 = vmatpush3.bf16.msra.mxu0 %v4053_v8 }
  0x41   :  { %3809 = vmatmul.mubr.msk.bf16.vlgmr.msra.gmra.mxu0 %vm175_vm2, %v150_v14 }
  0x42   :  { %3812 = vmatprep.mubr.msk.bf16.mxu0 %vm175_vm2, %v151_v15 }
  0x43   :  { %71 = vsyncpa [#allocation3], 0  ;;  %v139_v22 = vld [vmem:[%s4220_s5 + $0x50] sm:$0xff]  ;;  %v140_v23 = vld [vmem:[%s4220_s5 + $0x58] sm:$0xff]  ;;  %s4194_s13 = smov 16   ;;  %s4195_s28 = smov 24   ;;  %v1034_v37 = vlaneseq }
  0x44   :  { %v141_v24 = vld [vmem:[%s4220_s5 + $0x60] sm:$0xff]  ;;  %v142_v25 = vld [vmem:[%s4220_s5 + $0x68] sm:$0xff]  ;;  %v154_v26 = vpack.c.bf16 %v140_v23, %v139_v22  ;;  %v143_v28 = vld [vmem:[%s4220_s5 + $0x70] sm:$0xff]  ;;  %1351 = vrot.lane.b32.xlu1 %v5643_v9, %s4194_s13  ;;  %s4196_s1 = smov 48   ;;  %vm361_vm3 = vcmask 1043456   ;;  %vm336_vm4 = vcmask 64512  }
  0x45   :  { %v155_v27 = vpack.c.bf16 %v142_v25, %v141_v24  ;;  %v144_v29 = vld [vmem:[%s4220_s5 + $0x78] sm:$0xff]  ;;  %1390 = vrot.lane.b32.xlu0 %v5643_v9, %s4195_s28  ;;  %v320_v31 = vld [vmem:[%s4240_s21] sm:$0xf]  ;;  %v4197_v35 = vmov 1983009808   ;;  %v4422_v39 = vshrl.u32 %v1034_v37, 7 }
  0x46   :  { %v156_v30 = vpack.c.bf16 %v144_v29, %v143_v28  ;;  %v574_v32 = vld [vmem:[%s4250_s29] sm:$0xf]  ;;  %3996 = vmatprep.subr.msk.bf16.mxu1 %vm361_vm3, %v320_v31  ;;  %v363_v33 = vsel %vm361_vm3, %v320_v31, 0  ;;  %v1032_v36 = vunpack.c.l.s4 %v4197_v35  ;;  %s4198_s5 = smov 56   ;;  %s4200_s21 = smov 32   ;;  %vm591_vm5 = vcmask 130048  }
  0x47   :  { %3997 = vmatprep.subr.msk.bf16.mxu0 %vm361_vm3, %v574_v32  ;;  %v714_v34 = vsel %vm361_vm3, %v574_v32, 0  ;;  %3825 = vmatpush3.bf16.msra.mxu1 %v363_v33  ;;  %5682 = vst [vmem:[#allocation20_spill] sm:$0xff] %v4422_v39  ;;  %v4425_v40 = vld [vmem:[%s4235_s17] ss:$0 sm:$0xff]  ;;  %s4199_s17 = smov 64   ;;  %s4201_s29 = smov 40  }
  0x48   :  { %1749 = vrot.lane.b32.xlu1 %v5643_v9, %s4196_s1  ;;  %3861 = vmatpush3.bf16.msra.mxu0 %v714_v34  ;;  %v1033_v38 = vunpack.c.0.s8 %v1032_v36  ;;  %vm2134_vm6 = vcmask 195584   ;;  %vm2151_vm7 = vcmask 261120   ;;  %vm2168_vm8 = vcmask 326656   ;;  %s5768_s2 = sld [smem:[#allocation10_spill]]  ;;  %s4207_s10 = smov 6  }
  0x49   :  { %3813 = vmatmul.mubr.msk.bf16.gmra.mxu0 %vm175_vm2, %v152_v20  ;;  %vm2185_vm9 = vcmask 392192   ;;  %vm2202_vm10 = vcmask 457728   ;;  %vm2219_vm11 = vcmask 523264   ;;  %vm2369_vm12 = vcmask 588800   ;;  %s5769_s7 = sld [smem:[#allocation13_spill]]  ;;  %s4208_s18 = smov 38  }
  0x4a   :  { %3816 = vmatprep.mubr.msk.bf16.mxu0 %vm175_vm2, %v153_v21  ;;  %v4429_v43 = vsub.s32 %v1033_v38, %v4422_v39  ;;  %vm4202_vm13 = vmmov 0   ;;  %vm2745_vm14 = vcmask 123904   ;;  %vm980_vm15 = vcmask 89088   ;;  %s5770_s11 = sld [smem:[#allocation15_spill]]  ;;  %s4209_s26 = smov [#allocation2]  }
  0x4b   :  { %vm997_vm0 = vcmask 154624   ;;  %s5771_s15 = sld [smem:[#allocation17_spill]]  ;;  %vm3499_vm1 = vcmask 1041408  }
  0x4c   :  { %s5772_s16 = sld [smem:[#allocation5_spill]] }
  0x4d   :  { %s5773_s22 = sld [smem:[#allocation18_spill]] }
  0x4e   :  { %s5774_s23 = sld [smem:[#allocation14_spill]] }
  0x51   :  { %3817 = vmatmul.mubr.msk.bf16.gmra.mxu0 %vm175_vm2, %v154_v26 }
  0x52   :  { %3820 = vmatprep.mubr.msk.bf16.mxu0 %vm175_vm2, %v155_v27 }
  0x59   :  { %3821 = vmatmul.mubr.msk.bf16.gmra.mxu0 %vm175_vm2, %v156_v30  ;;  %vm3495_vm2 = vcmask 31744  }
 0x101   :  { %v3810_v41 = vpop.f32.mrf.mxu0 }
 0x102   :  { %v250_v42 = vadd.f32 %v3810_v41, %v4425_v40 }
 0x103   :  { %v241_v44 = vpop.f32.mrf.mxu0 }
 0x104   :  { %v306_v45 = vmax.f32 %v250_v42, 0.0  ;;  %v242_v50 = vadd.f32 %v4425_v40, %v241_v44 }
 0x105   :  { %v3811_v46 = vpop.f32.mrf.mxu0 }
 0x106   :  { %v1064_v47 = vcombine.high %v306_v45, %v306_v45  ;;  %v253_v48 = vadd.f32 %v3811_v46, %v4425_v40  ;;  %v1071_v49 = vrot.slane %v306_v45, %v4429_v43  ;;  %v4445_v58 = vmax.f32 %v242_v50, 0.0 }
 0x107   :  { %v244_v51 = vpop.f32.mrf.mxu0 }
 0x108   :  { %v245_v52 = vadd.f32 %v4425_v40, %v244_v51  ;;  %1314 = vrot.lane.b32.xlu0 %v1071_v49, %s4193_s0  ;;  %v4436_v53 = vmax.f32 %v253_v48, 0.0  ;;  %v4439_v55 = vrot.slane %v1064_v47, %v4429_v43  ;;  %v4443_v57 = vcombine.high %v1071_v49, %v1071_v49 }
 0x109   :  { %v3814_v54 = vpop.f32.mrf.mxu0  ;;  %v1037_v8 = vrot.slane %v4445_v58, %v4429_v43  ;;  %v1794_v14 = vrot.slane %v1071_v49, %v4429_v43  ;;  %v1030_v32 = vcombine.high %v4445_v58, %v4445_v58 }
 0x10a   :  { %v4441_v56 = vmax.f32 %v245_v52, 0.0  ;;  %1316 = vrot.lane.b32.xlu1 %v4439_v55, %s4193_s0  ;;  %v266_v60 = vadd.f32 %v3814_v54, %v4425_v40  ;;  %v4455_v63 = vrot.slane %v4436_v53, %v4429_v43  ;;  %v322_v1 = vpack.c.bf16 %v4436_v53, %v306_v45 }
 0x10b   :  { %v257_v59 = vpop.f32.mrf.mxu0  ;;  %v4480_v11 = vcombine.high %v4439_v55, %v4439_v55  ;;  %v1045_v20 = vcombine.high %v1037_v8, %v1037_v8  ;;  %v1081_v22 = vcombine.high %v4436_v53, %v4436_v53  ;;  %v1954_v24 = vrot.slane %v4443_v57, %v4429_v43 }
 0x10c   :  { %v258_v61 = vadd.f32 %v4425_v40, %v257_v59  ;;  %1353 = vrot.lane.b32.xlu0 %v4443_v57, %s4194_s13  ;;  %v321_v0 = vpack.c.bf16 %v4441_v56, %v4445_v58  ;;  %v4464_v4 = vmax.f32 %v266_v60, 0.0  ;;  %v1435_v30 = vrot.slane %v1037_v8, %v4429_v43 }
 0x10d   :  { %v3815_v62 = vpop.f32.mrf.mxu0  ;;  %v1095_v34 = vrot.slane %v1081_v22, %v4429_v43  ;;  %v4532_v45 = vcombine.high %v4455_v63, %v4455_v63  ;;  %v1044_v46 = vrot.slane %v1030_v32, %v4429_v43  ;;  %v1801_v51 = vrot.slane %v4439_v55, %v4429_v43 }
 0x10e   :  { %v269_v2 = vadd.f32 %v3815_v62, %v4425_v40  ;;  %1318 = vrot.lane.b32.xlu1 %v4455_v63, %s4193_s0  ;;  %3826 = vmatprep.mubr.msk.bf16.mxu1 %vm336_vm4, %v321_v0  ;;  %v4466_v5 = vmax.f32 %v258_v61, 0.0  ;;  %v1595_v58 = vrot.slane %v1045_v20, %v4429_v43  ;;  %v1961_v59 = vrot.slane %v4480_v11, %v4429_v43 }
 0x10f   :  { %v260_v3 = vpop.f32.mrf.mxu0  ;;  %3862 = vmatprep.mubr.msk.bf16.mxu0 %vm336_vm4, %v321_v0  ;;  %3827 = vmatmul.mubr.msk.bf16.vlgmr.msra.gmra.mxu1 %vm336_vm4, %v322_v1  ;;  %v1046_v53 = vcombine.high %v1044_v46, %v1044_v46  ;;  %v1442_v55 = vrot.slane %v1044_v46, %v4429_v43  ;;  %v1139_v60 = vrot.slane %v4464_v4, %v4429_v43 }
 0x110   :  { %v4468_v6 = vmax.f32 %v269_v2, 0.0  ;;  %v261_v7 = vadd.f32 %v4425_v40, %v260_v3  ;;  %3863 = vmatmul.mubr.msk.bf16.vlgmr.msra.gmra.mxu0 %vm336_vm4, %v322_v1  ;;  %1751 = vrot.lane.b32.xlu0 %v4443_v57, %s4196_s1  ;;  %v1808_v61 = vrot.slane %v4455_v63, %v4429_v43  ;;  %v1054_v62 = vrot.slane %v4441_v56, %v4429_v43 }
 0x111   :  { %v3818_v10 = vpop.f32.mrf.mxu0  ;;  %v1097_v0 = vcombine.high %v1095_v34, %v1095_v34  ;;  %v1602_v1 = vrot.slane %v1046_v53, %v4429_v43  ;;  %v1132_v3 = vcombine.high %v4464_v4, %v4464_v4  ;;  %v1968_v63 = vrot.slane %v4532_v45, %v4429_v43 }
 0x112   :  { %v4482_v12 = vmax.f32 %v261_v7, 0.0  ;;  %1355 = vrot.lane.b32.xlu1 %v4480_v11, %s4194_s13  ;;  %v324_v15 = vpack.c.bf16 %v4468_v6, %v4464_v4  ;;  %v282_v17 = vadd.f32 %v3818_v10, %v4425_v40  ;;  %v1062_v2 = vcombine.high %v1054_v62, %v1054_v62 }
 0x113   :  { %v273_v13 = vpop.f32.mrf.mxu0  ;;  %v1449_v7 = vrot.slane %v1054_v62, %v4429_v43  ;;  %v1047_v8 = vcombine.high %v4441_v56, %v4441_v56  ;;  %v1146_v10 = vrot.slane %v1132_v3, %v4429_v43  ;;  %v1815_v4 = vrot.slane %v1095_v34, %v4429_v43 }
 0x114   :  { %v323_v16 = vpack.c.bf16 %v4482_v12, %v4466_v5  ;;  %v274_v18 = vadd.f32 %v4425_v40, %v273_v13  ;;  %1900 = vrot.lane.b32.xlu0 %v1794_v14, %s4198_s5  ;;  %v4502_v25 = vmax.f32 %v282_v17, 0.0  ;;  %v4595_v13 = vcombine.high %v1139_v60, %v1139_v60 }
 0x115   :  { %v3819_v19 = vpop.f32.mrf.mxu0  ;;  %v1061_v14 = vrot.slane %v1047_v8, %v4429_v43  ;;  %v1822_v17 = vrot.slane %v1139_v60, %v4429_v43  ;;  %v1829_v32 = vrot.slane %v1146_v10, %v4429_v43 }
 0x116   :  { %v285_v21 = vadd.f32 %v3819_v19, %v4425_v40  ;;  %3830 = vmatprep.mubr.msk.bf16.mxu1 %vm336_vm4, %v323_v16  ;;  %3866 = vmatprep.mubr.msk.bf16.mxu0 %vm336_vm4, %v323_v16  ;;  %v4504_v26 = vmax.f32 %v274_v18, 0.0  ;;  %5683 = vst [vmem:[#allocation21_spill] sm:$0xff] %v4595_v13  ;;  %v1105_v16 = vrot.slane %v4466_v5, %v4429_v43 }
 0x117   :  { %1392 = vrot.lane.b32.xlu1 %v1045_v20, %s4195_s28  ;;  %v276_v23 = vpop.f32.mrf.mxu0  ;;  %3831 = vmatmul.mubr.msk.bf16.gmra.mxu1 %vm336_vm4, %v324_v15  ;;  %v1456_v56 = vrot.slane %v1061_v14, %v4429_v43  ;;  %v1975_v18 = vrot.slane %v1097_v0, %v4429_v43  ;;  %v1063_v20 = vcombine.high %v1061_v14, %v1061_v14 }
 0x118   :  { %v4506_v27 = vmax.f32 %v285_v21, 0.0  ;;  %v277_v28 = vadd.f32 %v4425_v40, %v276_v23  ;;  %2060 = vrot.lane.b32.xlu0 %v1954_v24, %s4199_s17  ;;  %3867 = vmatmul.mubr.msk.bf16.gmra.mxu0 %vm336_vm4, %v324_v15  ;;  %v1609_v15 = vrot.slane %v1062_v2, %v4429_v43  ;;  %v1113_v19 = vcombine.high %v1105_v16, %v1105_v16 }
 0x119   :  { %v3822_v29 = vpop.f32.mrf.mxu0  ;;  %v1156_v21 = vrot.slane %v4468_v6, %v4429_v43  ;;  %v1616_v22 = vrot.slane %v1063_v20, %v4429_v43  ;;  %v4618_v23 = vcombine.high %v1146_v10, %v1146_v10  ;;  %v1098_v24 = vcombine.high %v4466_v5, %v4466_v5 }
 0x11a   :  { %v4513_v31 = vmax.f32 %v277_v28, 0.0  ;;  %v326_v35 = vpack.c.bf16 %v4506_v27, %v4502_v25  ;;  %v298_v37 = vadd.f32 %v3822_v29, %v4425_v40  ;;  %v1463_v28 = vrot.slane %v1105_v16, %v4429_v43 }
 0x11b   :  { %1541 = vrot.lane.b32.xlu1 %v1435_v30, %s4200_s21  ;;  %v289_v33 = vpop.f32.mrf.mxu0  ;;  %5684 = vst [vmem:[#allocation22_spill] sm:$0xff] %v4618_v23  ;;  %v1149_v29 = vcombine.high %v4468_v6, %v4468_v6  ;;  %v1982_v30 = vrot.slane %v4595_v13, %v4429_v43  ;;  %v1112_v5 = vrot.slane %v1098_v24, %v4429_v43 }
 0x11c   :  { %v325_v36 = vpack.c.bf16 %v4513_v31, %v4504_v26  ;;  %v290_v38 = vadd.f32 %v4425_v40, %v289_v33  ;;  %1320 = vrot.lane.b32.xlu0 %v1095_v34, %s4193_s0  ;;  %v4536_v47 = vmax.f32 %v298_v37, 0.0  ;;  %v4639_v6 = vcombine.high %v1156_v21, %v1156_v21 }
 0x11d   :  { %v3823_v41 = vpop.f32.mrf.mxu0  ;;  %v1163_v33 = vrot.slane %v1149_v29, %v4429_v43  ;;  %v1114_v34 = vcombine.high %v1112_v5, %v1112_v5  ;;  %v1470_v37 = vrot.slane %v1112_v5, %v4429_v43  ;;  %v1207_v46 = vrot.slane %v4502_v25, %v4429_v43 }
 0x11e   :  { %v301_v42 = vadd.f32 %v3823_v41, %v4425_v40  ;;  %3834 = vmatprep.mubr.msk.bf16.mxu1 %vm336_vm4, %v325_v36  ;;  %3870 = vmatprep.mubr.msk.bf16.mxu0 %vm336_vm4, %v325_v36  ;;  %v4538_v48 = vmax.f32 %v290_v38, 0.0  ;;  %5685 = vst [vmem:[#allocation23_spill] sm:$0xff] %v4639_v6  ;;  %v4054_v36 = vld [vmem:[%s4255_s3] sm:$0xff]   ;;  %v1122_v38 = vrot.slane %v4482_v12, %v4429_v43  ;;  %s5747_s3 = sld [smem:[#allocation7_spill]] }
 0x11f   :  { %1753 = vrot.lane.b32.xlu1 %v4480_v11, %s4196_s1  ;;  %v292_v44 = vpop.f32.mrf.mxu0  ;;  %3835 = vmatmul.mubr.msk.bf16.gmra.mxu1 %vm336_vm4, %v326_v35  ;;  %v1836_v41 = vrot.slane %v1156_v21, %v4429_v43  ;;  %v1843_v62 = vrot.slane %v1163_v33, %v4429_v43  ;;  %v1850_v16 = vrot.slane %v1207_v46, %v4429_v43 }
 0x120   :  { %v4540_v49 = vmax.f32 %v301_v42, 0.0  ;;  %v293_v50 = vadd.f32 %v4425_v40, %v292_v44  ;;  %1357 = vrot.lane.b32.xlu0 %v4532_v45, %s4194_s13  ;;  %3871 = vmatmul.mubr.msk.bf16.gmra.mxu0 %vm336_vm4, %v326_v35  ;;  %v1623_v35 = vrot.slane %v1113_v19, %v4429_v43  ;;  %v1989_v42 = vrot.slane %v4618_v23, %v4429_v43 }
 0x121   :  { %3842 = vmatprep.subr.bf16.mxu1 %v4054_v36  ;;  %v1130_v44 = vcombine.high %v1122_v38, %v1122_v38  ;;  %v1217_v29 = vcombine.high %v4506_v27, %v4506_v27 }
 0x122   :  { %v4548_v52 = vmax.f32 %v293_v50, 0.0  ;;  %v328_v54 = vpack.c.bf16 %v4540_v49, %v4536_v47  ;;  %3843 = vmatpush3.bf16.msra.mxu1 %v4054_v36  ;;  %v4660_v50 = vpop.permute.xlu0 %1312 }
 0x123   :  { %1902 = vrot.lane.b32.xlu1 %v1801_v51, %s4198_s5  ;;  %v1630_v51 = vrot.slane %v1114_v34, %v4429_v43 }
 0x124   :  { %v327_v40 = vpack.c.bf16 %v4548_v52, %v4538_v48  ;;  %1394 = vrot.lane.b32.xlu0 %v1046_v53, %s4195_s28  ;;  %v1165_v53 = vcombine.high %v1163_v33, %v1163_v33 }
 0x126   :  { %3838 = vmatprep.mubr.msk.bf16.mxu1 %vm336_vm4, %v327_v40  ;;  %3874 = vmatprep.mubr.msk.bf16.mxu0 %vm336_vm4, %v327_v40  ;;  %v1200_v40 = vcombine.high %v4502_v25, %v4502_v25 }
 0x127   :  { %1701 = vrot.lane.b32.xlu1 %v1595_v58, %s4201_s29  ;;  %3839 = vmatmul.mubr.msk.bf16.gmra.mxu1 %vm336_vm4, %v328_v54  ;;  %v1996_v58 = vrot.slane %v4639_v6, %v4429_v43 }
 0x128   :  { %1543 = vrot.lane.b32.xlu0 %v1442_v55, %s4200_s21  ;;  %3875 = vmatmul.mubr.msk.bf16.gmra.mxu0 %vm336_vm4, %v328_v54  ;;  %v4665_v54 = vpop.permute.xlu1 %1351  ;;  %v4672_v55 = vpop.permute.xlu0 %1390  ;;  %v1214_v25 = vrot.slane %v1200_v40, %v4429_v43 }
 0x12a   :  { %v4721_v20 = vcombine.high %v1214_v25, %v1214_v25 }
 0x12b   :  { %2062 = vrot.lane.b32.xlu1 %v1961_v59, %s4199_s17  ;;  %v1477_v59 = vrot.slane %v1122_v38, %v4429_v43 }
 0x12c   :  { %1755 = vrot.lane.b32.xlu0 %v4532_v45, %s4196_s1  ;;  %5688 = vst [vmem:[#allocation26_spill] sm:$0xff] %v4721_v20 }
 0x12f   :  { %1322 = vrot.lane.b32.xlu1 %v1139_v60, %s4193_s0  ;;  %v1115_v60 = vcombine.high %v4482_v12, %v4482_v12  ;;  %v1637_v12 = vrot.slane %v1130_v44, %v4429_v43 }
 0x130   :  { %1904 = vrot.lane.b32.xlu0 %v1808_v61, %s4198_s5  ;;  %v4679_v61 = vpop.permute.xlu1 %1749 }
 0x133   :  { %1359 = vrot.lane.b32.xlu1 %v1097_v0, %s4194_s13 }
 0x134   :  { %1703 = vrot.lane.b32.xlu0 %v1602_v1, %s4201_s29  ;;  %v4687_v1 = vcombine.high %v1207_v46, %v1207_v46 }
 0x136   :  { %5686 = vst [vmem:[#allocation24_spill] sm:$0xff] %v4687_v1 }
 0x137   :  { %1396 = vrot.lane.b32.xlu1 %v1062_v2, %s4195_s28  ;;  %v1129_v2 = vrot.slane %v1115_v60, %v4429_v43  ;;  %v2017_v60 = vrot.slane %v4721_v20, %v4429_v43 }
 0x138   :  { %2064 = vrot.lane.b32.xlu0 %v1968_v63, %s4199_s17 }
 0x13b   :  { %1545 = vrot.lane.b32.xlu1 %v1449_v7, %s4200_s21  ;;  %v1484_v7 = vrot.slane %v1129_v2, %v4429_v43 }
 0x13c   :  { %1324 = vrot.lane.b32.xlu0 %v1146_v10, %s4193_s0  ;;  %v2003_v10 = vrot.slane %v1165_v53, %v4429_v43 }
 0x13f   :  { %1906 = vrot.lane.b32.xlu1 %v1815_v4, %s4198_s5 }
 0x140   :  { %1361 = vrot.lane.b32.xlu0 %v4595_v13, %s4194_s13 }
 0x143   :  { %1705 = vrot.lane.b32.xlu1 %v1609_v15, %s4201_s29  ;;  %v1224_v15 = vrot.slane %v4506_v27, %v4429_v43  ;;  %v1231_v27 = vrot.slane %v1217_v29, %v4429_v43 }
 0x144   :  { %1547 = vrot.lane.b32.xlu0 %v1456_v56, %s4200_s21 }
 0x145   :  { %v4755_v38 = vcombine.high %v1224_v15, %v1224_v15 }
 0x147   :  { %1757 = vrot.lane.b32.xlu1 %v4595_v13, %s4196_s1  ;;  %5690 = vst [vmem:[#allocation28_spill] sm:$0xff] %v4755_v38 }
 0x148   :  { %1908 = vrot.lane.b32.xlu0 %v1822_v17, %s4198_s5  ;;  %v1131_v17 = vcombine.high %v1129_v2, %v1129_v2 }
 0x14b   :  { %2066 = vrot.lane.b32.xlu1 %v1975_v18, %s4199_s17  ;;  %v1173_v18 = vrot.slane %v4504_v26, %v4429_v43 }
 0x14c   :  { %1398 = vrot.lane.b32.xlu0 %v1113_v19, %s4195_s28 }
 0x14f   :  { %1326 = vrot.lane.b32.xlu1 %v1156_v21, %s4193_s0 }
 0x150   :  { %1707 = vrot.lane.b32.xlu0 %v1616_v22, %s4201_s29  ;;  %v1644_v22 = vrot.slane %v1131_v17, %v4429_v43 }
 0x153   :  { %1363 = vrot.lane.b32.xlu1 %v4618_v23, %s4194_s13 }
 0x154   :  { %1759 = vrot.lane.b32.xlu0 %v4618_v23, %s4196_s1 }
 0x157   :  { %1549 = vrot.lane.b32.xlu1 %v1463_v28, %s4200_s21  ;;  %v1181_v28 = vcombine.high %v1173_v18, %v1173_v18 }
 0x158   :  { %2068 = vrot.lane.b32.xlu0 %v1982_v30, %s4199_s17 }
 0x15b   :  { %1910 = vrot.lane.b32.xlu1 %v1829_v32, %s4198_s5  ;;  %v2010_v32 = vrot.slane %v4687_v1, %v4429_v43 }
 0x15c   :  { %1328 = vrot.lane.b32.xlu0 %v1163_v33, %s4193_s0  ;;  %v1491_v33 = vrot.slane %v1173_v18, %v4429_v43  ;;  %v1183_v18 = vcombine.high %v4513_v31, %v4513_v31 }
 0x15f   :  { %1400 = vrot.lane.b32.xlu1 %v1114_v34, %s4195_s28  ;;  %v1166_v34 = vcombine.high %v4504_v26, %v4504_v26 }
 0x160   :  { %1365 = vrot.lane.b32.xlu0 %v4639_v6, %s4194_s13 }
 0x163   :  { %1709 = vrot.lane.b32.xlu1 %v1623_v35, %s4201_s29 }
 0x164   :  { %1551 = vrot.lane.b32.xlu0 %v1470_v37, %s4200_s21 }
 0x167   :  { %1761 = vrot.lane.b32.xlu1 %v4639_v6, %s4196_s1 }
 0x168   :  { %1912 = vrot.lane.b32.xlu0 %v1836_v41, %s4198_s5  ;;  %v1180_v41 = vrot.slane %v1166_v34, %v4429_v43 }
 0x16b   :  { %2070 = vrot.lane.b32.xlu1 %v1989_v42, %s4199_s17  ;;  %v1857_v42 = vrot.slane %v1214_v25, %v4429_v43 }
 0x16c   :  { %1402 = vrot.lane.b32.xlu0 %v1130_v44, %s4195_s28 }
 0x16f   :  { %1330 = vrot.lane.b32.xlu1 %v1207_v46, %s4193_s0  ;;  %v1182_v46 = vcombine.high %v1180_v41, %v1180_v41 }
 0x170   :  { %1711 = vrot.lane.b32.xlu0 %v1630_v51, %s4201_s29 }
 0x173   :  { %1367 = vrot.lane.b32.xlu1 %v1165_v53, %s4194_s13  ;;  %v1651_v53 = vrot.slane %v1181_v28, %v4429_v43 }
 0x174   :  { %2072 = vrot.lane.b32.xlu0 %v1996_v58, %s4199_s17  ;;  %v1498_v58 = vrot.slane %v1180_v41, %v4429_v43  ;;  %v1871_v41 = vrot.slane %v1231_v27, %v4429_v43 }
 0x177   :  { %1553 = vrot.lane.b32.xlu1 %v1477_v59, %s4200_s21 }
 0x178   :  { %1332 = vrot.lane.b32.xlu0 %v1214_v25, %s4193_s0 }
 0x17a   :  { %v4684_v0 = vpop.permute.xlu0 %1314 }
 0x17b   :  { %1914 = vrot.lane.b32.xlu1 %v1843_v62, %s4198_s5  ;;  %v1190_v62 = vrot.slane %v4513_v31, %v4429_v43  ;;  %v1197_v31 = vrot.slane %v1183_v18, %v4429_v43 }
 0x17c   :  { %v4690_v3 = vpop.permute.xlu1 %1316  ;;  %1369 = vrot.lane.b32.xlu0 %v4687_v1, %s4194_s13 }
 0x17d   :  { %v1198_v17 = vcombine.high %v1190_v62, %v1190_v62 }
 0x17e   :  { %v4695_v63 = vpop.permute.xlu0 %1353 }
 0x17f   :  { %1713 = vrot.lane.b32.xlu1 %v1637_v12, %s4201_s29  ;;  %v1233_v12 = vcombine.high %v1231_v27, %v1231_v27 }
 0x180   :  { %v4699_v8 = vpop.permute.xlu1 %1318  ;;  %1555 = vrot.lane.b32.xlu0 %v1484_v7, %s4200_s21 }
 0x182   :  { %v4703_v4 = vpop.permute.xlu0 %1751 }
 0x183   :  { %2074 = vrot.lane.b32.xlu1 %v2003_v10, %s4199_s17  ;;  %v1864_v10 = vrot.slane %v1224_v15, %v4429_v43 }
 0x184   :  { %v4706_v14 = vpop.permute.xlu1 %1355  ;;  %1763 = vrot.lane.b32.xlu0 %v4687_v1, %s4196_s1 }
 0x186   :  { %v4712_v56 = vpop.permute.xlu0 %1900 }
 0x187   :  { %5687 = vst [vmem:[#allocation25_spill] sm:$0xff] %v4712_v56  ;;  %1334 = vrot.lane.b32.xlu1 %v1224_v15, %s4193_s0  ;;  %v1505_v15 = vrot.slane %v1190_v62, %v4429_v43  ;;  %v1241_v62 = vrot.slane %v4538_v48, %v4429_v43 }
 0x188   :  { %1916 = vrot.lane.b32.xlu0 %v1850_v16, %s4198_s5 }
 0x189   :  { %v4718_v19 = vpop.permute.xlu1 %1392 }
 0x18a   :  { %v4723_v21 = vpop.permute.xlu0 %2060 }
 0x18b   :  { %5689 = vst [vmem:[#allocation27_spill] sm:$0xff] %v4723_v21  ;;  %1371 = vrot.lane.b32.xlu1 %v4721_v20, %s4194_s13 }
 0x18c   :  { %1715 = vrot.lane.b32.xlu0 %v1644_v22, %s4201_s29 }
 0x18d   :  { %v4728_v24 = vpop.permute.xlu1 %1541 }
 0x18e   :  { %v4733_v30 = vpop.permute.xlu0 %1320 }
 0x18f   :  { %1404 = vrot.lane.b32.xlu1 %v1181_v28, %s4195_s28  ;;  %v1658_v28 = vrot.slane %v1182_v46, %v4429_v43 }
 0x190   :  { %2076 = vrot.lane.b32.xlu0 %v2010_v32, %s4199_s17 }
 0x191   :  { %v4738_v5 = vpop.permute.xlu1 %1753 }
 0x192   :  { %v4744_v35 = vpop.permute.xlu0 %1357 }
 0x193   :  { %1557 = vrot.lane.b32.xlu1 %v1491_v33, %s4200_s21  ;;  %v2024_v33 = vrot.slane %v4755_v38, %v4429_v43 }
 0x194   :  { %1336 = vrot.lane.b32.xlu0 %v1231_v27, %s4193_s0 }
 0x195   :  { %v4748_v36 = vpop.permute.xlu1 %1902 }
 0x196   :  { %v4753_v37 = vpop.permute.xlu0 %1394 }
 0x197   :  { %1765 = vrot.lane.b32.xlu1 %v4721_v20, %s4196_s1  ;;  %v1285_v20 = vcombine.high %v4540_v49, %v4540_v49 }
 0x198   :  { %1373 = vrot.lane.b32.xlu0 %v4755_v38, %s4194_s13 }
 0x199   :  { %v4758_v26 = vpop.permute.xlu1 %1701 }
 0x19a   :  { %v4764_v44 = vpop.permute.xlu0 %1543 }
 0x19b   :  { %1918 = vrot.lane.b32.xlu1 %v1857_v42, %s4198_s5  ;;  %v1275_v42 = vrot.slane %v4536_v47, %v4429_v43 }
 0x19c   :  { %1406 = vrot.lane.b32.xlu0 %v1182_v46, %s4195_s28 }
 0x19d   :  { %v4766_v51 = vpop.permute.xlu1 %2062 }
 0x19e   :  { %5691 = vst [vmem:[#allocation29_spill] sm:$0xff] %v4766_v51  ;;  %v4771_v40 = vpop.permute.xlu0 %1755 }
 0x19f   :  { %1717 = vrot.lane.b32.xlu1 %v1651_v53, %s4201_s29  ;;  %v1512_v53 = vrot.slane %v1197_v31, %v4429_v43 }
 0x1a0   :  { %1559 = vrot.lane.b32.xlu0 %v1498_v58, %s4200_s21 }
 0x1a1   :  { %v4774_v59 = vpop.permute.xlu1 %1322 }
 0x1a2   :  { %5692 = vst [vmem:[#allocation30_spill] sm:$0xff] %v4774_v59  ;;  %v4780_v25 = vpop.permute.xlu0 %1904 }
 0x1a3   :  { %2078 = vrot.lane.b32.xlu1 %v2017_v60, %s4199_s17  ;;  %v1665_v60 = vrot.slane %v1198_v17, %v4429_v43 }
 0x1a4   :  { %1767 = vrot.lane.b32.xlu0 %v4755_v38, %s4196_s1 }
 0x1a5   :  { %v4784_v2 = vpop.permute.xlu1 %1359 }
 0x1a6   :  { %v4789_v7 = vpop.permute.xlu0 %1703 }
 0x1a7   :  { %1375 = vrot.lane.b32.xlu1 %v1233_v12, %s4194_s13  ;;  %s3561_s13 = sshll.u32 %s4209_s26, 4  ;;  %s3562_s13 = int_to_ptr.vmem [resolvable:$true] %s3561_s13 }
 0x1a8   :  { %1920 = vrot.lane.b32.xlu0 %v1864_v10, %s4198_s5  ;;  %v1878_v10 = vrot.slane %v1275_v42, %v4429_v43  ;;  %p4142_p1 = scmp.lt.s32.totalorder %s3562_s13, %s3562_s13 }
 0x1a9   :  { %v4792_v16 = vpop.permute.xlu1 %1396 }
 0x1aa   :  { %v4798_v22 = vpop.permute.xlu0 %2064 }
 0x1ab   :  { %1408 = vrot.lane.b32.xlu1 %v1198_v17, %s4195_s28  ;;  %5693 = vst [vmem:[#allocation31_spill] sm:$0xff] %v4798_v22 }
 0x1ac   :  { %1719 = vrot.lane.b32.xlu0 %v1658_v28, %s4201_s29  ;;  %v1283_v28 = vcombine.high %v1275_v42, %v1275_v42 }
 0x1ad   :  { %v4801_v29 = vpop.permute.xlu1 %1545 }
 0x1ae   :  { %v4806_v32 = vpop.permute.xlu0 %1324 }
 0x1af   :  { %1561 = vrot.lane.b32.xlu1 %v1505_v15, %s4200_s21  ;;  %5694 = vst [vmem:[#allocation32_spill] sm:$0xff] %v4806_v32  ;;  %v1268_v15 = vcombine.high %v4536_v47, %v4536_v47 }
 0x1b0   :  { %2080 = vrot.lane.b32.xlu0 %v2024_v33, %s4199_s17  ;;  %v1249_v33 = vcombine.high %v1241_v62, %v1241_v62 }
 0x1b1   :  { %v4811_v34 = vpop.permute.xlu1 %1906  ;;  %v1282_v9 = vrot.slane %v1268_v15, %v4429_v43 }
 0x1b2   :  { %v4818_v46 = vpop.permute.xlu0 %1361 }
 0x1b3   :  { %1922 = vrot.lane.b32.xlu1 %v1871_v41, %s4198_s5  ;;  %5695 = vst [vmem:[#allocation33_spill] sm:$0xff] %v4818_v46  ;;  %v1199_v41 = vcombine.high %v1197_v31, %v1197_v31  ;;  %v1519_v31 = vrot.slane %v1241_v62, %v4429_v43  ;;  %v1284_v15 = vcombine.high %v1282_v9, %v1282_v9  ;;  %v4867_v62 = vld [vmem:[%s4265_s14 + $0x20] ss:$0 sps:$4 sm:$0xff]  }
 0x1b4   :  { %1563 = vrot.lane.b32.xlu0 %v1512_v53, %s4200_s21  ;;  %3998 = vmatprep.subr.msk.bf16.mxu1 %vm361_vm3, %v4867_v62 }
 0x1b5   :  { %v4821_v58 = vpop.permute.xlu1 %1705  ;;  %v1672_v47 = vrot.slane %v1199_v41, %v4429_v43  ;;  %v1885_v41 = vrot.slane %v1282_v9, %v4429_v43 }
 0x1b6   :  { %v4828_v27 = vpop.permute.xlu0 %1547 }
 0x1b7   :  { %1721 = vrot.lane.b32.xlu1 %v1665_v60, %s4201_s29  ;;  %v2031_v60 = vrot.slane %v1233_v12, %v4429_v43 }
 0x1b8   :  { %1924 = vrot.lane.b32.xlu0 %v1878_v10, %s4198_s5  ;;  %v1234_v10 = vcombine.high %v4538_v48, %v4538_v48  ;;  %v2038_v48 = vrot.slane %v1283_v28, %v4429_v43 }
 0x1b9   :  { %v4831_v18 = vpop.permute.xlu1 %1757 }
 0x1ba   :  { %v4837_v17 = vpop.permute.xlu0 %1908 }
 0x1bb   :  { %1769 = vrot.lane.b32.xlu1 %v1283_v28, %s4196_s1  ;;  %5696 = vst [vmem:[#allocation34_spill] sm:$0xff] %v4837_v17 }
 0x1bc   :  { %1410 = vrot.lane.b32.xlu0 %v1249_v33, %s4195_s28 }
 0x1bd   :  { %v4839_v53 = vpop.permute.xlu1 %2066 }
 0x1be   :  { %v4845_v42 = vpop.permute.xlu0 %1398 }
 0x1bf   :  { %2082 = vrot.lane.b32.xlu1 %v2031_v60, %s4199_s17  ;;  %v1248_v60 = vrot.slane %v1234_v10, %v4429_v43  ;;  %v1292_v10 = vrot.slane %v4540_v49, %v4429_v43 }
 0x1c0   :  { %1723 = vrot.lane.b32.xlu0 %v1672_v47, %s4201_s29 }
 0x1c1   :  { %v4850_v39 = vpop.permute.xlu1 %1326  ;;  %v1250_v6 = vcombine.high %v1248_v60, %v1248_v60  ;;  %v1526_v28 = vrot.slane %v1248_v60, %v4429_v43  ;;  %v1251_v60 = vcombine.high %v4548_v52, %v4548_v52 }
 0x1c2   :  { %5697 = vst [vmem:[#allocation35_spill] sm:$0xff] %v4850_v39  ;;  %v4855_v12 = vpop.permute.xlu0 %1707 }
 0x1c3   :  { %1565 = vrot.lane.b32.xlu1 %v1519_v31, %s4200_s21 }
 0x1c4   :  { %1771 = vrot.lane.b32.xlu0 %v1284_v15, %s4196_s1 }
 0x1c5   :  { %v4858_v38 = vpop.permute.xlu1 %1363 }
 0x1c6   :  { %5698 = vst [vmem:[#allocation36_spill] sm:$0xff] %v4858_v38  ;;  %v4864_v47 = vpop.permute.xlu0 %1759  ;;  %v1892_v38 = vrot.slane %v1292_v10, %v4429_v43 }
 0x1c7   :  { %1926 = vrot.lane.b32.xlu1 %v1885_v41, %s4198_s5  ;;  %5699 = vst [vmem:[#allocation37_spill] sm:$0xff] %v4864_v47  ;;  %v1679_v41 = vrot.slane %v1249_v33, %v4429_v43  ;;  %v4893_v33 = vcombine.high %v1292_v10, %v1292_v10 }
 0x1c8   :  { %2084 = vrot.lane.b32.xlu0 %v2038_v48, %s4199_s17  ;;  %v1258_v48 = vrot.slane %v4548_v52, %v4429_v43  ;;  %v2045_v52 = vrot.slane %v1284_v15, %v4429_v43  ;;  %v1299_v15 = vrot.slane %v1285_v20, %v4429_v43 }
 0x1c9   :  { %v4869_v31 = vpop.permute.xlu1 %1549 }
 0x1ca   :  { %v4877_v9 = vpop.permute.xlu0 %2068 }
 0x1cb   :  { %1412 = vrot.lane.b32.xlu1 %v1250_v6, %s4195_s28  ;;  %5700 = vst [vmem:[#allocation38_spill] sm:$0xff] %v4877_v9 }
 0x1cc   :  { %1567 = vrot.lane.b32.xlu0 %v1526_v28, %s4200_s21 }
 0x1cd   :  { %v4881_v23 = vpop.permute.xlu1 %1910 }
 0x1ce   :  { %v4887_v39 = vpop.permute.xlu0 %1328 }
 0x1cf   :  { %1725 = vrot.lane.b32.xlu1 %v1679_v41, %s4201_s29  ;;  %5701 = vst [vmem:[#allocation39_spill] sm:$0xff] %v4887_v39  ;;  %v3828_v13 = vpop.f32.mrf.mxu1  ;;  %v4901_v41 = vcombine.high %v1258_v48, %v1258_v48  ;;  %v4904_v39 = vld [vmem:[%s4245_s25] ss:$0 sm:$0xff]  ;;  %s5746_s25 = sld [smem:[#allocation9_spill]] }
 0x1d0   :  { %1928 = vrot.lane.b32.xlu0 %v1892_v38, %s4198_s5  ;;  %v4921_v22 = vadd.f32 %v3828_v13, %v4904_v39  ;;  %v1533_v13 = vrot.slane %v1258_v48, %v4429_v43 }
 0x1d1   :  { %v4890_v32 = vpop.permute.xlu1 %1400  ;;  %v399_v28 = vpop.f32.mrf.mxu1 }
 0x1d2   :  { %v4899_v46 = vpop.permute.xlu0 %1365  ;;  %v4918_v9 = vadd.f32 %v4904_v39, %v399_v28  ;;  %5705 = vst [vmem:[#allocation43_spill] sm:$0xff] %v4921_v22 }
 0x1d3   :  { %1773 = vrot.lane.b32.xlu1 %v4893_v33, %s4196_s1  ;;  %5702 = vst [vmem:[#allocation40_spill] sm:$0xff] %v4899_v46  ;;  %v3829_v59 = vpop.f32.mrf.mxu1  ;;  %v1265_v46 = vrot.slane %v1251_v60, %v4429_v43 }
 0x1d4   :  { %v4909_v38 = vadd.f32 %v3829_v59, %v4904_v39  ;;  %1414 = vrot.lane.b32.xlu0 %v4901_v41, %s4195_s28  ;;  %5704 = vst [vmem:[#allocation42_spill] sm:$0xff] %v4918_v9  ;;  %v1686_v59 = vrot.slane %v1250_v6, %v4429_v43  ;;  %s4137_s28 = scalar_lea.vmem %s3562_s13, 256 }
 0x1d5   :  { %v4911_v10 = vpop.permute.xlu1 %1709  ;;  %v402_v21 = vpop.f32.mrf.mxu1  ;;  %v1267_v6 = vcombine.high %v1265_v46, %v1265_v46  ;;  %v1540_v48 = vrot.slane %v1265_v46, %v4429_v43  ;;  %p4138_p0 = scmp.ne.s32.totalorder %s3562_s13, %s4137_s28  ;;  %p4143_p2 = scmp.lt.s32.totalorder %s4137_s28, %s4137_s28 }
 0x1d6   :  { %5703 = vst [vmem:[#allocation41_spill] sm:$0xff] %v4909_v38  ;;  %v4924_v49 = vpop.permute.xlu0 %1551  ;;  %v4928_v51 = vadd.f32 %v4904_v39, %v402_v21  ;;  %v465_v60 = vmax.f32 %v4909_v38, 0.0  ;;  %v464_v21 = vmax.f32 %v4921_v22, 0.0 }
 0x1d7   :  { %2086 = vrot.lane.b32.xlu1 %v2045_v52, %s4199_s17  ;;  %v3832_v17 = vpop.f32.mrf.mxu1  ;;  %v462_v52 = vmax.f32 %v4918_v9, 0.0  ;;  %p4144_p3 = por %p4143_p2, %p4142_p1 }
 0x1d8   :  { %5706 = vst [vmem:[#allocation44_spill] sm:$0xff] %v4928_v51  ;;  %1727 = vrot.lane.b32.xlu0 %v1686_v59, %s4201_s29  ;;  %v463_v56 = vmax.f32 %v4928_v51, 0.0  ;;  %v4940_v1 = vadd.f32 %v3832_v17, %v4904_v39  ;;  %v578_v51 = vpack.c.bf16 %v465_v60, %v464_v21  ;;  %v1899_v17 = vrot.slane %v1299_v15, %v4429_v43 }
 0x1d9   :  { %v4932_v28 = vpop.permute.xlu1 %1761  ;;  %v415_v47 = vpop.f32.mrf.mxu1  ;;  %p4145_p4 = pnand %p4144_p3, %p4138_p0 }
 0x1da   :  { %5707 = vst [vmem:[#allocation45_spill] sm:$0xff] %v4932_v28  ;;  %5708 = vst [vmem:[#allocation46_spill] sm:$0xff] %v4940_v1  ;;  %v4943_v20 = vadd.f32 %v4904_v39, %v415_v47  ;;  %v4946_v59 = vpop.permute.xlu0 %1912  ;;  %v577_v9 = vpack.c.bf16 %v463_v56, %v462_v52  ;;  %v2377_v47 = vsel %vm361_vm3, %v4867_v62, 0  ;;  %v1700_v56 = vrot.slane %v1267_v6, %v4429_v43 }
 0x1db   :  { %1569 = vrot.lane.b32.xlu1 %v1533_v13, %s4200_s21  ;;  %5710 = vst [vmem:[#allocation48_spill] sm:$0xff] %v4946_v59  ;;  %v3833_v38 = vpop.f32.mrf.mxu1  ;;  %v4056_v13 = vld [vmem:[%s4265_s14 + $0x18] sm:$0xff]   ;;  %v468_v60 = vmax.f32 %v4940_v1, 0.0  ;;  %v1693_v1 = vrot.slane %v4901_v41, %v4429_v43 }
 0x1dc   :  { %5709 = vst [vmem:[#allocation47_spill] sm:$0xff] %v4943_v20  ;;  %v4950_v28 = vadd.f32 %v3833_v38, %v4904_v39  ;;  %1571 = vrot.lane.b32.xlu0 %v1540_v48, %s4200_s21  ;;  %3844 = vmatprep.mubr.msk.bf16.mxu1 %vm591_vm5, %v577_v9  ;;  %v466_v38 = vmax.f32 %v4943_v20, 0.0  ;;  %v1301_v20 = vcombine.high %v1299_v15, %v1299_v15 }
 0x1dd   :  { %v4952_v22 = vpop.permute.xlu1 %2070  ;;  %v418_v46 = vpop.f32.mrf.mxu1  ;;  %3845 = vmatmul.mubr.msk.bf16.vlgmr.msra.gmra.mxu1 %vm591_vm5, %v578_v51  ;;  %v2052_v51 = vrot.slane %v4893_v33, %v4429_v43 }
 0x1de   :  { %5711 = vst [vmem:[#allocation49_spill] sm:$0xff] %v4950_v28  ;;  %v469_v52 = vmax.f32 %v4950_v28, 0.0  ;;  %v4965_v21 = vadd.f32 %v4904_v39, %v418_v46  ;;  %v4969_v62 = vpop.permute.xlu0 %1402  ;;  %3879 = vmatpush3.bf16.msra.mxu1 %v2377_v47  ;;  %v2059_v33 = vrot.slane %v1301_v20, %v4429_v43 }
 0x1df   :  { %1930 = vrot.lane.b32.xlu1 %v1899_v17, %s4198_s5  ;;  %v3836_v9 = vpop.f32.mrf.mxu1  ;;  %3880 = vmatprep.subr.bf16.mxu1 %v4056_v13  ;;  %v4057_v17 = vld [vmem:[%s4265_s14 + $0x10] sm:$0xff]  }
 0x1e0   :  { %5712 = vst [vmem:[#allocation50_spill] sm:$0xff] %v4965_v21  ;;  %v467_v6 = vmax.f32 %v4965_v21, 0.0  ;;  %1731 = vrot.lane.b32.xlu0 %v1700_v56, %s4201_s29  ;;  %v580_v28 = vpack.c.bf16 %v469_v52, %v468_v60  ;;  %v4981_v47 = vadd.f32 %v3836_v9, %v4904_v39  ;;  %v4058_v60 = vld [vmem:[%s4265_s14 + $0x8] sm:$0xff]  }
 0x1e1   :  { %v4972_v48 = vpop.permute.xlu1 %1330  ;;  %v431_v46 = vpop.f32.mrf.mxu1 }
 0x1e2   :  { %5713 = vst [vmem:[#allocation51_spill] sm:$0xff] %v4972_v48  ;;  %v579_v59 = vpack.c.bf16 %v467_v6, %v466_v38  ;;  %5714 = vst [vmem:[#allocation52_spill] sm:$0xff] %v4981_v47  ;;  %v4984_v21 = vadd.f32 %v4904_v39, %v431_v46  ;;  %v4987_v56 = vpop.permute.xlu0 %1711  ;;  %3881 = vmatpush3.bf16.msra.mxu1 %v4056_v13 }
 0x1e3   :  { %1729 = vrot.lane.b32.xlu1 %v1693_v1, %s4201_s29  ;;  %v3837_v41 = vpop.f32.mrf.mxu1  ;;  %3882 = vmatprep.subr.bf16.mxu1 %v4057_v17  ;;  %v472_v1 = vmax.f32 %v4981_v47, 0.0 }
 0x1e4   :  { %5715 = vst [vmem:[#allocation53_spill] sm:$0xff] %v4984_v21  ;;  %2088 = vrot.lane.b32.xlu0 %v2052_v51, %s4199_s17  ;;  %3848 = vmatprep.mubr.msk.bf16.mxu1 %vm591_vm5, %v579_v59  ;;  %v4996_v38 = vadd.f32 %v3837_v41, %v4904_v39  ;;  %v470_v9 = vmax.f32 %v4984_v21, 0.0  ;;  %v4059_v41 = vld [vmem:[%s4265_s14] sm:$0xff]   ;;  %s5748_s14 = sld [smem:[#allocation11_spill]] }
 0x1e5   :  { %v4989_v15 = vpop.permute.xlu1 %1367  ;;  %v434_v52 = vpop.f32.mrf.mxu1  ;;  %3849 = vmatmul.mubr.msk.bf16.gmra.mxu1 %vm591_vm5, %v580_v28 }
 0x1e6   :  { %5716 = vst [vmem:[#allocation54_spill] sm:$0xff] %v4989_v15  ;;  %5717 = vst [vmem:[#allocation55_spill] sm:$0xff] %v4996_v38  ;;  %v5001_v13 = vadd.f32 %v4904_v39, %v434_v52  ;;  %v5005_v59 = vpop.permute.xlu0 %2072  ;;  %v473_v20 = vmax.f32 %v4996_v38, 0.0  ;;  %3883 = vmatpush3.bf16.msra.mxu1 %v4057_v17  ;;  %v2108_v52 = vsel %vm336_vm4, 0.0, %v4660_v50 }
 0x1e7   :  { %2090 = vrot.lane.b32.xlu1 %v2059_v33, %s4199_s17  ;;  %v3840_v6 = vpop.f32.mrf.mxu1  ;;  %3884 = vmatprep.subr.bf16.mxu1 %v4058_v60 }
 0x1e8   :  { %5718 = vst [vmem:[#allocation56_spill] sm:$0xff] %v5001_v13  ;;  %v471_v46 = vmax.f32 %v5001_v13, 0.0  ;;  %v582_v21 = vpack.c.bf16 %v473_v20, %v472_v1  ;;  %v5015_v33 = vadd.f32 %v3840_v6, %v4904_v39  ;;  %v2121_v13 = vsel %vm591_vm5, %v2108_v52, %v4665_v54 }
 0x1e9   :  { %v5009_v51 = vpop.permute.xlu1 %1553  ;;  %v447_v47 = vpop.f32.mrf.mxu1  ;;  %v2135_v54 = vsel %vm2134_vm6, %v2121_v13, %v4672_v55 }
 0x1ea   :  { %v581_v28 = vpack.c.bf16 %v471_v46, %v470_v9  ;;  %5719 = vst [vmem:[#allocation57_spill] sm:$0xff] %v5015_v33  ;;  %v5017_v48 = vpop.permute.xlu0 %1332  ;;  %v5020_v38 = vadd.f32 %v4904_v39, %v447_v47  ;;  %3885 = vmatpush3.bf16.msra.mxu1 %v4058_v60  ;;  %v476_v9 = vmax.f32 %v5015_v33, 0.0  ;;  %v2109_v46 = vsel %vm336_vm4, 0.0, %v4684_v0 }
 0x1eb   :  { %v3841_v17 = vpop.f32.mrf.mxu1  ;;  %3886 = vmatprep.subr.bf16.mxu1 %v4059_v41  ;;  %v2136_v0 = vsel %vm2134_vm6, %v2121_v13, %v4718_v19 }
 0x1ec   :  { %5720 = vst [vmem:[#allocation58_spill] sm:$0xff] %v5020_v38  ;;  %v5025_v15 = vadd.f32 %v3841_v17, %v4904_v39  ;;  %3852 = vmatprep.mubr.msk.bf16.mxu1 %vm591_vm5, %v581_v28  ;;  %v474_v20 = vmax.f32 %v5020_v38, 0.0  ;;  %v2122_v28 = vsel %vm591_vm5, %v2109_v46, %v4695_v63  ;;  %v2138_v17 = vsel %vm2134_vm6, %v2121_v13, %v4792_v16 }
 0x1ed   :  { %v5027_v50 = vpop.permute.xlu1 %1914  ;;  %v450_v1 = vpop.f32.mrf.mxu1  ;;  %3853 = vmatmul.mubr.msk.bf16.gmra.mxu1 %vm591_vm5, %v582_v21  ;;  %v2110_v21 = vsel %vm336_vm4, %v4443_v57, %v4690_v3  ;;  %v2137_v57 = vsel %vm2134_vm6, %v2121_v13, %v4753_v37  ;;  %v2152_v13 = vsel %vm2151_vm7, %v2135_v54, %v4728_v24 }
 0x1ee   :  { %v477_v47 = vmax.f32 %v5025_v15, 0.0  ;;  %v5033_v60 = vpop.permute.xlu0 %1369  ;;  %v5039_v6 = vadd.f32 %v4904_v39, %v450_v1  ;;  %3887 = vmatpush3.bf16.msra.mxu1 %v4059_v41  ;;  %v2123_v41 = vsel %vm591_vm5, %v2110_v21, %v4706_v14  ;;  %v2155_v1 = vsel %vm2151_vm7, %v2138_v17, %v4828_v27  ;;  %v5724_v17 = vld [vmem:[#allocation34_spill] sm:$0xff] }
 0x1ef   :  { %v2140_v3 = vsel %vm2134_vm6, %v2123_v41, %v4845_v42  ;;  %v2172_v63 = vsel %vm2168_vm8, %v2155_v1, %v4855_v12  ;;  %v2153_v14 = vsel %vm2151_vm7, %v2136_v0, %v4764_v44  ;;  %v2154_v19 = vsel %vm2151_vm7, %v2137_v57, %v4801_v29 }
 0x1f0   :  { %v475_v39 = vmax.f32 %v5039_v6, 0.0  ;;  %v584_v33 = vpack.c.bf16 %v477_v47, %v476_v9  ;;  %v2139_v27 = vsel %vm2134_vm6, %v2122_v28, %v4672_v55  ;;  %v2157_v9 = vsel %vm2151_vm7, %v2140_v3, %v4924_v49  ;;  %v5723_v28 = vld [vmem:[#allocation25_spill] sm:$0xff] }
 0x1f1   :  { %v1714_v52 = vpop.permute.xlu1 %1713  ;;  %v2111_v42 = vsel %vm336_vm4, %v4480_v11, %v4699_v8  ;;  %v2170_v12 = vsel %vm2168_vm8, %v2153_v14, %v4789_v7  ;;  %v2171_v44 = vsel %vm2168_vm8, %v2154_v19, %v4821_v58  ;;  %v2174_v29 = vsel %vm2168_vm8, %v2157_v9, %v4987_v56  ;;  %v5728_v19 = vld [vmem:[#allocation27_spill] sm:$0xff]  ;;  %v5729_v9 = vld [vmem:[#allocation38_spill] sm:$0xff] }
 0x1f2   :  { %v1556_v38 = vpop.permute.xlu0 %1555  ;;  %v583_v16 = vpack.c.bf16 %v475_v39, %v474_v20  ;;  %v2124_v49 = vsel %vm591_vm5, %v2111_v42, %v4744_v35  ;;  %v2189_v11 = vsel %vm2185_vm9, %v2172_v63, %v4771_v40  ;;  %v2156_v8 = vsel %vm2151_vm7, %v2139_v27, %v4869_v31 }
 0x1f3   :  { %v2169_v58 = vsel %vm2168_vm8, %v2152_v13, %v4758_v26  ;;  %v2141_v24 = vsel %vm2134_vm6, %v2124_v49, %v4890_v32  ;;  %v2173_v35 = vsel %vm2168_vm8, %v2156_v8, %v4911_v10  ;;  %v2187_v40 = vsel %vm2185_vm9, %v2170_v12, %v4703_v4  ;;  %v5730_v12 = vld [vmem:[#allocation45_spill] sm:$0xff] }
 0x1f4   :  { %3856 = vmatprep.mubr.msk.bf16.mxu1 %vm591_vm5, %v583_v16  ;;  %v2188_v31 = vsel %vm2185_vm9, %v2171_v44, %v4738_v5  ;;  %v2191_v56 = vsel %vm2185_vm9, %v2174_v29, %v4831_v18  ;;  %v2206_v26 = vsel %vm2202_vm10, %v2189_v11, %v4811_v34  ;;  %v2186_v10 = vsel %vm2185_vm9, %v2169_v58, %v4679_v61  ;;  %v5727_v16 = vld [vmem:[#allocation48_spill] sm:$0xff] }
 0x1f5   :  { %v2075_v37 = vpop.permute.xlu1 %2074  ;;  %3857 = vmatmul.mubr.msk.bf16.gmra.mxu1 %vm591_vm5, %v584_v33  ;;  %v2158_v33 = vsel %vm2151_vm7, %v2141_v24, %v5009_v51  ;;  %v2190_v4 = vsel %vm2185_vm9, %v2173_v35, %v4679_v61  ;;  %v2112_v18 = vsel %vm336_vm4, %v4532_v45, %v4733_v30  ;;  %v2204_v51 = vsel %vm2202_vm10, %v2187_v40, %v4748_v36  ;;  %v5722_v45 = vld [vmem:[#allocation37_spill] sm:$0xff] }
 0x1f6   :  { %v5090_v7 = vpop.permute.xlu0 %1763  ;;  %v2175_v32 = vsel %vm2168_vm8, %v2158_v33, %v1714_v52  ;;  %v2205_v34 = vsel %vm2202_vm10, %v2188_v31, %v4780_v25  ;;  %v2208_v54 = vsel %vm2202_vm10, %v2191_v56, %v4881_v23  ;;  %v2125_v20 = vsel %vm591_vm5, %v2112_v18, %v4784_v2  ;;  %v5721_v52 = vld [vmem:[#allocation24_spill] sm:$0xff]  ;;  %v5732_v18 = vld [vmem:[#allocation30_spill] sm:$0xff] }
 0x1f7   :  { %v2223_v46 = vsel %vm2219_vm11, %v2206_v26, %v4839_v53  ;;  %v2118_v21 = vsel %vm336_vm4, %v5721_v52, %v5017_v48  ;;  %v2192_v30 = vsel %vm2185_vm9, %v2175_v32, %v5722_v45  ;;  %v2203_v25 = vsel %vm2202_vm10, %v2186_v10, %v5723_v28  ;;  %v5725_v53 = vld [vmem:[#allocation29_spill] sm:$0xff]  ;;  %v5726_v48 = vld [vmem:[#allocation31_spill] sm:$0xff]  ;;  %v5731_v10 = vld [vmem:[#allocation26_spill] sm:$0xff] }
 0x1f8   :  { %v2207_v23 = vsel %vm2202_vm10, %v2190_v4, %v5724_v17  ;;  %v2142_v2 = vsel %vm2134_vm6, %v2125_v20, %v4969_v62  ;;  %v2221_v41 = vsel %vm2219_vm11, %v2204_v51, %v5725_v53  ;;  %v2222_v0 = vsel %vm2219_vm11, %v2205_v34, %v5726_v48  ;;  %v5734_v45 = vld [vmem:[#allocation32_spill] sm:$0xff] }
 0x1f9   :  { %v1335_v47 = vpop.permute.xlu1 %1334  ;;  %v2225_v1 = vsel %vm2219_vm11, %v2208_v54, %v4952_v22  ;;  %v2159_v57 = vsel %vm2151_vm7, %v2142_v2, %v1556_v38  ;;  %v2262_v63 = vcombine.low %v2222_v0, %v2223_v46  ;;  %v2209_v14 = vsel %vm2202_vm10, %v2192_v30, %v5727_v16  ;;  %v5733_v54 = vld [vmem:[#allocation33_spill] sm:$0xff] }
 0x1fa   :  { %v1917_v5 = vpop.permute.xlu0 %1916  ;;  %v2220_v27 = vsel %vm2219_vm11, %v2203_v25, %v5728_v19  ;;  %v2224_v42 = vsel %vm2219_vm11, %v2207_v23, %v5729_v9  ;;  %v2226_v49 = vsel %vm2219_vm11, %v2209_v14, %v5005_v59  ;;  %v2113_v51 = vsel %vm336_vm4, 0.0, %v5732_v18  ;;  %v5735_v30 = vld [vmem:[#allocation21_spill] sm:$0xff]  ;;  %v5736_v25 = vld [vmem:[#allocation36_spill] sm:$0xff] }
 0x1fb   :  { %v2261_v22 = vcombine.low %v2220_v27, %v2221_v41  ;;  %v2278_v13 = vcombine.low %v2224_v42, %v2225_v1  ;;  %v2276_v24 = vrot.slane %v2262_v63, %v4429_v43  ;;  %v2126_v20 = vsel %vm591_vm5, %v2113_v51, %v5733_v54 }
 0x1fd   :  { %v1372_v36 = vpop.permute.xlu1 %1371  ;;  %v2269_v40 = vrot.slane %v2261_v22, %v4429_v43  ;;  %v2286_v31 = vrot.slane %v2278_v13, %v4429_v43  ;;  %v5737_v22 = vld [vmem:[#allocation35_spill] sm:$0xff]  ;;  %v5738_v13 = vld [vmem:[#allocation22_spill] sm:$0xff] }
 0x1fe   :  { %v5138_v39 = vsel %vm591_vm5, %v2118_v21, %v1372_v36  ;;  %v1716_v3 = vpop.permute.xlu0 %1715  ;;  %v2143_v21 = vsel %vm2134_vm6, %v2126_v20, %v4672_v55 }
 0x1ff   :  { %v2176_v62 = vsel %vm2168_vm8, %v2159_v57, %v1716_v3  ;;  %v2277_v26 = vcombine.low %v2269_v40, %v2276_v24 }
 0x200   :  { %v2193_v44 = vsel %vm2185_vm9, %v2176_v62, %v5730_v12 }
 0x201   :  { %v1405_v29 = vpop.permute.xlu1 %1404  ;;  %v2210_v38 = vsel %vm2202_vm10, %v2193_v44, %v5027_v50 }
 0x202   :  { %v2227_v11 = vsel %vm2219_vm11, %v2210_v38, %v2075_v37  ;;  %v2077_v8 = vpop.permute.xlu0 %2076  ;;  %v2119_v37 = vsel %vm336_vm4, %v5731_v10, %v1335_v47  ;;  %v2114_v47 = vsel %vm336_vm4, %v5735_v30, %v5734_v45  ;;  %v2115_v38 = vsel %vm336_vm4, %v5738_v13, %v5737_v22 }
 0x203   :  { %v2279_v58 = vcombine.low %v2226_v49, %v2227_v11  ;;  %v2127_v17 = vsel %vm591_vm5, %v2114_v47, %v5736_v25  ;;  %v5739_v49 = vld [vmem:[#allocation40_spill] sm:$0xff] }
 0x204   :  { %v2144_v2 = vsel %vm2134_vm6, %v2127_v17, %v1405_v29  ;;  %v2128_v11 = vsel %vm591_vm5, %v2115_v38, %v5739_v49 }
 0x205   :  { %v1558_v35 = vpop.permute.xlu1 %1557  ;;  %v2293_v56 = vrot.slane %v2279_v58, %v4429_v43 }
 0x206   :  { %v5165_v33 = vpop.permute.xlu0 %1336  ;;  %v2160_v36 = vsel %vm2151_vm7, %v2143_v21, %v1558_v35 }
 0x207   :  { %v2294_v50 = vcombine.low %v2286_v31, %v2293_v56 }
 0x209   :  { %v1766_v32 = vpop.permute.xlu1 %1765  ;;  %v2333_v59 = vpack.c.bf16 %v2294_v50, %v2277_v26  ;;  %v5740_v50 = vld [vmem:[#allocation39_spill] sm:$0xff] }
 0x20a   :  { %v1374_v4 = vpop.permute.xlu0 %1373 }
 0x20b   :  { %v5172_v34 = vsel %vm591_vm5, %v2119_v37, %v1374_v4  ;;  %3888 = vmatprep.mubr.msk.bf16.mxu1 %vm2369_vm12, %v2333_v59  ;;  %v5741_v59 = vld [vmem:[#allocation23_spill] sm:$0xff]  ;;  %v5742_v37 = vld [vmem:[#allocation54_spill] sm:$0xff] }
 0x20c   :  { %v2116_v10 = vsel %vm336_vm4, %v5741_v59, %v5740_v50 }
 0x20d   :  { %v1919_v46 = vpop.permute.xlu1 %1918  ;;  %v2129_v4 = vsel %vm591_vm5, %v2116_v10, %v5742_v37 }
 0x20e   :  { %v1407_v52 = vpop.permute.xlu0 %1406 }
 0x20f   :  { %v2145_v58 = vsel %vm2134_vm6, %v2128_v11, %v1407_v52 }
 0x211   :  { %v1718_v28 = vpop.permute.xlu1 %1717 }
 0x212   :  { %v2177_v23 = vsel %vm2168_vm8, %v2160_v36, %v1718_v28  ;;  %v1560_v41 = vpop.permute.xlu0 %1559 }
 0x213   :  { %v2194_v53 = vsel %vm2185_vm9, %v2177_v23, %v4679_v61  ;;  %v2161_v0 = vsel %vm2151_vm7, %v2144_v2, %v1560_v41 }
 0x214   :  { %v2211_v48 = vsel %vm2202_vm10, %v2194_v53, %v1917_v5 }
 0x215   :  { %v2228_v1 = vsel %vm2219_vm11, %v2211_v48, %v2077_v8  ;;  %v2079_v57 = vpop.permute.xlu1 %2078 }
 0x216   :  { %v1768_v3 = vpop.permute.xlu0 %1767 }
 0x219   :  { %v5192_v63 = vpop.permute.xlu1 %1375 }
 0x21a   :  { %v1921_v16 = vpop.permute.xlu0 %1920 }
 0x21d   :  { %v1409_v14 = vpop.permute.xlu1 %1408 }
 0x21e   :  { %v1720_v62 = vpop.permute.xlu0 %1719  ;;  %v2146_v51 = vsel %vm2134_vm6, %v2129_v4, %v1409_v14 }
 0x21f   :  { %v2178_v19 = vsel %vm2168_vm8, %v2161_v0, %v1720_v62  ;;  %v5743_v0 = vld [vmem:[#allocation51_spill] sm:$0xff] }
 0x220   :  { %v2195_v27 = vsel %vm2185_vm9, %v2178_v19, %v5090_v7 }
 0x221   :  { %v1562_v9 = vpop.permute.xlu1 %1561  ;;  %v2212_v42 = vsel %vm2202_vm10, %v2195_v27, %v1919_v46 }
 0x222   :  { %v2229_v5 = vsel %vm2219_vm11, %v2212_v42, %v2079_v57  ;;  %v2081_v12 = vpop.permute.xlu0 %2080  ;;  %v2162_v7 = vsel %vm2151_vm7, %v2145_v58, %v1562_v9  ;;  %v5744_v58 = vld [vmem:[#allocation28_spill] sm:$0xff] }
 0x223   :  { %v2295_v44 = vcombine.low %v2228_v1, %v2229_v5  ;;  %v2117_v1 = vsel %vm336_vm4, 0.0, %v5743_v0 }
 0x224   :  { %v2130_v57 = vsel %vm591_vm5, %v2117_v1, %v5033_v60 }
 0x225   :  { %v1923_v29 = vpop.permute.xlu1 %1922  ;;  %v2303_v17 = vrot.slane %v2295_v44, %v4429_v43  ;;  %v2147_v62 = vsel %vm2134_vm6, %v2130_v57, %v4672_v55 }
 0x226   :  { %v1564_v8 = vpop.permute.xlu0 %1563 }
 0x227   :  { %v2163_v54 = vsel %vm2151_vm7, %v2146_v51, %v1564_v8 }
 0x229   :  { %v1722_v24 = vpop.permute.xlu1 %1721 }
 0x22a   :  { %v2179_v35 = vsel %vm2168_vm8, %v2162_v7, %v1722_v24  ;;  %v1925_v31 = vpop.permute.xlu0 %1924 }
 0x22b   :  { %v2196_v40 = vsel %vm2185_vm9, %v2179_v35, %v1766_v32 }
 0x22c   :  { %v2213_v46 = vsel %vm2202_vm10, %v2196_v40, %v1921_v16  ;;  %v4060_v16 = vld [vmem:[%s4275_s24] sm:$0xff]   ;;  %s4204_s24 = smov 96  }
 0x22d   :  { %v1770_v56 = vpop.permute.xlu1 %1769  ;;  %v2230_v30 = vsel %vm2219_vm11, %v2213_v46, %v2081_v12  ;;  %3892 = vmatprep.subr.bf16.mxu0 %v4060_v16 }
 0x22e   :  { %v1411_v26 = vpop.permute.xlu0 %1410  ;;  %3893 = vmatpush3.bf16.msra.mxu0 %v4060_v16 }
 0x22f   :  { %v2148_v60 = vsel %vm2134_vm6, %v5138_v39, %v1411_v26  ;;  %v2120_v39 = vsel %vm336_vm4, %v5744_v58, %v5165_v33  ;;  %v5306_v58 = vpop.f32.mrf.mxu0 }
 0x230   :  { %v2133_v24 = vsel %vm591_vm5, %v2120_v39, %v5192_v63 }
 0x231   :  { %v2083_v18 = vpop.permute.xlu1 %2082  ;;  %v5308_v39 = vpop.f32.mrf.mxu0 }
 0x232   :  { %v1724_v20 = vpop.permute.xlu0 %1723 }
 0x233   :  { %v2180_v32 = vsel %vm2168_vm8, %v2163_v54, %v1724_v20 }
 0x234   :  { %v2197_v52 = vsel %vm2185_vm9, %v2180_v32, %v1768_v3 }
 0x235   :  { %v1566_v21 = vpop.permute.xlu1 %1565  ;;  %v2214_v45 = vsel %vm2202_vm10, %v2197_v52, %v1923_v29 }
 0x236   :  { %v2231_v47 = vsel %vm2219_vm11, %v2214_v45, %v2083_v18  ;;  %v1772_v36 = vpop.permute.xlu0 %1771  ;;  %v2164_v19 = vsel %vm2151_vm7, %v2147_v62, %v1566_v21 }
 0x237   :  { %v2296_v28 = vcombine.low %v2230_v30, %v2231_v47  ;;  %v4061_v30 = vld [vmem:[%s4285_s6] sm:$0xff]   ;;  %s5765_s6 = sld [smem:[#allocation6_spill]] }
 0x238   :  { %3906 = vmatprep.subr.bf16.mxu0 %v4061_v30 }
 0x239   :  { %v1927_v25 = vpop.permute.xlu1 %1926  ;;  %v2310_v23 = vrot.slane %v2296_v28, %v4429_v43 }
 0x23a   :  { %v2085_v2 = vpop.permute.xlu0 %2084 }
 0x23b   :  { %v2311_v53 = vcombine.low %v2303_v17, %v2310_v23 }
 0x23d   :  { %v1413_v41 = vpop.permute.xlu1 %1412 }
 0x23e   :  { %v1568_v48 = vpop.permute.xlu0 %1567  ;;  %v2149_v26 = vsel %vm2134_vm6, %v5172_v34, %v1413_v41 }
 0x23f   :  { %v2165_v44 = vsel %vm2151_vm7, %v2148_v60, %v1568_v48 }
 0x241   :  { %v1726_v3 = vpop.permute.xlu1 %1725 }
 0x242   :  { %v1929_v14 = vpop.permute.xlu0 %1928  ;;  %v2181_v9 = vsel %vm2168_vm8, %v2164_v19, %v1726_v3 }
 0x243   :  { %v2198_v5 = vsel %vm2185_vm9, %v2181_v9, %v4679_v61 }
 0x244   :  { %v2215_v55 = vsel %vm2202_vm10, %v2198_v5, %v1925_v31 }
 0x245   :  { %v1774_v27 = vpop.permute.xlu1 %1773  ;;  %v2232_v11 = vsel %vm2219_vm11, %v2215_v55, %v2085_v2 }
 0x246   :  { %v1415_v42 = vpop.permute.xlu0 %1414 }
 0x247   :  { %v2150_v40 = vsel %vm2134_vm6, %v2133_v24, %v1415_v42 }
 0x249   :  { %v2087_v12 = vpop.permute.xlu1 %2086 }
 0x24a   :  { %v1728_v29 = vpop.permute.xlu0 %1727 }
 0x24b   :  { %v2182_v22 = vsel %vm2168_vm8, %v2165_v44, %v1728_v29 }
 0x24c   :  { %v2199_v13 = vsel %vm2185_vm9, %v2182_v22, %v1770_v56 }
 0x24d   :  { %v1570_v38 = vpop.permute.xlu1 %1569  ;;  %v2216_v49 = vsel %vm2202_vm10, %v2199_v13, %v1927_v25 }
 0x24e   :  { %v2233_v61 = vsel %vm2219_vm11, %v2216_v49, %v2087_v12  ;;  %v1572_v8 = vpop.permute.xlu0 %1571  ;;  %v2166_v59 = vsel %vm2151_vm7, %v2149_v26, %v1570_v38 }
 0x24f   :  { %v2312_v7 = vcombine.low %v2232_v11, %v2233_v61  ;;  %v2167_v31 = vsel %vm2151_vm7, %v2150_v40, %v1572_v8  ;;  %v5745_v11 = vmov 0.0   ;;  %v4062_v61 = vld [vmem:[%s4290_s12 + $0x8] sm:$0xff]   ;;  %v4063_v8 = vld [vmem:[%s4290_s12] sm:$0xff]   ;;  %s4206_s12 = smov 11  }
 0x250   :  { %3898 = vmatprep.subr.bf16.mxu1 %v4062_v61 }
 0x251   :  { %v1931_v35 = vpop.permute.xlu1 %1930  ;;  %v2320_v32 = vrot.slane %v2312_v7, %v4429_v43  ;;  %v5310_v7 = vpop.f32.mrf.mxu0 }
 0x252   :  { %v1732_v56 = vpop.permute.xlu0 %1731 }
 0x253   :  { %v2184_v50 = vsel %vm2168_vm8, %v2167_v31, %v1732_v56  ;;  %v5312_v24 = vpop.f32.mrf.mxu0 }
 0x254   :  { %v2201_v33 = vsel %vm2185_vm9, %v2184_v50, %v1774_v27  ;;  %v3666_v27 = vld [vmem:[%s4270_s19] ss:$0 sm:$0xff]  ;;  %s5757_s19 = sld [smem:[#allocation8_spill]] }
 0x255   :  { %v1730_v10 = vpop.permute.xlu1 %1729  ;;  %v2218_v34 = vsel %vm2202_vm10, %v2201_v33, %v1931_v35  ;;  %v5314_v35 = vpop.f32.mrf.mxu0 }
 0x256   :  { %v2183_v37 = vsel %vm2168_vm8, %v2166_v59, %v1730_v10  ;;  %v2089_v4 = vpop.permute.xlu0 %2088 }
 0x257   :  { %v2200_v63 = vsel %vm2185_vm9, %v2183_v37, %v1772_v36  ;;  %v5316_v40 = vpop.f32.mrf.mxu0 }
 0x258   :  { %v2217_v18 = vsel %vm2202_vm10, %v2200_v63, %v1929_v14 }
 0x259   :  { %v2234_v51 = vsel %vm2219_vm11, %v2217_v18, %v2089_v4  ;;  %v2091_v54 = vpop.permute.xlu1 %2090  ;;  %v5318_v31 = vpop.f32.mrf.mxu0 }
 0x25a   :  { %v2235_v20 = vsel %vm2219_vm11, %v2218_v34, %v2091_v54  ;;  %v3674_v54 = vld [vmem:[%s4280_s30] ss:$0 sm:$0xff]  ;;  %s4205_s30 = smov 112  }
 0x25b   :  { %v2313_v46 = vcombine.low %v2234_v51, %v2235_v20  ;;  %v5320_v56 = vpop.f32.mrf.mxu0 }
 0x25d   :  { %v2327_v52 = vrot.slane %v2313_v46, %v4429_v43  ;;  %v5322_v26 = vpop.f32.mrf.mxu0 }
 0x25f   :  { %v2328_v21 = vcombine.low %v2320_v32, %v2327_v52  ;;  %v5324_v50 = vpop.f32.mrf.mxu0 }
 0x261   :  { %v2334_v45 = vpack.c.bf16 %v2328_v21, %v2311_v53  ;;  %v5326_v59 = vpop.f32.mrf.mxu0 }
 0x263   :  { %3889 = vmatmul.mubr.msk.bf16.vlgmr.msra.gmra.mxu1 %vm2369_vm12, %v2334_v45  ;;  %v5328_v10 = vpop.f32.mrf.mxu0 }
 0x264   :  { %3899 = vmatpush3.bf16.msra.mxu1 %v4062_v61 }
 0x265   :  { %3900 = vmatprep.subr.bf16.mxu1 %v4063_v8  ;;  %v5330_v33 = vpop.f32.mrf.mxu0 }
 0x267   :  { %v5332_v37 = vpop.f32.mrf.mxu0 }
 0x268   :  { %3901 = vmatpush3.bf16.msra.mxu1 %v4063_v8 }
 0x269   :  { %3912 = vmatprep.subr.bf16.mxu1 %v5745_v11  ;;  %v5334_v63 = vpop.f32.mrf.mxu0 }
 0x26b   :  { %v5336_v4 = vpop.f32.mrf.mxu0 }
 0x29d   :  { %v5265_v47 = vpop.f32.mrf.mxu1 }
 0x29f   :  { %v5267_v36 = vpop.f32.mrf.mxu1 }
 0x2a1   :  { %v5269_v28 = vpop.f32.mrf.mxu1 }
 0x2a3   :  { %v5271_v25 = vpop.f32.mrf.mxu1 }
 0x2a5   :  { %v5273_v17 = vpop.f32.mrf.mxu1 }
 0x2a7   :  { %v5275_v23 = vpop.f32.mrf.mxu1 }
 0x2a9   :  { %v5277_v2 = vpop.f32.mrf.mxu1 }
 0x2ab   :  { %v5279_v53 = vpop.f32.mrf.mxu1 }
 0x2ad   :  { %v5281_v41 = vpop.f32.mrf.mxu1 }
 0x2af   :  { %v5283_v48 = vpop.f32.mrf.mxu1 }
 0x2b1   :  { %v5285_v0 = vpop.f32.mrf.mxu1 }
 0x2b3   :  { %v5287_v1 = vpop.f32.mrf.mxu1 }
 0x2b5   :  { %v5289_v57 = vpop.f32.mrf.mxu1 }
 0x2b7   :  { %v5291_v3 = vpop.f32.mrf.mxu1 }
 0x2b9   :  { %v5293_v16 = vpop.f32.mrf.mxu1 }
 0x2bb   :  { %v5295_v14 = vpop.f32.mrf.mxu1 }
 0x323   :  { %v3890_v62 = vpop.f32.mrf.mxu1 }
 0x324   :  { %v2422_v12 = vadd.f32 %v3890_v62, %v3666_v27 }
 0x325   :  { %v2413_v19 = vpop.f32.mrf.mxu1 }
 0x326   :  { %v2414_v42 = vadd.f32 %v3666_v27, %v2413_v19  ;;  %v2430_v13 = vmax.f32 %v2422_v12, 0.0 }
 0x327   :  { %v3891_v9 = vpop.f32.mrf.mxu1 }
 0x328   :  { %v2425_v5 = vadd.f32 %v3891_v9, %v3666_v27  ;;  %v2428_v55 = vmax.f32 %v2414_v42, 0.0  ;;  %v4064_v42 = vld [vmem:[%s4300_s27] sm:$0xff]   ;;  %s5766_s27 = sld [smem:[#allocation19_spill]] }
 0x329   :  { %v2416_v60 = vpop.f32.mrf.mxu1 }
 0x32a   :  { %v2417_v44 = vadd.f32 %v3666_v27, %v2416_v60  ;;  %v2431_v29 = vmax.f32 %v2425_v5, 0.0  ;;  %v3699_v5 = vld [vmem:[%s5746_s25 + $0x8] sm:$0xff] }
 0x32b   :  { %3109 = vrot.lane.b32.xlu0 %v3699_v5, %s4200_s21 }
 0x32c   :  { %v2429_v22 = vmax.f32 %v2417_v44, 0.0  ;;  %v2435_v49 = vpack.c.bf16 %v2431_v29, %v2430_v13  ;;  %v3685_v29 = vld [vmem:[%s5747_s3] ss:$0 sm:$0xff] }
 0x32e   :  { %v2434_v38 = vpack.c.bf16 %v2429_v22, %v2428_v55 }
 0x330   :  { %3894 = vmatprep.mubr.msk.bf16.mxu0 %vm591_vm5, %v2434_v38 }
 0x331   :  { %3895 = vmatmul.mubr.msk.bf16.vlgmr.msra.gmra.mxu0 %vm591_vm5, %v2435_v49 }
 0x332   :  { %3908 = vmatprep.mubr.msk.bf16.mxu0 %vm591_vm5, %v2434_v38  ;;  %3907 = vmatpush3.bf16.msra.mxu0 %v4061_v30 }
 0x333   :  { %3918 = vmatprep.subr.bf16.mxu0 %v5745_v11 }
 0x339   :  { %3909 = vmatmul.mubr.msk.bf16.vlgmr.msra.gmra.mxu0 %vm591_vm5, %v2435_v49 }
 0x33a   :  { %3922 = vmatprep.mubr.msk.bf16.mxu0 %vm4202_vm13, %v5745_v11 }
 0x3f1   :  { %v3896_v18 = vpop.f32.mrf.mxu0 }
 0x3f2   :  { %v2498_v32 = vadd.f32 %v3896_v18, %v3674_v54 }
 0x3f3   :  { %v2489_v51 = vpop.f32.mrf.mxu0 }
 0x3f4   :  { %v2490_v20 = vadd.f32 %v3674_v54, %v2489_v51  ;;  %v2506_v19 = vmax.f32 %v2498_v32, 0.0 }
 0x3f5   :  { %v3897_v34 = vpop.f32.mrf.mxu0 }
 0x3f6   :  { %v2501_v46 = vadd.f32 %v3897_v34, %v3674_v54  ;;  %v2504_v30 = vmax.f32 %v2490_v20, 0.0 }
 0x3f7   :  { %v2492_v52 = vpop.f32.mrf.mxu0 }
 0x3f8   :  { %v2493_v21 = vadd.f32 %v3674_v54, %v2492_v52  ;;  %v2507_v45 = vmax.f32 %v2501_v46, 0.0 }
 0x3f9   :  { %v3910_v12 = vpop.f32.mrf.mxu0 }
 0x3fa   :  { %v2505_v62 = vmax.f32 %v2493_v21, 0.0  ;;  %v2515_v9 = vpack.c.bf16 %v2507_v45, %v2506_v19 }
 0x3fb   :  { %v2623_v60 = vpop.f32.mrf.mxu0 }
 0x3fc   :  { %v2514_v27 = vpack.c.bf16 %v2505_v62, %v2504_v30 }
 0x3fd   :  { %v3911_v13 = vpop.f32.mrf.mxu0 }
 0x3fe   :  { %3902 = vmatprep.mubr.msk.bf16.mxu1 %vm2151_vm7, %v2514_v27 }
 0x3ff   :  { %3903 = vmatmul.mubr.msk.bf16.vlgmr.msra.gmra.mxu1 %vm2151_vm7, %v2515_v9  ;;  %v2626_v34 = vpop.f32.mrf.mxu0 }
 0x400   :  { %3914 = vmatprep.mubr.msk.bf16.mxu1 %vm4202_vm13, %v5745_v11  ;;  %3913 = vmatpush3.bf16.msra.mxu1 %v4064_v42 }
 0x401   :  { %3926 = vmatprep.subr.bf16.mxu1 %v5745_v11 }
 0x4bf   :  { %v3904_v44 = vpop.f32.mrf.mxu1 }
 0x4c0   :  { %v2632_v55 = vadd.f32 %v3910_v12, %v3904_v44 }
 0x4c1   :  { %v2568_v22 = vpop.f32.mrf.mxu1 }
 0x4c2   :  { %v2647_v38 = vadd.f32 %v3685_v29, %v2632_v55  ;;  %v2624_v49 = vadd.f32 %v2623_v60, %v2568_v22 }
 0x4c3   :  { %v3905_v61 = vpop.f32.mrf.mxu1 }
 0x4c4   :  { %v2651_v8 = vmax.f32 %v2647_v38, 0.0  ;;  %v2645_v18 = vadd.f32 %v3685_v29, %v2624_v49  ;;  %v2635_v51 = vadd.f32 %v3911_v13, %v3905_v61 }
 0x4c5   :  { %v2571_v54 = vpop.f32.mrf.mxu1 }
 0x4c6   :  { %2655 = vst.msk [vmem:[%s4365_s4 + $0x10] sm:$0xff] %vm591_vm5, %v2651_v8  ;;  %v2649_v20 = vmax.f32 %v2645_v18, 0.0  ;;  %v2648_v46 = vadd.f32 %v3685_v29, %v2635_v51  ;;  %v2627_v32 = vadd.f32 %v2626_v34, %v2571_v54  ;;  %v2695_v51 = vcombine.high %v2651_v8, %v2651_v8 }
 0x4c7   :  { %v2702_v54 = vrot.slane %v2651_v8, %v4429_v43 }
 0x4c8   :  { %2653 = vst.msk [vmem:[%s4365_s4] sm:$0xff] %vm591_vm5, %v2649_v20  ;;  %v2661_v52 = vcombine.high %v2649_v20, %v2649_v20  ;;  %v2668_v21 = vrot.slane %v2649_v20, %v4429_v43  ;;  %v2652_v45 = vmax.f32 %v2648_v46, 0.0  ;;  %v2646_v30 = vadd.f32 %v3685_v29, %v2627_v32 }
 0x4ca   :  { %v2675_v62 = vrot.slane %v2661_v52, %v4429_v43  ;;  %v2676_v19 = vcombine.high %v2668_v21, %v2668_v21  ;;  %2656 = vst.msk [vmem:[%s4365_s4 + $0x18] sm:$0xff] %vm591_vm5, %v2652_v45  ;;  %v2650_v27 = vmax.f32 %v2646_v30, 0.0  ;;  %v2746_v42 = vsel %vm2745_vm14, %v2668_v21, 0.0 }
 0x4cb   :  { %v2709_v21 = vrot.slane %v2695_v51, %v4429_v43  ;;  %v2710_v30 = vcombine.high %v2702_v54, %v2702_v54  ;;  %v2712_v8 = vcombine.high %v2652_v45, %v2652_v45 }
 0x4cc   :  { %v2677_v9 = vcombine.high %v2675_v62, %v2675_v62  ;;  %v2747_v5 = vsel %vm2745_vm14, %v2676_v19, 0.0  ;;  %2654 = vst.msk [vmem:[%s4365_s4 + $0x8] sm:$0xff] %vm591_vm5, %v2650_v27  ;;  %v2678_v60 = vcombine.high %v2650_v27, %v2650_v27  ;;  %v2685_v44 = vrot.slane %v2650_v27, %v4429_v43  ;;  %s5767_s4 = sld [smem:[#allocation12_spill]] }
 0x4cd   :  { %v2748_v12 = vadd.f32 %v2747_v5, %v2746_v42  ;;  %v2749_v29 = vsel %vm2745_vm14, %v2675_v62, 0.0  ;;  %v2761_v27 = vsel %vm2745_vm14, %v2702_v54, 0.0  ;;  %v2711_v42 = vcombine.high %v2709_v21, %v2709_v21 }
 0x4ce   :  { %v2692_v22 = vrot.slane %v2678_v60, %v4429_v43  ;;  %v2693_v13 = vcombine.high %v2685_v44, %v2685_v44  ;;  %v2751_v38 = vsel %vm2745_vm14, %v2677_v9, 0.0  ;;  %v2753_v61 = vsel %vm2745_vm14, %v2685_v44, 0.0 }
 0x4cf   :  { %v2750_v55 = vadd.f32 %v2749_v29, %v2748_v12  ;;  %v2763_v5 = vsel %vm2745_vm14, %v2710_v30, 0.0  ;;  %v2719_v12 = vrot.slane %v2652_v45, %v4429_v43  ;;  %v2765_v44 = vsel %vm2745_vm14, %v2709_v21, 0.0  ;;  %v4066_v21 = vld [vmem:[%s5748_s14] sm:$0xff]   ;;  %v5749_v30 = vld [vmem:[#allocation44_spill] sm:$0xff] }
 0x4d0   :  { %v2694_v34 = vcombine.high %v2692_v22, %v2692_v22  ;;  %v2755_v20 = vsel %vm2745_vm14, %v2693_v13, 0.0  ;;  %v2757_v32 = vsel %vm2745_vm14, %v2692_v22, 0.0  ;;  %v2726_v22 = vrot.slane %v2712_v8, %v4429_v43  ;;  %v4065_v43 = vld [vmem:[%s5748_s14 + $0x8] sm:$0xff]  }
 0x4d1   :  { %v2752_v49 = vadd.f32 %v2751_v38, %v2750_v55  ;;  %v2767_v55 = vsel %vm2745_vm14, %v2711_v42, 0.0  ;;  %v2727_v13 = vcombine.high %v2719_v12, %v2719_v12  ;;  %3919 = vmatpush3.bf16.msra.mxu0 %v4065_v43 }
 0x4d2   :  { %v2759_v62 = vsel %vm2745_vm14, %v2694_v34, 0.0  ;;  %v2773_v45 = vsel %vm2745_vm14, %v2726_v22, 0.0  ;;  %3920 = vmatprep.subr.bf16.mxu0 %v5745_v11 }
 0x4d3   :  { %v2754_v18 = vadd.f32 %v2753_v61, %v2752_v49  ;;  %v2769_v49 = vsel %vm2745_vm14, %v2719_v12, 0.0  ;;  %v2771_v51 = vsel %vm2745_vm14, %v2727_v13, 0.0  ;;  %v5753_v12 = vld [vmem:[#allocation49_spill] sm:$0xff] }
 0x4d5   :  { %v2756_v46 = vadd.f32 %v2755_v20, %v2754_v18  ;;  %v2728_v18 = vcombine.high %v2726_v22, %v2726_v22  ;;  %3921 = vmatpush3.bf16.msra.mxu0 %v4066_v21 }
 0x4d6   :  { %3932 = vmatprep.subr.bf16.mxu0 %v5745_v11 }
 0x4d7   :  { %v2758_v52 = vadd.f32 %v2757_v32, %v2756_v46  ;;  %v2775_v20 = vsel %vm2745_vm14, %v2728_v18, 0.0 }
 0x4d9   :  { %v2760_v19 = vadd.f32 %v2759_v62, %v2758_v52  ;;  %v3633_v62 = vmul.f32 -1.442695, %v5749_v30  ;;  %v3686_v30 = vld [vmem:[%s5757_s19] ss:$0 sm:$0xff] }
 0x4db   :  { %v2762_v9 = vadd.f32 %v2761_v27, %v2760_v19  ;;  %v5750_v19 = vld [vmem:[#allocation41_spill] sm:$0xff]  ;;  %4073 = vpow2.f32 %v3633_v62 }
 0x4dc   :  { %v3635_v27 = vmul.f32 -1.442695, %v5750_v19  ;;  %v5760_v62 = vld [vmem:[#allocation53_spill] sm:$0xff] }
 0x4dd   :  { %v2764_v60 = vadd.f32 %v2763_v5, %v2762_v9  ;;  %v5751_v9 = vld [vmem:[#allocation50_spill] sm:$0xff]  ;;  %v3640_v19 = vmul.f32 -1.442695, %v5760_v62 }
 0x4de   :  { %4075 = vpow2.f32 %v3635_v27  ;;  %v3637_v42 = vmul.f32 -1.442695, %v5751_v9  ;;  %v5752_v5 = vld [vmem:[#allocation42_spill] sm:$0xff]  ;;  %v3647_v9 = vmul.f32 -1.442695, %v5025_v15 }
 0x4df   :  { %v2766_v29 = vadd.f32 %v2765_v44, %v2764_v60  ;;  %v3632_v8 = vmul.f32 -1.442695, %v5752_v5  ;;  %v3639_v60 = vmul.f32 -1.442695, %v5753_v12  ;;  %v5754_v44 = vld [vmem:[#allocation43_spill] sm:$0xff] }
 0x4e0   :  { %4077 = vpow2.f32 %v3637_v42 }
 0x4e1   :  { %v2768_v38 = vadd.f32 %v2767_v55, %v2766_v29  ;;  %v3634_v29 = vmul.f32 -1.442695, %v5754_v44  ;;  %4079 = vpow2.f32 %v3632_v8  ;;  %v5755_v55 = vld [vmem:[#allocation56_spill] sm:$0xff] }
 0x4e2   :  { %4081 = vpow2.f32 %v3639_v60  ;;  %v3641_v22 = vmul.f32 -1.442695, %v5755_v55  ;;  %v5761_v60 = vld [vmem:[#allocation20_spill] sm:$0xff] }
 0x4e3   :  { %v2770_v61 = vadd.f32 %v2769_v49, %v2768_v38  ;;  %4083 = vpow2.f32 %v3634_v29  ;;  %v5756_v38 = vld [vmem:[#allocation47_spill] sm:$0xff]  ;;  %v5762_v29 = vld [vmem:[#allocation52_spill] sm:$0xff] }
 0x4e4   :  { %v3636_v49 = vmul.f32 -1.442695, %v5756_v38  ;;  %4085 = vpow2.f32 %v3641_v22  ;;  %v3642_v55 = vmul.f32 -1.442695, %v5762_v29 }
 0x4e5   :  { %v2772_v54 = vadd.f32 %v2771_v51, %v2770_v61  ;;  %v5758_v61 = vld [vmem:[#allocation55_spill] sm:$0xff] }
 0x4e6   :  { %v3643_v18 = vmul.f32 -1.442695, %v5758_v61  ;;  %4087 = vpow2.f32 %v3636_v49 }
 0x4e7   :  { %v2774_v34 = vadd.f32 %v2773_v45, %v2772_v54  ;;  %v4203_v45 = vmov 1966171168  }
 0x4e8   :  { %v4074_v13 = vpop.eup %4073  ;;  %4089 = vpow2.f32 %v3643_v18 }
 0x4e9   :  { %v2776_v46 = vadd.f32 %v2775_v20, %v2774_v34  ;;  %v527_v54 = vadd.f32 1.0, %v4074_v13  ;;  %v2841_v34 = vunpack.c.l.s4 %v4203_v45  ;;  %v5759_v20 = vld [vmem:[#allocation46_spill] sm:$0xff] }
 0x4eb   :  { %v2778_v32 = vmul.f32 0.0625, %v2776_v46  ;;  %v4076_v51 = vpop.eup %4075  ;;  %v3638_v46 = vmul.f32 -1.442695, %v5759_v20  ;;  %4091 = vrcp.f32 %v527_v54  ;;  %v2842_v43 = vunpack.c.0.s8 %v2841_v34  ;;  %v5763_v20 = vld [vmem:[#allocation58_spill] sm:$0xff] }
 0x4ec   :  { %v2865_v54 = vsub.s32 0, %v5761_v60 }
 0x4ed   :  { %v2781_v52 = vpack.c.bf16 %v2778_v32, %v2778_v32  ;;  %v529_v32 = vadd.f32 1.0, %v4076_v51  ;;  %v4078_v21 = vpop.eup %4077  ;;  %4093 = vpow2.f32 %v3638_v46  ;;  %v2845_v44 = vsub.s32 %v2842_v43, %v5761_v60 }
 0x4ee   :  { %v4080_v27 = vpop.eup %4079  ;;  %v531_v8 = vadd.f32 1.0, %v4078_v21  ;;  %v3644_v46 = vmul.f32 -1.442695, %v5763_v20 }
 0x4ef   :  { %3915 = vmatmul.mubr.msk.bf16.vlgmr.msra.gmra.mxu1 %vm591_vm5, %v2781_v52  ;;  %v3645_v52 = vmul.f32 -1.442695, %v5039_v6  ;;  %4095 = vrcp.f32 %v529_v32  ;;  %v4082_v5 = vpop.eup %4081  ;;  %v526_v13 = vadd.f32 1.0, %v4080_v27 }
 0x4f0   :  { %3928 = vmatprep.mubr.msk.bf16.mxu1 %vm4202_vm13, %v5745_v11  ;;  %v4084_v22 = vpop.eup %4083  ;;  %v533_v49 = vadd.f32 1.0, %v4082_v5  ;;  %v2862_v5 = vld [vmem:[%s5746_s25] sm:$0xff] }
 0x4f1   :  { %4097 = vpow2.f32 %v3645_v52  ;;  %v4086_v18 = vpop.eup %4085  ;;  %v528_v45 = vadd.f32 1.0, %v4084_v22 }
 0x4f2   :  { %4099 = vpow2.f32 %v3640_v19  ;;  %v535_v21 = vadd.f32 1.0, %v4086_v18 }
 0x4f3   :  { %4101 = vpow2.f32 %v3647_v9  ;;  %v4088_v43 = vpop.eup %4087  ;;  %v5764_v9 = vld [vmem:[#allocation57_spill] sm:$0xff] }
 0x4f4   :  { %4103 = vrcp.f32 %v531_v8  ;;  %v3110_v8 = vpop.permute.xlu0 %3109 }
 0x4f5   :  { %4105 = vpow2.f32 %v3642_v55 }
 0x4f6   :  { %4107 = vrcp.f32 %v526_v13 }
 0x4f7   :  { %4109 = vrcp.f32 %v533_v49 }
 0x4f8   :  { %4111 = vrcp.f32 %v528_v45 }
 0x4f9   :  { %4113 = vpow2.f32 %v3644_v46 }
 0x4fa   :  { %4115 = vrcp.f32 %v535_v21 }
 0x5af   :  { %v2832_v42 = vpop.f32.mrf.mxu1 }
 0x5b0   :  { %v2833_v12 = vadd.f32 %v3686_v30, %v2832_v42  ;;  %v4090_v30 = vpop.eup %4089  ;;  %v3646_v42 = vmul.f32 -1.442695, %v5764_v9 }
 0x5b1   :  { %v3916_v6 = vpop.f32.mrf.mxu1  ;;  %v4092_v27 = vpop.eup %4091  ;;  %v537_v55 = vadd.f32 1.0, %v4090_v30 }
 0x5b2   :  { %v2838_v38 = vmax.f32 %v2833_v12, 0.0  ;;  %v530_v12 = vadd.f32 1.0, %v4088_v43  ;;  %v4094_v29 = vpop.eup %4093  ;;  %4117 = vpow2.f32 %v3646_v42 }
 0x5b3   :  { %v2835_v61 = vpop.f32.mrf.mxu1  ;;  %v4096_v6 = vpop.eup %4095 }
 0x5b4   :  { %v2846_v15 = vrot.slane %v2838_v38, %v2845_v44  ;;  %v5405_v51 = vpack.c.bf16 %v2838_v38, %v2838_v38  ;;  %v4098_v49 = vpop.eup %4097  ;;  %v532_v61 = vadd.f32 1.0, %v4094_v29  ;;  %4119 = vrcp.f32 %v530_v12 }
 0x5b5   :  { %v3917_v34 = vpop.f32.mrf.mxu1  ;;  %4121 = vrcp.f32 %v537_v55  ;;  %v754_v29 = vadd.f32 %v5312_v24, %v5271_v25 }
 0x5b6   :  { %v2847_v32 = vcombine.high %v2846_v15, %v2846_v15  ;;  %v2854_v52 = vrot.slane %v2846_v15, %v2845_v44  ;;  %3432 = vrot.lane.b32.xlu0 %v5405_v51, %s4204_s24  ;;  %v539_v34 = vadd.f32 1.0, %v4098_v49  ;;  %4123 = vrcp.f32 %v532_v61 }
 0x5b7   :  { %v770_v61 = vadd.f32 %v5320_v56, %v5279_v53  ;;  %v759_v53 = vadd.f32 %v5306_v58, %v5265_v47  ;;  %v794_v58 = vadd.f32 %v5326_v59, %v5285_v0 }
 0x5b8   :  { %v2861_v62 = vrot.slane %v2847_v32, %v2845_v44  ;;  %v2866_v19 = vrot.slane %v2854_v52, %v2865_v54  ;;  %4125 = vrcp.f32 %v539_v34  ;;  %v786_v34 = vadd.f32 %v5328_v10, %v5287_v1 }
 0x5b9   :  { %v775_v1 = vadd.f32 %v5314_v35, %v5273_v17  ;;  %v810_v35 = vadd.f32 %v5334_v63, %v5293_v16  ;;  %v799_v63 = vadd.f32 %v5332_v37, %v5291_v3 }
 0x5ba   :  { %v2870_v60 = vrot.slane %v2861_v62, %v2865_v54  ;;  %870 = vrot.lane.b32.xlu0 %v4092_v27, %s4205_s30  ;;  %v2873_v22 = vadd.f32 %v2866_v19, %v2862_v5  ;;  %v3112_v44 = vadd.f32 %v3110_v8, %v2866_v19  ;;  %v4100_v54 = vpop.eup %4099 }
 0x5bb   :  { %v4102_v45 = vpop.eup %4101  ;;  %v534_v32 = vadd.f32 1.0, %v4100_v54 }
 0x5bc   :  { %v2874_v13 = vadd.f32 %v2870_v60, %v2862_v5  ;;  %v3113_v38 = vadd.f32 %v3110_v8, %v2870_v60  ;;  %v4104_v20 = vpop.eup %4103  ;;  %v541_v43 = vadd.f32 1.0, %v4102_v45 }
 0x5bd   :  { %v4106_v46 = vpop.eup %4105  ;;  %4127 = vrcp.f32 %v534_v32 }
 0x5be   :  { %v2879_v18 = vpack.c.bf16 %v2874_v13, %v2873_v22  ;;  %v3119_v15 = vpack.c.bf16 %v3113_v38, %v3112_v44  ;;  %874 = vrot.lane.b32.xlu0 %v4096_v6, %s4205_s30  ;;  %v4108_v52 = vpop.eup %4107  ;;  %v536_v62 = vadd.f32 1.0, %v4106_v46  ;;  %4129 = vrcp.f32 %v541_v43  ;;  %v5431_v22 = vld [vmem:[%s5765_s6] ss:$0 sm:$0xff] }
 0x5bf   :  { %v4110_v21 = vpop.eup %4109  ;;  %v762_v13 = vadd.f32 %v5310_v7, %v5269_v28  ;;  %v821_v44 = vadd.f32 %v5431_v22, %v754_v29  ;;  %v825_v54 = vadd.f32 %v5431_v22, %v770_v61  ;;  %v829_v46 = vadd.f32 %v5431_v22, %v786_v34 }
 0x5c0   :  { %3129 = vrot.lane.b32.xlu1 %v3119_v15, %s4204_s24  ;;  %3923 = vmatmul.mubr.msk.bf16.vlgmr.msra.gmra.mxu0 %vm2151_vm7, %v2879_v18  ;;  %v4112_v30 = vpop.eup %4111  ;;  %4131 = vrcp.f32 %v536_v62  ;;  %v751_v18 = vadd.f32 %v5308_v39, %v5267_v36  ;;  %v778_v15 = vadd.f32 %v5318_v31, %v5277_v2  ;;  %v822_v2 = vadd.f32 %v5431_v22, %v759_v53 }
 0x5c1   :  { %3934 = vmatprep.mubr.msk.bf16.mxu0 %vm4202_vm13, %v5745_v11  ;;  %v4114_v19 = vpop.eup %4113  ;;  %v823_v24 = vadd.f32 %v5431_v22, %v762_v13  ;;  %v837_v49 = vmax.f32 %v821_v44, 0.0  ;;  %v841_v45 = vmax.f32 %v825_v54, 0.0  ;;  %v826_v0 = vadd.f32 %v5431_v22, %v775_v1 }
 0x5c2   :  { %878 = vrot.lane.b32.xlu0 %v4104_v20, %s4205_s30  ;;  %v4116_v27 = vpop.eup %4115  ;;  %v538_v42 = vadd.f32 1.0, %v4114_v19  ;;  %v820_v56 = vadd.f32 %v5431_v22, %v751_v18  ;;  %v827_v39 = vadd.f32 %v5431_v22, %v778_v15  ;;  %v767_v20 = vadd.f32 %v5316_v40, %v5275_v23 }
 0x5c3   :  { %v4118_v9 = vpop.eup %4117  ;;  %v839_v7 = vmax.f32 %v823_v24, 0.0  ;;  %v838_v32 = vmax.f32 %v822_v2, 0.0  ;;  %v831_v23 = vadd.f32 %v5431_v22, %v794_v58  ;;  %v845_v40 = vmax.f32 %v829_v46, 0.0 }
 0x5c4   :  { %868 = vrot.lane.b32.xlu1 %v4108_v52, %s4205_s30  ;;  %v4120_v5 = vpop.eup %4119  ;;  %v540_v12 = vadd.f32 1.0, %v4118_v9  ;;  %4133 = vrcp.f32 %v538_v42  ;;  %v836_v31 = vmax.f32 %v820_v56, 0.0  ;;  %v843_v47 = vmax.f32 %v827_v39, 0.0 }
 0x5c5   :  { %v4122_v8 = vpop.eup %4121  ;;  %v824_v10 = vadd.f32 %v5431_v22, %v767_v20  ;;  %v802_v52 = vadd.f32 %v5336_v4, %v5295_v14  ;;  %v783_v43 = vadd.f32 %v5324_v50, %v5283_v48  ;;  %v847_v17 = vmax.f32 %v831_v23, 0.0 }
 0x5c6   :  { %882 = vrot.lane.b32.xlu0 %v4110_v21, %s4205_s30  ;;  %v4124_v60 = vpop.eup %4123  ;;  %4135 = vrcp.f32 %v540_v12  ;;  %v791_v14 = vadd.f32 %v5322_v26, %v5281_v41  ;;  %v835_v48 = vadd.f32 %v5431_v22, %v810_v35  ;;  %v807_v26 = vadd.f32 %v5330_v33, %v5289_v57 }
 0x5c7   :  { %v4126_v55 = vpop.eup %4125  ;;  %v840_v59 = vmax.f32 %v824_v10, 0.0  ;;  %v833_v21 = vadd.f32 %v5431_v22, %v802_v52  ;;  %v828_v4 = vadd.f32 %v5431_v22, %v783_v43 }
 0x5c8   :  { %872 = vrot.lane.b32.xlu1 %v4112_v30, %s4205_s30  ;;  %v842_v30 = vmax.f32 %v826_v0, 0.0  ;;  %v830_v62 = vadd.f32 %v5431_v22, %v791_v14  ;;  %v851_v19 = vmax.f32 %v835_v48, 0.0  ;;  %v834_v9 = vadd.f32 %v5431_v22, %v807_v26  ;;  %v3689_v48 = vld [vmem:[%s5767_s4] ss:$0 sm:$0xff] }
 0x5c9   :  { %v849_v50 = vmax.f32 %v833_v21, 0.0  ;;  %v844_v16 = vmax.f32 %v828_v4, 0.0 }
 0x5ca   :  { %886 = vrot.lane.b32.xlu0 %v4116_v27, %s4205_s30  ;;  %v4128_v6 = vpop.eup %4127  ;;  %v846_v41 = vmax.f32 %v830_v62, 0.0  ;;  %v832_v27 = vadd.f32 %v5431_v22, %v799_v63  ;;  %v850_v3 = vmax.f32 %v834_v9, 0.0 }
 0x5cb   :  { %v4130_v38 = vpop.eup %4129 }
 0x5cc   :  { %876 = vrot.lane.b32.xlu1 %v4120_v5, %s4205_s30  ;;  %v848_v42 = vmax.f32 %v832_v27, 0.0 }
 0x5cd   :  { %v4132_v25 = vpop.eup %4131 }
 0x5ce   :  { %890 = vrot.lane.b32.xlu0 %v4122_v8, %s4205_s30 }
 0x5d0   :  { %880 = vrot.lane.b32.xlu1 %v4124_v60, %s4205_s30 }
 0x5d1   :  { %v4134_v28 = vpop.eup %4133 }
 0x5d2   :  { %894 = vrot.lane.b32.xlu0 %v4126_v55, %s4205_s30 }
 0x5d3   :  { %v4136_v36 = vpop.eup %4135 }
 0x5d4   :  { %884 = vrot.lane.b32.xlu1 %v4128_v6, %s4205_s30 }
 0x5d6   :  { %898 = vrot.lane.b32.xlu0 %v4130_v38, %s4205_s30 }
 0x5d8   :  { %888 = vrot.lane.b32.xlu1 %v4132_v25, %s4205_s30 }
 0x5da   :  { %934 = vrot.lane.b32.xlu0 %v837_v49, %s4206_s12 }
 0x5dc   :  { %892 = vrot.lane.b32.xlu1 %v4134_v28, %s4205_s30 }
 0x5de   :  { %938 = vrot.lane.b32.xlu0 %v839_v7, %s4206_s12 }
 0x5e0   :  { %896 = vrot.lane.b32.xlu1 %v4136_v36, %s4205_s30 }
 0x5e2   :  { %942 = vrot.lane.b32.xlu0 %v841_v45, %s4206_s12 }
 0x5e4   :  { %932 = vrot.lane.b32.xlu1 %v836_v31, %s4206_s12 }
 0x5e6   :  { %946 = vrot.lane.b32.xlu0 %v843_v47, %s4206_s12 }
 0x5e8   :  { %936 = vrot.lane.b32.xlu1 %v838_v32, %s4206_s12 }
 0x5ea   :  { %950 = vrot.lane.b32.xlu0 %v845_v40, %s4206_s12 }
 0x5ec   :  { %940 = vrot.lane.b32.xlu1 %v840_v59, %s4206_s12 }
 0x5ee   :  { %954 = vrot.lane.b32.xlu0 %v847_v17, %s4206_s12 }
 0x5f0   :  { %944 = vrot.lane.b32.xlu1 %v842_v30, %s4206_s12 }
 0x5f2   :  { %958 = vrot.lane.b32.xlu0 %v849_v50, %s4206_s12 }
 0x5f4   :  { %948 = vrot.lane.b32.xlu1 %v844_v16, %s4206_s12 }
 0x5f6   :  { %962 = vrot.lane.b32.xlu0 %v851_v19, %s4206_s12 }
 0x5f8   :  { %952 = vrot.lane.b32.xlu1 %v846_v41, %s4206_s12  ;;  %v2945_v41 = vld [vmem:[%s5768_s2] sm:$0xff] }
 0x5fc   :  { %956 = vrot.lane.b32.xlu1 %v848_v42, %s4206_s12 }
 0x600   :  { %960 = vrot.lane.b32.xlu1 %v850_v3, %s4206_s12 }
 0x628   :  { %v5500_v37 = vpop.permute.xlu0 %3432 }
 0x62c   :  { %v871_v5 = vpop.permute.xlu0 %870 }
 0x630   :  { %v875_v8 = vpop.permute.xlu0 %874 }
 0x632   :  { %v5502_v12 = vpop.permute.xlu1 %3129 }
 0x634   :  { %v879_v57 = vpop.permute.xlu0 %878 }
 0x636   :  { %v869_v33 = vpop.permute.xlu1 %868 }
 0x638   :  { %v883_v60 = vpop.permute.xlu0 %882 }
 0x63a   :  { %v873_v29 = vpop.permute.xlu1 %872 }
 0x63c   :  { %v887_v55 = vpop.permute.xlu0 %886 }
 0x63e   :  { %v877_v6 = vpop.permute.xlu1 %876 }
 0x640   :  { %v891_v22 = vpop.permute.xlu0 %890 }
 0x642   :  { %v881_v13 = vpop.permute.xlu1 %880 }
 0x644   :  { %v895_v44 = vpop.permute.xlu0 %894 }
 0x646   :  { %v885_v38 = vpop.permute.xlu1 %884 }
 0x648   :  { %v899_v25 = vpop.permute.xlu0 %898 }
 0x64a   :  { %v889_v24 = vpop.permute.xlu1 %888 }
 0x64c   :  { %v935_v49 = vpop.permute.xlu0 %934 }
 0x64d   :  { %v982_v61 = vsel %vm980_vm15, %v871_v5, %v935_v49  ;;  %v2946_v5 = vpack.c.bf16 %v2945_v41, %v2945_v41 }
 0x64e   :  { %999 = vst.msk [vmem:[%s5766_s27 + $0x8] sm:$0xff] %vm997_vm0, %v982_v61  ;;  %v893_v18 = vpop.permute.xlu1 %892  ;;  %v3705_v61 = vld [vmem:[%s5767_s4 + $0x1] ss:$0 sm:$0xff] }
 0x650   :  { %v939_v28 = vpop.permute.xlu0 %938 }
 0x651   :  { %v984_v7 = vsel %vm980_vm15, %v875_v8, %v939_v28  ;;  %v4069_v8 = vld [vmem:[%s5769_s7 + $0x8] sm:$0xff]  }
 0x652   :  { %1001 = vst.msk [vmem:[%s5766_s27 + $0x18] sm:$0xff] %vm997_vm0, %v984_v7  ;;  %v897_v15 = vpop.permute.xlu1 %896 }
 0x654   :  { %v943_v54 = vpop.permute.xlu0 %942 }
 0x655   :  { %v986_v53 = vsel %vm980_vm15, %v879_v57, %v943_v54 }
 0x656   :  { %1003 = vst.msk [vmem:[%s5766_s27 + $0x28] sm:$0xff] %vm997_vm0, %v986_v53  ;;  %v933_v56 = vpop.permute.xlu1 %932  ;;  %v3709_v53 = vld [vmem:[%s5768_s2 + $0x8] sm:$0xff] }
 0x657   :  { %v981_v36 = vsel %vm980_vm15, %v869_v33, %v933_v56 }
 0x658   :  { %998 = vst.msk [vmem:[%s5766_s27] sm:$0xff] %vm997_vm0, %v981_v36  ;;  %v947_v39 = vpop.permute.xlu0 %946 }
 0x659   :  { %v988_v45 = vsel %vm980_vm15, %v883_v60, %v947_v39  ;;  %v4067_v60 = vld [vmem:[%s5748_s14 + $0x18] sm:$0xff]  }
 0x65a   :  { %1005 = vst.msk [vmem:[%s5766_s27 + $0x38] sm:$0xff] %vm997_vm0, %v988_v45  ;;  %v937_v34 = vpop.permute.xlu1 %936 }
 0x65b   :  { %v983_v2 = vsel %vm980_vm15, %v873_v29, %v937_v34  ;;  %v4068_v29 = vld [vmem:[%s5748_s14 + $0x10] sm:$0xff]  }
 0x65c   :  { %1000 = vst.msk [vmem:[%s5766_s27 + $0x10] sm:$0xff] %vm997_vm0, %v983_v2  ;;  %v951_v31 = vpop.permute.xlu0 %950  ;;  %v3191_v2 = vpack.c.bf16 %v3709_v53, %v3709_v53 }
 0x65d   :  { %v990_v20 = vsel %vm980_vm15, %v887_v55, %v951_v31  ;;  %v4070_v55 = vld [vmem:[%s5769_s7] sm:$0xff]  }
 0x65e   :  { %1007 = vst.msk [vmem:[%s5766_s27 + $0x48] sm:$0xff] %vm997_vm0, %v990_v20  ;;  %v941_v47 = vpop.permute.xlu1 %940 }
 0x65f   :  { %v985_v58 = vsel %vm980_vm15, %v877_v6, %v941_v47  ;;  %v4071_v47 = vld [vmem:[%s5770_s11 + $0x8] sm:$0xff]  }
 0x660   :  { %1002 = vst.msk [vmem:[%s5766_s27 + $0x20] sm:$0xff] %vm997_vm0, %v985_v58  ;;  %v955_v46 = vpop.permute.xlu0 %954  ;;  %v4072_v58 = vld [vmem:[%s5770_s11] sm:$0xff]  }
 0x661   :  { %v992_v32 = vsel %vm980_vm15, %v891_v22, %v955_v46  ;;  %v3486_v46 = vld [vmem:[%s5771_s15] sm:$0x3] }
 0x662   :  { %1009 = vst.msk [vmem:[%s5766_s27 + $0x58] sm:$0xff] %vm997_vm0, %v992_v32  ;;  %v945_v1 = vpop.permute.xlu1 %944  ;;  %v3484_v32 = vld [vmem:[%s5772_s16] sm:$0xff] }
 0x663   :  { %v987_v10 = vsel %vm980_vm15, %v881_v13, %v945_v1  ;;  %v3485_v1 = vld [vmem:[%s5772_s16 + $0x8] sm:$0xff] }
 0x664   :  { %1004 = vst.msk [vmem:[%s5766_s27 + $0x30] sm:$0xff] %vm997_vm0, %v987_v10  ;;  %v959_v23 = vpop.permute.xlu0 %958  ;;  %v3501_v10 = vsel %vm3499_vm1, %v3486_v46, 0 }
 0x665   :  { %v994_v40 = vsel %vm980_vm15, %v895_v44, %v959_v23  ;;  %v3487_v23 = vpack.c.bf16 %v3485_v1, %v3484_v32 }
 0x666   :  { %1011 = vst.msk [vmem:[%s5766_s27 + $0x68] sm:$0xff] %vm997_vm0, %v994_v40  ;;  %v949_v52 = vpop.permute.xlu1 %948 }
 0x667   :  { %v989_v0 = vsel %vm980_vm15, %v885_v38, %v949_v52 }
 0x668   :  { %1006 = vst.msk [vmem:[%s5766_s27 + $0x40] sm:$0xff] %vm997_vm0, %v989_v0  ;;  %v963_v59 = vpop.permute.xlu0 %962 }
 0x669   :  { %v996_v43 = vsel %vm980_vm15, %v899_v25, %v963_v59 }
 0x66a   :  { %1013 = vst.msk [vmem:[%s5766_s27 + $0x78] sm:$0xff] %vm997_vm0, %v996_v43  ;;  %v953_v17 = vpop.permute.xlu1 %952 }
 0x66b   :  { %v991_v35 = vsel %vm980_vm15, %v889_v24, %v953_v17 }
 0x66c   :  { %1008 = vst.msk [vmem:[%s5766_s27 + $0x50] sm:$0xff] %vm997_vm0, %v991_v35 }
 0x66e   :  { %v957_v21 = vpop.permute.xlu1 %956 }
 0x66f   :  { %v993_v30 = vsel %vm980_vm15, %v893_v18, %v957_v21 }
 0x670   :  { %1010 = vst.msk [vmem:[%s5766_s27 + $0x60] sm:$0xff] %vm997_vm0, %v993_v30 }
 0x672   :  { %v961_v14 = vpop.permute.xlu1 %960 }
 0x673   :  { %v995_v4 = vsel %vm980_vm15, %v897_v15, %v961_v14 }
 0x674   :  { %1012 = vst.msk [vmem:[%s5766_s27 + $0x70] sm:$0xff] %vm997_vm0, %v995_v4 }
 0x680   :  { %v2936_v50 = vpop.f32.mrf.mxu0 }
 0x681   :  { %v2937_v62 = vadd.f32 %v3689_v48, %v2936_v50 }
 0x682   :  { %v3924_v16 = vpop.f32.mrf.mxu0 }
 0x683   :  { %v2943_v63 = vmax.f32 %v2937_v62, 0.0 }
 0x684   :  { %v2939_v19 = vpop.f32.mrf.mxu0 }
 0x685   :  { %v2947_v26 = vpack.c.bf16 %v2943_v63, %v2943_v63  ;;  %v2940_v27 = vadd.f32 %v3689_v48, %v2939_v19  ;;  %v3718_v19 = vld [vmem:[%s5773_s22] ss:$0 sm:$0xff] }
 0x686   :  { %v3925_v9 = vpop.f32.mrf.mxu0 }
 0x687   :  { %v2944_v42 = vmax.f32 %v2940_v27, 0.0  ;;  %v2953_v3 = vsel %vm361_vm3, %v2947_v26, 0 }
 0x688   :  { %3927 = vmatpush3.bf16.msra.mxu1 %v2953_v3 }
 0x689   :  { %v2948_v57 = vpack.c.bf16 %v2944_v42, %v2944_v42  ;;  %3938 = vmatprep.subr.bf16.mxu1 %v5745_v11 }
 0x68b   :  { %v2996_v33 = vsel %vm361_vm3, %v2948_v57, 0  ;;  %3929 = vmatmul.mubr.msk.bf16.vlgmr.msra.gmra.mxu1 %vm336_vm4, %v2946_v5 }
 0x68c   :  { %3933 = vmatpush3.bf16.msra.mxu0 %v2996_v33  ;;  %3939 = vmatpush3.bf16.msra.mxu1 %v4069_v8 }
 0x68d   :  { %3946 = vmatprep.subr.bf16.mxu0 %v5745_v11  ;;  %3940 = vmatprep.subr.bf16.mxu1 %v5745_v11 }
 0x68e   :  { %3942 = vmatprep.mubr.msk.bf16.mxu1 %vm4202_vm13, %v5745_v11 }
 0x68f   :  { %3935 = vmatmul.mubr.msk.bf16.vlgmr.msra.gmra.mxu0 %vm336_vm4, %v2946_v5 }
 0x690   :  { %3947 = vmatpush3.bf16.msra.mxu0 %v4067_v60  ;;  %3950 = vmatprep.mubr.msk.bf16.mxu0 %vm4202_vm13, %v5745_v11 }
 0x691   :  { %3948 = vmatprep.subr.bf16.mxu0 %v5745_v11  ;;  %3941 = vmatpush3.bf16.msra.mxu1 %v4070_v55 }
 0x692   :  { %3954 = vmatprep.subr.bf16.mxu1 %v5745_v11 }
 0x694   :  { %3949 = vmatpush3.bf16.msra.mxu0 %v4068_v29 }
 0x695   :  { %3960 = vmatprep.subr.bf16.mxu0 %v5745_v11 }
 0x697   :  { %3951 = vmatmul.mubr.msk.bf16.vlgmr.msra.gmra.mxu0 %vm2151_vm7, %v5502_v12 }
 0x698   :  { %3962 = vmatprep.mubr.msk.bf16.mxu0 %vm4202_vm13, %v5745_v11 }
 0x74b   :  { %v2989_v6 = vpop.f32.mrf.mxu1 }
 0x74c   :  { %3338 = vrot.lane.b32.xlu0 %v2989_v6, %s4207_s10 }
 0x74d   :  { %v3930_v22 = vpop.f32.mrf.mxu1 }
 0x74f   :  { %v3032_v13 = vpop.f32.mrf.mxu0  ;;  %v2992_v44 = vpop.f32.mrf.mxu1 }
 0x750   :  { %v3042_v38 = vpack.c.bf16 %v3032_v13, %v2989_v6  ;;  %3340 = vrot.lane.b32.xlu1 %v3032_v13, %s4207_s10 }
 0x751   :  { %v3936_v25 = vpop.f32.mrf.mxu0  ;;  %v3931_v24 = vpop.f32.mrf.mxu1 }
 0x752   :  { %3943 = vmatmul.mubr.msk.bf16.vlgmr.msra.gmra.mxu1 %vm2151_vm7, %v3042_v38 }
 0x753   :  { %v3035_v12 = vpop.f32.mrf.mxu0  ;;  %3956 = vmatprep.mubr.msk.bf16.mxu1 %vm4202_vm13, %v5745_v11 }
 0x755   :  { %v3937_v49 = vpop.f32.mrf.mxu0 }
 0x757   :  { %v3180_v18 = vpop.f32.mrf.mxu0 }
 0x758   :  { %v3181_v28 = vadd.f32 %v3705_v61, %v3180_v18 }
 0x759   :  { %v3952_v7 = vpop.f32.mrf.mxu0 }
 0x75a   :  { %v3187_v15 = vmax.f32 %v3181_v28, 0.0 }
 0x75b   :  { %v3183_v54 = vpop.f32.mrf.mxu0 }
 0x75c   :  { %v3192_v56 = vpack.c.bf16 %v3187_v15, %v3187_v15  ;;  %v3184_v36 = vadd.f32 %v3705_v61, %v3183_v54 }
 0x75d   :  { %v3953_v39 = vpop.f32.mrf.mxu0 }
 0x75e   :  { %v3188_v45 = vmax.f32 %v3184_v36, 0.0  ;;  %v3198_v34 = vsel %vm361_vm3, %v3192_v56, 0 }
 0x75f   :  { %3955 = vmatpush3.bf16.msra.mxu1 %v3198_v34 }
 0x760   :  { %v3193_v31 = vpack.c.bf16 %v3188_v45, %v3188_v45  ;;  %3966 = vmatprep.subr.bf16.mxu1 %v5745_v11 }
 0x762   :  { %v3241_v20 = vsel %vm361_vm3, %v3193_v31, 0  ;;  %3957 = vmatmul.mubr.msk.bf16.vlgmr.msra.gmra.mxu1 %vm336_vm4, %v3191_v2 }
 0x763   :  { %3961 = vmatpush3.bf16.msra.mxu0 %v3241_v20  ;;  %3967 = vmatpush3.bf16.msra.mxu1 %v4069_v8  ;;  %v3695_v8 = vld [vmem:[%s5774_s23] ss:$0 sm:$0xff] }
 0x764   :  { %3974 = vmatprep.subr.bf16.mxu0 %v5745_v11  ;;  %3968 = vmatprep.subr.bf16.mxu1 %v5745_v11 }
 0x765   :  { %3970 = vmatprep.mubr.msk.bf16.mxu1 %vm4202_vm13, %v5745_v11 }
 0x766   :  { %3963 = vmatmul.mubr.msk.bf16.vlgmr.msra.gmra.mxu0 %vm336_vm4, %v3191_v2 }
 0x767   :  { %3975 = vmatpush3.bf16.msra.mxu0 %v4071_v47  ;;  %3978 = vmatprep.mubr.msk.bf16.mxu0 %vm4202_vm13, %v5745_v11 }
 0x768   :  { %3976 = vmatprep.subr.bf16.mxu0 %v5745_v11  ;;  %3969 = vmatpush3.bf16.msra.mxu1 %v4070_v55 }
 0x769   :  { %3982 = vmatprep.subr.bf16.mxu1 %v5745_v11 }
 0x76b   :  { %3977 = vmatpush3.bf16.msra.mxu0 %v4072_v58 }
 0x76c   :  { %3990 = vmatprep.subr.bf16.mxu0 %v5745_v11 }
 0x76e   :  { %3979 = vmatmul.mubr.msk.bf16.vlgmr.msra.gmra.mxu0 %vm2151_vm7, %v5405_v51 }
 0x76f   :  { %3992 = vmatprep.mubr.msk.bf16.mxu0 %vm4202_vm13, %v5745_v11  ;;  %3991 = vmatpush3.bf16.msra.mxu0 %v3501_v10 }
 0x776   :  { %3993 = vmatmul.mubr.msk.bf16.vlgmr.msra.gmra.mxu0 %vm3495_vm2, %v3487_v23 }
 0x812   :  { %v5604_v40 = vpop.f32.mrf.mxu1 }
 0x814   :  { %v3944_v52 = vpop.f32.mrf.mxu1 }
 0x816   :  { %v5606_v0 = vpop.f32.mrf.mxu1 }
 0x818   :  { %v3945_v59 = vpop.f32.mrf.mxu1 }
 0x822   :  { %v3234_v43 = vpop.f32.mrf.mxu1 }
 0x823   :  { %3346 = vrot.lane.b32.xlu1 %v3234_v43, %s4208_s18 }
 0x824   :  { %v3958_v51 = vpop.f32.mrf.mxu1 }
 0x826   :  { %v3277_v17 = vpop.f32.mrf.mxu0  ;;  %v3237_v35 = vpop.f32.mrf.mxu1 }
 0x827   :  { %v3283_v21 = vpack.c.bf16 %v3277_v17, %v3234_v43 }
 0x828   :  { %v3964_v30 = vpop.f32.mrf.mxu0  ;;  %v3959_v14 = vpop.f32.mrf.mxu1 }
 0x829   :  { %3971 = vmatmul.mubr.msk.bf16.vlgmr.msra.gmra.mxu1 %vm2151_vm7, %v3283_v21 }
 0x82a   :  { %v3280_v4 = vpop.f32.mrf.mxu0  ;;  %3983 = vmatpush3.bf16.msra.mxu1 %v4071_v47  ;;  %3986 = vmatprep.mubr.msk.bf16.mxu1 %vm4202_vm13, %v5745_v11 }
 0x82b   :  { %3984 = vmatprep.subr.bf16.mxu1 %v5745_v11 }
 0x82c   :  { %v3965_v48 = vpop.f32.mrf.mxu0 }
 0x82e   :  { %v5613_v50 = vpop.f32.mrf.mxu0  ;;  %3985 = vmatpush3.bf16.msra.mxu1 %v4072_v58 }
 0x830   :  { %v3980_v62 = vpop.f32.mrf.mxu0 }
 0x831   :  { %3987 = vmatmul.mubr.msk.bf16.vlgmr.msra.gmra.mxu1 %vm2151_vm7, %v5500_v37 }
 0x832   :  { %v3428_v16 = vpop.f32.mrf.mxu0 }
 0x834   :  { %v3981_v63 = vpop.f32.mrf.mxu0 }
 0x836   :  { %v3537_v41 = vpop.f32.mrf.mxu0 }
 0x837   :  { %v3538_v26 = vadd.f32 %v3718_v19, %v3537_v41 }
 0x838   :  { %v3994_v27 = vpop.f32.mrf.mxu0 }
 0x839   :  { %v3544_v9 = vmax.f32 %v3538_v26, 0.0 }
 0x83a   :  { %v3540_v42 = vpop.f32.mrf.mxu0 }
 0x83b   :  { %3546 = vst.msk [vmem:[#allocation2] sm:$0xff] %vm591_vm5, %v3544_v9  ;;  %v3541_v11 = vadd.f32 %v3718_v19, %v3540_v42 }
 0x83c   :  { %v3995_v3 = vpop.f32.mrf.mxu0 }
 0x83d   :  { %v3545_v5 = vmax.f32 %v3541_v11, 0.0 }
 0x83f   :  { %3547 = vst.msk [vmem:[#allocation2 + $0x8] sm:$0xff] %vm591_vm5, %v3545_v5 }
 0x8e9   :  { %v3321_v57 = vpop.f32.mrf.mxu1 }
 0x8ea   :  { %v3322_v37 = vadd.f32 %v3695_v8, %v3321_v57 }
 0x8eb   :  { %v3972_v33 = vpop.f32.mrf.mxu1 }
 0x8ec   :  { %4148 = shalt.err (!%p4145_p4)
}
 0x8ed   :  { %s4210_s1 = smov 128   ;;  %s5775_s5 = sld [smem:[#allocation16_spill]]  ;;  %v3324_v60 = vpop.f32.mrf.mxu1  ;;  %v3341_v24 = vpop.permute.xlu1 %3340  ;;  %vm3352_vm3 = vcmask 23552   ;;  %v3100_v49 = vadd.f32 %v3695_v8, %v5604_v40  ;;  %vm3355_vm4 = vcmask 48128   ;;  %vm3358_vm5 = vcmask 310272  }
 0x8ee   :  { %3567 = dma.vmem_to_hbm [thread:$0]  %s3562_s13, 256, %s4380_s20, [#allocation3], %s4210_s1, %s4210_s1, %s4193_s0   ;;  %v3325_v29 = vadd.f32 %v3695_v8, %v3324_v60  ;;  %v3339_v12 = vpop.permute.xlu0 %3338  ;;  %vm3361_vm6 = vcmask 572416   ;;  %v3103_v15 = vadd.f32 %v3695_v8, %v5606_v0  ;;  %vm3482_vm7 = vcmask 41984  }
 0x8ef   :  { %s4211_s17 = smov 3   ;;  %v3973_v55 = vpop.f32.mrf.mxu1 }
 0x8f0   :  { %3330 = vrot.lane.b32.xlu0 %v3322_v37, %s4211_s17  ;;  %3332 = vrot.lane.b32.xlu1 %v3325_v29, %s4211_s17 }
 0x8f1   :  { %v3471_v22 = vpop.f32.mrf.mxu1  ;;  %v3347_v61 = vpop.permute.xlu1 %3346 }
 0x8f3   :  { %v3713_v6 = vld [vmem:[%s5775_s5] ss:$0 sm:$0xff]  ;;  %v3988_v44 = vpop.f32.mrf.mxu1 }
 0x8f4   :  { %3348 = vrot.lane.b32.xlu0 %v3277_v17, %s4208_s18  ;;  %v3472_v13 = vadd.f32 %v3713_v6, %v3471_v22  ;;  %v3426_v45 = vadd.f32 %v3713_v6, %v5613_v50 }
 0x8f5   :  { %v3474_v38 = vpop.f32.mrf.mxu1 }
 0x8f6   :  { %3478 = vrot.lane.b32.xlu1 %v3472_v13, %s4211_s17 }
 0x8f7   :  { %v3989_v25 = vpop.f32.mrf.mxu1 }
 0x962   :  { %v3331_v18 = vpop.permute.xlu0 %3330  ;;  %v3333_v53 = vpop.permute.xlu1 %3332 }
 0x963   :  { %v3353_v28 = vsel %vm3352_vm3, %v3100_v49, %v3331_v18  ;;  %v3354_v56 = vsel %vm3352_vm3, %v3103_v15, %v3333_v53 }
 0x964   :  { %v3356_v7 = vsel %vm3355_vm4, %v3353_v28, %v3339_v12  ;;  %v3357_v36 = vsel %vm3355_vm4, %v3354_v56, %v3341_v24 }
 0x965   :  { %v3359_v54 = vsel %vm3358_vm5, %v3356_v7, %v3347_v61 }
 0x966   :  { %3362 = vst.msk [vmem:[%s4370_s9] sm:$0xff] %vm3361_vm6, %v3359_v54  ;;  %v3349_v39 = vpop.permute.xlu0 %3348 }
 0x967   :  { %v3360_v34 = vsel %vm3358_vm5, %v3357_v36, %v3349_v39 }
 0x968   :  { %3363 = vst.msk [vmem:[%s4370_s9 + $0x8] sm:$0xff] %vm3361_vm6, %v3360_v34  ;;  %v3479_v2 = vpop.permute.xlu1 %3478 }
 0x969   :  { %v3481_v31 = vsel %vm3352_vm3, %v3426_v45, %v3479_v2 }
 0x96a   :  { %3483 = vst.msk [vmem:[%s4375_s8] sm:$0x3] %vm3482_vm7, %v3481_v31 }
 0x96b   :  { %4157 = dma.done.wait [#allocation3], 256  }
 0x96c   :  { %4158 = vsyncadd [#allocation3], 4294967040 }
 0x96d   :  { %3579 = vsyncpa [#allocation3], 1 }

</bundles_post_ra>
